<compile_context>
chip_gen: v7x
topology: tpu7x:2x2x1
jax: 0.10.0
libtpu: 0.0.40
codegen_flags: <defaults>
</compile_context>

<pallas_src>
import functools
import numpy as np
import jax
import jax.numpy as jnp
from jax import lax
from jax.experimental import pallas as pl
from jax.experimental.pallas import tpu as pltpu


# ----------------------------------------------------------------------------
# Fused kernel: implicit-GEMM Conv3d + batch stats + BatchNorm + LeakyReLU
# ----------------------------------------------------------------------------
def _tre_fused_kernel(x_ref, w_ref, mask_ref, gamma_ref, beta_ref, out_ref,
                      shifted_ref, ssum_ref, sssq_ref, *,
                      N, D, H, W, Cin_p, Cout, kD, kH, kW, eps, neg_slope):
    n = pl.program_id(0)
    HW = H * W
    KHW = kH * kW
    Dp = D + kD - 1

    @pl.when(n == 0)
    def _init():
        ssum_ref[...] = jnp.zeros_like(ssum_ref)
        sssq_ref[...] = jnp.zeros_like(sssq_ref)

    # Hoisted once per kernel invocation: per-tap (shift, boundary-mask) pairs and the
    # per-kd weight slabs.  Captured by the loops below as loop constants.
    tap_info = []
    for kh in range(kH):
        dh = kh - (kH - 1) // 2
        for kw in range(kW):
            dw = kw - (kW - 1) // 2
            t = kh * kW + kw
            s = dh * W + dw                               # flat in-plane shift
            m = None
            if dh != 0 or dw != 0:
                m = mask_ref[pl.ds(t, 1), :]              # (1, HW) {0,1} float mask
            tap_info.append((t, s, m))
    wk = [w_ref[kd] for kd in range(kD)]                  # each (Cout, KHW*Cin_p)

    # --- Stage 1: build stacked taps (KHW*Cin_p, HW) once per padded depth plane ----
    def build_plane(p, carry):
        xs = x_ref[p]                                     # (Cin_p, HW) padded plane
        for (t, s, m) in tap_info:
            # st[c, q] == x[c, h+dh, w+dw] for q = h*W + w (0 outside the plane)
            st = xs if s == 0 else pltpu.roll(xs, shift=(-s) % HW, axis=1)
            if m is not None:
                st = st * m
            shifted_ref[p, pl.ds(t * Cin_p, Cin_p), :] = st
        return carry

    lax.fori_loop(0, Dp, build_plane, 0, unroll=True)

    # --- Stage 2: conv for each output plane — kD matmuls with K = KHW*Cin_p --------
    def conv_plane(d, carry):
        acc = jnp.zeros((Cout, HW), dtype=jnp.float32)
        for kd in range(kD):
            acc = acc + jnp.dot(wk[kd], shifted_ref[d + kd],
                                preferred_element_type=jnp.float32)
        # Conv bias intentionally omitted: it cancels exactly under train-mode BN.
        out_ref[n * D + d] = acc                          # dense (Cout, HW) store
        ssum_ref[...] += acc                              # elementwise stat partials
        sssq_ref[...] += acc * acc
        return carry

    lax.fori_loop(0, D, conv_plane, 0, unroll=True)

    # --- Stage 3 (last batch): BatchNorm (batch stats) + LeakyReLU, in place --------
    @pl.when(n == N - 1)
    def _finalize():
        inv_m = 1.0 / float(N * D * HW)
        mean = jnp.sum(ssum_ref[...], axis=1, keepdims=True) * inv_m   # (Cout, 1)
        ex2 = jnp.sum(sssq_ref[...], axis=1, keepdims=True) * inv_m
        # E[x^2] - mean^2 in f32; inputs/accums are all f32 so cancellation is benign
        # at these magnitudes (would need a two-pass variance before moving to bf16).
        var = ex2 - mean * mean                 # biased variance (PyTorch train mode)
        scale = gamma_ref[...] * lax.rsqrt(var + eps)                  # (Cout, 1)
        shift = beta_ref[...] - mean * scale
        scale_b = scale[None, :, :]                                    # (1, Cout, 1)
        shift_b = shift[None, :, :]

        def norm_batch(nn, carry):
            slab = out_ref[pl.ds(nn * D, D)]                           # (D, Cout, HW)
            yv = slab * scale_b + shift_b
            out_ref[pl.ds(nn * D, D)] = jnp.where(yv >= 0.0, yv, neg_slope * yv)
            return carry

        lax.fori_loop(0, N, norm_batch, 0, unroll=True)


# ----------------------------------------------------------------------------
# TREBlock forward
# ----------------------------------------------------------------------------
def tre_block_forward(x, weight, bias, gamma, beta, *, k_size, stride, pad,
                      eps=1e-5, neg_slope=0.01):
    """x: (N, in_ch, D, H, W)  ->  (N, out_ch, D, H, W), float32."""
    del bias  # cancels exactly under training-mode BatchNorm (pure mean shift)
    N, Cin, D, H, W = x.shape
    Cout = weight.shape[0]
    kD, kH, kW = k_size
    pD, pH, pW = pad
    # TODO(synk): general stride / padding would need a strided-window path; this
    # fused kernel covers the stride-1 "same" TREBlock configuration.
    assert stride == (1, 1, 1), "fused kernel supports stride 1 only"
    assert (kD % 2, kH % 2, kW % 2) == (1, 1, 1), "odd kernel sizes only"
    assert (pD, pH, pW) == ((kD - 1) // 2, (kH - 1) // 2, (kW - 1) // 2), \
        "fused kernel supports 'same' padding only"

    HW = H * W
    Dp = D + 2 * pD
    KHW = kH * kW
    Cin_p = ((Cin + 7) // 8) * 8          # pad channels to a full sublane tile

    # Cheap XLA layout pass on the (small) input -- no kD*kH*kW im2col blow-up:
    #   (N, C, D, H, W) -> (N, D+2pD, Cin_p, H*W), depth zero-padded, channels padded
    #   to the sublane tile, H*W lane-dense.
    xr = jnp.transpose(x.astype(jnp.float32), (0, 2, 1, 3, 4)).reshape(N, D, Cin, HW)
    xr = jnp.pad(xr, ((0, 0), (pD, pD), (0, Cin_p - Cin), (0, 0)))

    # Weights: (Cout, Cin, kD, kH, kW) -> (kD, Cout, kH*kW*Cin_p), taps ordered
    # (kh, kw, cin) to match the stacked-tap operand built inside the kernel.
    wr = jnp.transpose(weight.astype(jnp.float32), (2, 0, 3, 4, 1))
    wr = jnp.pad(wr, ((0, 0), (0, 0), (0, 0), (0, 0), (0, Cin_p - Cin)))
    wr = wr.reshape(kD, Cout, KHW * Cin_p)

    g_r = gamma.reshape(Cout, 1).astype(jnp.float32)
    b_r = beta.reshape(Cout, 1).astype(jnp.float32)

    # Static (kh, kw) boundary masks, built once on the host (hoisted out of the
    # kernel entirely): 1.0 where the shifted in-plane tap stays inside H x W.
    pos = np.arange(HW)
    row, col = pos // W, pos % W
    mask_np = np.ones((KHW, HW), np.float32)
    for kh in range(kH):
        dh = kh - (kH - 1) // 2
        for kw in range(kW):
            dw = kw - (kW - 1) // 2
            ok = (row + dh >= 0) & (row + dh < H) & (col + dw >= 0) & (col + dw < W)
            mask_np[kh * kW + kw] = ok.astype(np.float32)
    masks = jnp.asarray(mask_np)

    # Generation-aware VMEM budget (v7x: 64 MiB physical vs 128 MiB on v5e/v6e).
    try:
        vmem_cap = int(getattr(pltpu.get_tpu_info(), "vmem_capacity_bytes",
                               64 * 1024 * 1024))
    except Exception:  # be conservative if the query is unavailable
        vmem_cap = 64 * 1024 * 1024
    vmem_limit = min(32 * 1024 * 1024, vmem_cap // 2)

    # Explicit accounting including double buffers (output block x2 margin, stacked-
    # tap scratch, stats scratch, input slab x2, lane-padded params x2).
    lane = lambda v: max(v, 128)
    resident_bytes = 4 * (
        2 * N * D * Cout * HW
        + Dp * KHW * Cin_p * HW
        + 2 * Cout * HW
        + 2 * Dp * Cin_p * HW
        + 2 * (kD * Cout * lane(KHW * Cin_p) + KHW * lane(HW) + 2 * Cout * 128))
    assert resident_bytes < vmem_limit, (
        "activation too large for the fully-fused single-pass kernel")
    # TODO(synk): tiled two-pass (conv+stats, then BN+LeakyReLU) fallback for shapes
    # whose resident working set exceeds the per-generation VMEM budget.
    # TODO(synk): v7x dual-TensorCore split of the N axis with per-core partial stats.
    # TODO(synk): bf16 x/w feeding the MXU (f32 accumulation) once a two-pass variance
    # guard is in place; single-buffer (pl.Buffered(1)) the constant-index params.

    kernel = functools.partial(
        _tre_fused_kernel, N=N, D=D, H=H, W=W, Cin_p=Cin_p, Cout=Cout,
        kD=kD, kH=kH, kW=kW, eps=eps, neg_slope=neg_slope)

    out = pl.pallas_call(
        kernel,
        out_shape=jax.ShapeDtypeStruct((N * D, Cout, HW), jnp.float32),
        grid_spec=pltpu.PrefetchScalarGridSpec(
            num_scalar_prefetch=0,
            grid=(N,),                                    # D folded into the body
            in_specs=[
                # per-batch padded depth slab (double-buffered across n)
                pl.BlockSpec((None, Dp, Cin_p, HW), lambda n: (n, 0, 0, 0)),
                # resident params (constant block index -> never re-DMA'd)
                pl.BlockSpec((kD, Cout, KHW * Cin_p), lambda n: (0, 0, 0)),
                pl.BlockSpec((KHW, HW), lambda n: (0, 0)),
                pl.BlockSpec((Cout, 1), lambda n: (0, 0)),
                pl.BlockSpec((Cout, 1), lambda n: (0, 0)),
            ],
            # whole output resident across the grid; flushed to HBM exactly once
            out_specs=pl.BlockSpec((N * D, Cout, HW), lambda n: (0, 0, 0)),
            scratch_shapes=[
                pltpu.VMEM((Dp, KHW * Cin_p, HW), jnp.float32),   # stacked taps
                pltpu.VMEM((Cout, HW), jnp.float32),              # running sum
                pltpu.VMEM((Cout, HW), jnp.float32),              # running sum of sq
            ],
        ),
        compiler_params=pltpu.CompilerParams(
            dimension_semantics=("arbitrary",),
            vmem_limit_bytes=vmem_limit),
    )(xr, wr, masks, g_r, b_r)

    # Kernel layout (N*D, Cout, H*W) keeps every store a full (Cout, HW) tile; one
    # small XLA transpose of the final tensor recovers NCDHW.
    return jnp.transpose(out.reshape(N, D, Cout, H, W), (0, 2, 1, 3, 4))


# ----------------------------------------------------------------------------
# Pure-JAX reference (for correctness check)
# ----------------------------------------------------------------------------
def tre_block_reference(x, weight, bias, gamma, beta, *, stride, pad, eps=1e-5):
    y = lax.conv_general_dilated(
        x, weight, window_strides=stride,
        padding=[(p, p) for p in pad],
        dimension_numbers=("NCDHW", "OIDHW", "NCDHW"))
    y = y + bias.reshape(1, -1, 1, 1, 1)
    mean = jnp.mean(y, axis=(0, 2, 3, 4), keepdims=True)
    var = jnp.mean((y - mean) ** 2, axis=(0, 2, 3, 4), keepdims=True)
    yn = (y - mean) * lax.rsqrt(var + eps)
    yn = yn * gamma.reshape(1, -1, 1, 1, 1) + beta.reshape(1, -1, 1, 1, 1)
    return jnp.where(yn >= 0.0, yn, 0.01 * yn)


if __name__ == "__main__":
    # Small shapes consistent with the module: NCDHW input.
    N, in_ch, out_ch = 2, 4, 8
    D, H, W = 8, 16, 16
    k_size = (3, 3, 3)
    stride = (1, 1, 1)
    pad = (1, 1, 1)

    key = jax.random.PRNGKey(0)
    kx, kwt, kb, kg, kbt = jax.random.split(key, 5)

    x = jax.random.normal(kx, (N, in_ch, D, H, W), dtype=jnp.float32)
    fan_in = in_ch * k_size[0] * k_size[1] * k_size[2]
    bound = 1.0 / np.sqrt(fan_in)
    weight = jax.random.uniform(kwt, (out_ch, in_ch, *k_size), jnp.float32,
                                minval=-bound, maxval=bound)
    bias = jax.random.uniform(kb, (out_ch,), jnp.float32, minval=-bound, maxval=bound)
    gamma = 1.0 + 0.1 * jax.random.normal(kg, (out_ch,), dtype=jnp.float32)
    beta = 0.1 * jax.random.normal(kbt, (out_ch,), dtype=jnp.float32)

    fwd = jax.jit(functools.partial(
        tre_block_forward, k_size=k_size, stride=stride, pad=pad))
    out = jax.block_until_ready(fwd(x, weight, bias, gamma, beta))

    ref = jax.block_until_ready(tre_block_reference(
        x, weight, bias, gamma, beta, stride=stride, pad=pad))

    assert out.shape == (N, out_ch, D, H, W), out.shape
    np.testing.assert_allclose(np.asarray(out), np.asarray(ref), rtol=2e-2, atol=2e-2)

    print("KERNEL_OK")
</pallas_src>

<mosaic_0001>
module attributes {stable_mosaic.version = 11 : i64} {
  func.func @_tre_fused_kernel(%arg0: i32, %arg1: memref<1x10x8x256xf32, #tpu.memory_space<vmem>>, %arg2: memref<3x8x72xf32, #tpu.memory_space<vmem>>, %arg3: memref<9x256xf32, #tpu.memory_space<vmem>>, %arg4: memref<8x1xf32, #tpu.memory_space<vmem>>, %arg5: memref<8x1xf32, #tpu.memory_space<vmem>>, %arg6: memref<16x8x256xf32, #tpu.memory_space<vmem>>, %arg7: memref<10x72x256xf32, #tpu.memory_space<vmem>>, %arg8: memref<8x256xf32, #tpu.memory_space<vmem>>, %arg9: memref<8x256xf32, #tpu.memory_space<vmem>>) attributes {dimension_semantics = [#tpu.dimension_semantics<arbitrary>], iteration_bounds = array<i64: 2>, scalar_prefetch = 0 : i64, scratch_operands = 3 : i64, tpu.core_type = #tpu.core_type<tc>, window_params = [{transform_indices = @transform_0, window_bounds = array<i64: 1, 10, 8, 256>}, {pipeline_mode = #tpu.pipeline_mode<synchronous>, transform_indices = @transform_1, window_bounds = array<i64: 3, 8, 72>}, {pipeline_mode = #tpu.pipeline_mode<synchronous>, transform_indices = @transform_2, window_bounds = array<i64: 9, 256>}, {pipeline_mode = #tpu.pipeline_mode<synchronous>, transform_indices = @transform_3, window_bounds = array<i64: 8, 1>}, {pipeline_mode = #tpu.pipeline_mode<synchronous>, transform_indices = @transform_4, window_bounds = array<i64: 8, 1>}, {pipeline_mode = #tpu.pipeline_mode<synchronous>, transform_indices = @transform_5, window_bounds = array<i64: 16, 8, 256>}]} {
    %c0_i32 = arith.constant 0 : i32
    %0 = arith.cmpi eq, %arg0, %c0_i32 : i32
    %1 = arith.extui %0 : i1 to i32
    %c0_i32_0 = arith.constant 0 : i32
    %2 = arith.cmpi ne, %1, %c0_i32_0 : i32
    scf.if %2 {
      %cst_497 = arith.constant 0.000000e+00 : f32
      %906 = vector.broadcast %cst_497 : f32 to vector<8x256xf32>
      %c0_498 = arith.constant 0 : index
      %c0_499 = arith.constant 0 : index
      %907 = vector.load %arg8[%c0_498, %c0_499] : memref<8x256xf32, #tpu.memory_space<vmem>>, vector<8x256xf32>
      tpu.vector_store %arg8[%c0_498, %c0_499], %906 {strides = array<i32>} : memref<8x256xf32, #tpu.memory_space<vmem>>, vector<8x256xf32>,
      %cst_500 = arith.constant 0.000000e+00 : f32
      %908 = vector.broadcast %cst_500 : f32 to vector<8x256xf32>
      %c0_501 = arith.constant 0 : index
      %c0_502 = arith.constant 0 : index
      %909 = vector.load %arg9[%c0_501, %c0_502] : memref<8x256xf32, #tpu.memory_space<vmem>>, vector<8x256xf32>
      tpu.vector_store %arg9[%c0_501, %c0_502], %908 {strides = array<i32>} : memref<8x256xf32, #tpu.memory_space<vmem>>, vector<8x256xf32>,
    } else {
    }
    %c0 = arith.constant 0 : index
    %c0_1 = arith.constant 0 : index
    %3 = vector.load %arg3[%c0, %c0_1] : memref<9x256xf32, #tpu.memory_space<vmem>>, vector<1x256xf32>
    %c1 = arith.constant 1 : index
    %c0_2 = arith.constant 0 : index
    %4 = vector.load %arg3[%c1, %c0_2] : memref<9x256xf32, #tpu.memory_space<vmem>>, vector<1x256xf32>
    %c2 = arith.constant 2 : index
    %c0_3 = arith.constant 0 : index
    %5 = vector.load %arg3[%c2, %c0_3] : memref<9x256xf32, #tpu.memory_space<vmem>>, vector<1x256xf32>
    %c3 = arith.constant 3 : index
    %c0_4 = arith.constant 0 : index
    %6 = vector.load %arg3[%c3, %c0_4] : memref<9x256xf32, #tpu.memory_space<vmem>>, vector<1x256xf32>
    %c5 = arith.constant 5 : index
    %c0_5 = arith.constant 0 : index
    %7 = vector.load %arg3[%c5, %c0_5] : memref<9x256xf32, #tpu.memory_space<vmem>>, vector<1x256xf32>
    %c6 = arith.constant 6 : index
    %c0_6 = arith.constant 0 : index
    %8 = vector.load %arg3[%c6, %c0_6] : memref<9x256xf32, #tpu.memory_space<vmem>>, vector<1x256xf32>
    %c7 = arith.constant 7 : index
    %c0_7 = arith.constant 0 : index
    %9 = vector.load %arg3[%c7, %c0_7] : memref<9x256xf32, #tpu.memory_space<vmem>>, vector<1x256xf32>
    %c8 = arith.constant 8 : index
    %c0_8 = arith.constant 0 : index
    %10 = vector.load %arg3[%c8, %c0_8] : memref<9x256xf32, #tpu.memory_space<vmem>>, vector<1x256xf32>
    %c0_9 = arith.constant 0 : index
    %c0_10 = arith.constant 0 : index
    %c0_11 = arith.constant 0 : index
    %11 = vector.load %arg2[%c0_9, %c0_10, %c0_11] : memref<3x8x72xf32, #tpu.memory_space<vmem>>, vector<1x8x72xf32>
    %12 = vector.shape_cast %11 : vector<1x8x72xf32> to vector<8x72xf32>
    %c1_12 = arith.constant 1 : index
    %c0_13 = arith.constant 0 : index
    %c0_14 = arith.constant 0 : index
    %13 = vector.load %arg2[%c1_12, %c0_13, %c0_14] : memref<3x8x72xf32, #tpu.memory_space<vmem>>, vector<1x8x72xf32>
    %14 = vector.shape_cast %13 : vector<1x8x72xf32> to vector<8x72xf32>
    %c2_15 = arith.constant 2 : index
    %c0_16 = arith.constant 0 : index
    %c0_17 = arith.constant 0 : index
    %15 = vector.load %arg2[%c2_15, %c0_16, %c0_17] : memref<3x8x72xf32, #tpu.memory_space<vmem>>, vector<1x8x72xf32>
    %16 = vector.shape_cast %15 : vector<1x8x72xf32> to vector<8x72xf32>
    %c0_i32_18 = arith.constant 0 : i32
    %c0_19 = arith.constant 0 : index
    %17 = arith.index_cast %c0_i32_18 : i32 to index
    %c0_20 = arith.constant 0 : index
    %c0_21 = arith.constant 0 : index
    %18 = vector.load %arg1[%c0_19, %17, %c0_20, %c0_21] : memref<1x10x8x256xf32, #tpu.memory_space<vmem>>, vector<1x1x8x256xf32>
    %19 = vector.shape_cast %18 : vector<1x1x8x256xf32> to vector<8x256xf32>
    %c17_i32 = arith.constant 17 : i32
    %20 = tpu.dynamic_rotate %19 by %c17_i32 dim 1 : vector<8x256xf32>, i32 -> vector<8x256xf32>
    %21 = vector.broadcast %3 : vector<1x256xf32> to vector<8x256xf32>
    %22 = arith.mulf %20, %21 : vector<8x256xf32>
    %23 = arith.index_cast %c0_i32_18 : i32 to index
    %c0_22 = arith.constant 0 : index
    %c0_23 = arith.constant 0 : index
    %24 = vector.load %arg7[%23, %c0_22, %c0_23] : memref<10x72x256xf32, #tpu.memory_space<vmem>>, vector<1x8x256xf32>
    %25 = vector.shape_cast %24 : vector<1x8x256xf32> to vector<8x256xf32>
    %26 = vector.shape_cast %22 : vector<8x256xf32> to vector<1x8x256xf32>
    tpu.vector_store %arg7[%23, %c0_22, %c0_23], %26 {strides = array<i32>} : memref<10x72x256xf32, #tpu.memory_space<vmem>>, vector<1x8x256xf32>,
    %c16_i32 = arith.constant 16 : i32
    %27 = tpu.dynamic_rotate %19 by %c16_i32 dim 1 : vector<8x256xf32>, i32 -> vector<8x256xf32>
    %28 = vector.broadcast %4 : vector<1x256xf32> to vector<8x256xf32>
    %29 = arith.mulf %27, %28 : vector<8x256xf32>
    %30 = arith.index_cast %c0_i32_18 : i32 to index
    %c8_24 = arith.constant 8 : index
    %c0_25 = arith.constant 0 : index
    %31 = vector.load %arg7[%30, %c8_24, %c0_25] : memref<10x72x256xf32, #tpu.memory_space<vmem>>, vector<1x8x256xf32>
    %32 = vector.shape_cast %31 : vector<1x8x256xf32> to vector<8x256xf32>
    %33 = vector.shape_cast %29 : vector<8x256xf32> to vector<1x8x256xf32>
    tpu.vector_store %arg7[%30, %c8_24, %c0_25], %33 {strides = array<i32>} : memref<10x72x256xf32, #tpu.memory_space<vmem>>, vector<1x8x256xf32>,
    %c15_i32 = arith.constant 15 : i32
    %34 = tpu.dynamic_rotate %19 by %c15_i32 dim 1 : vector<8x256xf32>, i32 -> vector<8x256xf32>
    %35 = vector.broadcast %5 : vector<1x256xf32> to vector<8x256xf32>
    %36 = arith.mulf %34, %35 : vector<8x256xf32>
    %37 = arith.index_cast %c0_i32_18 : i32 to index
    %c16 = arith.constant 16 : index
    %c0_26 = arith.constant 0 : index
    %38 = vector.load %arg7[%37, %c16, %c0_26] : memref<10x72x256xf32, #tpu.memory_space<vmem>>, vector<1x8x256xf32>
    %39 = vector.shape_cast %38 : vector<1x8x256xf32> to vector<8x256xf32>
    %40 = vector.shape_cast %36 : vector<8x256xf32> to vector<1x8x256xf32>
    tpu.vector_store %arg7[%37, %c16, %c0_26], %40 {strides = array<i32>} : memref<10x72x256xf32, #tpu.memory_space<vmem>>, vector<1x8x256xf32>,
    %c1_i32 = arith.constant 1 : i32
    %41 = tpu.dynamic_rotate %19 by %c1_i32 dim 1 : vector<8x256xf32>, i32 -> vector<8x256xf32>
    %42 = vector.broadcast %6 : vector<1x256xf32> to vector<8x256xf32>
    %43 = arith.mulf %41, %42 : vector<8x256xf32>
    %44 = arith.index_cast %c0_i32_18 : i32 to index
    %c24 = arith.constant 24 : index
    %c0_27 = arith.constant 0 : index
    %45 = vector.load %arg7[%44, %c24, %c0_27] : memref<10x72x256xf32, #tpu.memory_space<vmem>>, vector<1x8x256xf32>
    %46 = vector.shape_cast %45 : vector<1x8x256xf32> to vector<8x256xf32>
    %47 = vector.shape_cast %43 : vector<8x256xf32> to vector<1x8x256xf32>
    tpu.vector_store %arg7[%44, %c24, %c0_27], %47 {strides = array<i32>} : memref<10x72x256xf32, #tpu.memory_space<vmem>>, vector<1x8x256xf32>,
    %48 = arith.index_cast %c0_i32_18 : i32 to index
    %c32 = arith.constant 32 : index
    %c0_28 = arith.constant 0 : index
    %49 = vector.load %arg7[%48, %c32, %c0_28] : memref<10x72x256xf32, #tpu.memory_space<vmem>>, vector<1x8x256xf32>
    %50 = vector.shape_cast %49 : vector<1x8x256xf32> to vector<8x256xf32>
    %51 = vector.shape_cast %19 : vector<8x256xf32> to vector<1x8x256xf32>
    tpu.vector_store %arg7[%48, %c32, %c0_28], %51 {strides = array<i32>} : memref<10x72x256xf32, #tpu.memory_space<vmem>>, vector<1x8x256xf32>,
    %c255_i32 = arith.constant 255 : i32
    %52 = tpu.dynamic_rotate %19 by %c255_i32 dim 1 : vector<8x256xf32>, i32 -> vector<8x256xf32>
    %53 = vector.broadcast %7 : vector<1x256xf32> to vector<8x256xf32>
    %54 = arith.mulf %52, %53 : vector<8x256xf32>
    %55 = arith.index_cast %c0_i32_18 : i32 to index
    %c40 = arith.constant 40 : index
    %c0_29 = arith.constant 0 : index
    %56 = vector.load %arg7[%55, %c40, %c0_29] : memref<10x72x256xf32, #tpu.memory_space<vmem>>, vector<1x8x256xf32>
    %57 = vector.shape_cast %56 : vector<1x8x256xf32> to vector<8x256xf32>
    %58 = vector.shape_cast %54 : vector<8x256xf32> to vector<1x8x256xf32>
    tpu.vector_store %arg7[%55, %c40, %c0_29], %58 {strides = array<i32>} : memref<10x72x256xf32, #tpu.memory_space<vmem>>, vector<1x8x256xf32>,
    %c241_i32 = arith.constant 241 : i32
    %59 = tpu.dynamic_rotate %19 by %c241_i32 dim 1 : vector<8x256xf32>, i32 -> vector<8x256xf32>
    %60 = vector.broadcast %8 : vector<1x256xf32> to vector<8x256xf32>
    %61 = arith.mulf %59, %60 : vector<8x256xf32>
    %62 = arith.index_cast %c0_i32_18 : i32 to index
    %c48 = arith.constant 48 : index
    %c0_30 = arith.constant 0 : index
    %63 = vector.load %arg7[%62, %c48, %c0_30] : memref<10x72x256xf32, #tpu.memory_space<vmem>>, vector<1x8x256xf32>
    %64 = vector.shape_cast %63 : vector<1x8x256xf32> to vector<8x256xf32>
    %65 = vector.shape_cast %61 : vector<8x256xf32> to vector<1x8x256xf32>
    tpu.vector_store %arg7[%62, %c48, %c0_30], %65 {strides = array<i32>} : memref<10x72x256xf32, #tpu.memory_space<vmem>>, vector<1x8x256xf32>,
    %c240_i32 = arith.constant 240 : i32
    %66 = tpu.dynamic_rotate %19 by %c240_i32 dim 1 : vector<8x256xf32>, i32 -> vector<8x256xf32>
    %67 = vector.broadcast %9 : vector<1x256xf32> to vector<8x256xf32>
    %68 = arith.mulf %66, %67 : vector<8x256xf32>
    %69 = arith.index_cast %c0_i32_18 : i32 to index
    %c56 = arith.constant 56 : index
    %c0_31 = arith.constant 0 : index
    %70 = vector.load %arg7[%69, %c56, %c0_31] : memref<10x72x256xf32, #tpu.memory_space<vmem>>, vector<1x8x256xf32>
    %71 = vector.shape_cast %70 : vector<1x8x256xf32> to vector<8x256xf32>
    %72 = vector.shape_cast %68 : vector<8x256xf32> to vector<1x8x256xf32>
    tpu.vector_store %arg7[%69, %c56, %c0_31], %72 {strides = array<i32>} : memref<10x72x256xf32, #tpu.memory_space<vmem>>, vector<1x8x256xf32>,
    %c239_i32 = arith.constant 239 : i32
    %73 = tpu.dynamic_rotate %19 by %c239_i32 dim 1 : vector<8x256xf32>, i32 -> vector<8x256xf32>
    %74 = vector.broadcast %10 : vector<1x256xf32> to vector<8x256xf32>
    %75 = arith.mulf %73, %74 : vector<8x256xf32>
    %76 = arith.index_cast %c0_i32_18 : i32 to index
    %c64 = arith.constant 64 : index
    %c0_32 = arith.constant 0 : index
    %77 = vector.load %arg7[%76, %c64, %c0_32] : memref<10x72x256xf32, #tpu.memory_space<vmem>>, vector<1x8x256xf32>
    %78 = vector.shape_cast %77 : vector<1x8x256xf32> to vector<8x256xf32>
    %79 = vector.shape_cast %75 : vector<8x256xf32> to vector<1x8x256xf32>
    tpu.vector_store %arg7[%76, %c64, %c0_32], %79 {strides = array<i32>} : memref<10x72x256xf32, #tpu.memory_space<vmem>>, vector<1x8x256xf32>,
    %c1_i32_33 = arith.constant 1 : i32
    %c0_34 = arith.constant 0 : index
    %80 = arith.index_cast %c1_i32_33 : i32 to index
    %c0_35 = arith.constant 0 : index
    %c0_36 = arith.constant 0 : index
    %81 = vector.load %arg1[%c0_34, %80, %c0_35, %c0_36] : memref<1x10x8x256xf32, #tpu.memory_space<vmem>>, vector<1x1x8x256xf32>
    %82 = vector.shape_cast %81 : vector<1x1x8x256xf32> to vector<8x256xf32>
    %c17_i32_37 = arith.constant 17 : i32
    %83 = tpu.dynamic_rotate %82 by %c17_i32_37 dim 1 : vector<8x256xf32>, i32 -> vector<8x256xf32>
    %84 = vector.broadcast %3 : vector<1x256xf32> to vector<8x256xf32>
    %85 = arith.mulf %83, %84 : vector<8x256xf32>
    %86 = arith.index_cast %c1_i32_33 : i32 to index
    %c0_38 = arith.constant 0 : index
    %c0_39 = arith.constant 0 : index
    %87 = vector.load %arg7[%86, %c0_38, %c0_39] : memref<10x72x256xf32, #tpu.memory_space<vmem>>, vector<1x8x256xf32>
    %88 = vector.shape_cast %87 : vector<1x8x256xf32> to vector<8x256xf32>
    %89 = vector.shape_cast %85 : vector<8x256xf32> to vector<1x8x256xf32>
    tpu.vector_store %arg7[%86, %c0_38, %c0_39], %89 {strides = array<i32>} : memref<10x72x256xf32, #tpu.memory_space<vmem>>, vector<1x8x256xf32>,
    %c16_i32_40 = arith.constant 16 : i32
    %90 = tpu.dynamic_rotate %82 by %c16_i32_40 dim 1 : vector<8x256xf32>, i32 -> vector<8x256xf32>
    %91 = vector.broadcast %4 : vector<1x256xf32> to vector<8x256xf32>
    %92 = arith.mulf %90, %91 : vector<8x256xf32>
    %93 = arith.index_cast %c1_i32_33 : i32 to index
    %c8_41 = arith.constant 8 : index
    %c0_42 = arith.constant 0 : index
    %94 = vector.load %arg7[%93, %c8_41, %c0_42] : memref<10x72x256xf32, #tpu.memory_space<vmem>>, vector<1x8x256xf32>
    %95 = vector.shape_cast %94 : vector<1x8x256xf32> to vector<8x256xf32>
    %96 = vector.shape_cast %92 : vector<8x256xf32> to vector<1x8x256xf32>
    tpu.vector_store %arg7[%93, %c8_41, %c0_42], %96 {strides = array<i32>} : memref<10x72x256xf32, #tpu.memory_space<vmem>>, vector<1x8x256xf32>,
    %c15_i32_43 = arith.constant 15 : i32
    %97 = tpu.dynamic_rotate %82 by %c15_i32_43 dim 1 : vector<8x256xf32>, i32 -> vector<8x256xf32>
    %98 = vector.broadcast %5 : vector<1x256xf32> to vector<8x256xf32>
    %99 = arith.mulf %97, %98 : vector<8x256xf32>
    %100 = arith.index_cast %c1_i32_33 : i32 to index
    %c16_44 = arith.constant 16 : index
    %c0_45 = arith.constant 0 : index
    %101 = vector.load %arg7[%100, %c16_44, %c0_45] : memref<10x72x256xf32, #tpu.memory_space<vmem>>, vector<1x8x256xf32>
    %102 = vector.shape_cast %101 : vector<1x8x256xf32> to vector<8x256xf32>
    %103 = vector.shape_cast %99 : vector<8x256xf32> to vector<1x8x256xf32>
    tpu.vector_store %arg7[%100, %c16_44, %c0_45], %103 {strides = array<i32>} : memref<10x72x256xf32, #tpu.memory_space<vmem>>, vector<1x8x256xf32>,
    %c1_i32_46 = arith.constant 1 : i32
    %104 = tpu.dynamic_rotate %82 by %c1_i32_46 dim 1 : vector<8x256xf32>, i32 -> vector<8x256xf32>
    %105 = vector.broadcast %6 : vector<1x256xf32> to vector<8x256xf32>
    %106 = arith.mulf %104, %105 : vector<8x256xf32>
    %107 = arith.index_cast %c1_i32_33 : i32 to index
    %c24_47 = arith.constant 24 : index
    %c0_48 = arith.constant 0 : index
    %108 = vector.load %arg7[%107, %c24_47, %c0_48] : memref<10x72x256xf32, #tpu.memory_space<vmem>>, vector<1x8x256xf32>
    %109 = vector.shape_cast %108 : vector<1x8x256xf32> to vector<8x256xf32>
    %110 = vector.shape_cast %106 : vector<8x256xf32> to vector<1x8x256xf32>
    tpu.vector_store %arg7[%107, %c24_47, %c0_48], %110 {strides = array<i32>} : memref<10x72x256xf32, #tpu.memory_space<vmem>>, vector<1x8x256xf32>,
    %111 = arith.index_cast %c1_i32_33 : i32 to index
    %c32_49 = arith.constant 32 : index
    %c0_50 = arith.constant 0 : index
    %112 = vector.load %arg7[%111, %c32_49, %c0_50] : memref<10x72x256xf32, #tpu.memory_space<vmem>>, vector<1x8x256xf32>
    %113 = vector.shape_cast %112 : vector<1x8x256xf32> to vector<8x256xf32>
    %114 = vector.shape_cast %82 : vector<8x256xf32> to vector<1x8x256xf32>
    tpu.vector_store %arg7[%111, %c32_49, %c0_50], %114 {strides = array<i32>} : memref<10x72x256xf32, #tpu.memory_space<vmem>>, vector<1x8x256xf32>,
    %c255_i32_51 = arith.constant 255 : i32
    %115 = tpu.dynamic_rotate %82 by %c255_i32_51 dim 1 : vector<8x256xf32>, i32 -> vector<8x256xf32>
    %116 = vector.broadcast %7 : vector<1x256xf32> to vector<8x256xf32>
    %117 = arith.mulf %115, %116 : vector<8x256xf32>
    %118 = arith.index_cast %c1_i32_33 : i32 to index
    %c40_52 = arith.constant 40 : index
    %c0_53 = arith.constant 0 : index
    %119 = vector.load %arg7[%118, %c40_52, %c0_53] : memref<10x72x256xf32, #tpu.memory_space<vmem>>, vector<1x8x256xf32>
    %120 = vector.shape_cast %119 : vector<1x8x256xf32> to vector<8x256xf32>
    %121 = vector.shape_cast %117 : vector<8x256xf32> to vector<1x8x256xf32>
    tpu.vector_store %arg7[%118, %c40_52, %c0_53], %121 {strides = array<i32>} : memref<10x72x256xf32, #tpu.memory_space<vmem>>, vector<1x8x256xf32>,
    %c241_i32_54 = arith.constant 241 : i32
    %122 = tpu.dynamic_rotate %82 by %c241_i32_54 dim 1 : vector<8x256xf32>, i32 -> vector<8x256xf32>
    %123 = vector.broadcast %8 : vector<1x256xf32> to vector<8x256xf32>
    %124 = arith.mulf %122, %123 : vector<8x256xf32>
    %125 = arith.index_cast %c1_i32_33 : i32 to index
    %c48_55 = arith.constant 48 : index
    %c0_56 = arith.constant 0 : index
    %126 = vector.load %arg7[%125, %c48_55, %c0_56] : memref<10x72x256xf32, #tpu.memory_space<vmem>>, vector<1x8x256xf32>
    %127 = vector.shape_cast %126 : vector<1x8x256xf32> to vector<8x256xf32>
    %128 = vector.shape_cast %124 : vector<8x256xf32> to vector<1x8x256xf32>
    tpu.vector_store %arg7[%125, %c48_55, %c0_56], %128 {strides = array<i32>} : memref<10x72x256xf32, #tpu.memory_space<vmem>>, vector<1x8x256xf32>,
    %c240_i32_57 = arith.constant 240 : i32
    %129 = tpu.dynamic_rotate %82 by %c240_i32_57 dim 1 : vector<8x256xf32>, i32 -> vector<8x256xf32>
    %130 = vector.broadcast %9 : vector<1x256xf32> to vector<8x256xf32>
    %131 = arith.mulf %129, %130 : vector<8x256xf32>
    %132 = arith.index_cast %c1_i32_33 : i32 to index
    %c56_58 = arith.constant 56 : index
    %c0_59 = arith.constant 0 : index
    %133 = vector.load %arg7[%132, %c56_58, %c0_59] : memref<10x72x256xf32, #tpu.memory_space<vmem>>, vector<1x8x256xf32>
    %134 = vector.shape_cast %133 : vector<1x8x256xf32> to vector<8x256xf32>
    %135 = vector.shape_cast %131 : vector<8x256xf32> to vector<1x8x256xf32>
    tpu.vector_store %arg7[%132, %c56_58, %c0_59], %135 {strides = array<i32>} : memref<10x72x256xf32, #tpu.memory_space<vmem>>, vector<1x8x256xf32>,
    %c239_i32_60 = arith.constant 239 : i32
    %136 = tpu.dynamic_rotate %82 by %c239_i32_60 dim 1 : vector<8x256xf32>, i32 -> vector<8x256xf32>
    %137 = vector.broadcast %10 : vector<1x256xf32> to vector<8x256xf32>
    %138 = arith.mulf %136, %137 : vector<8x256xf32>
    %139 = arith.index_cast %c1_i32_33 : i32 to index
    %c64_61 = arith.constant 64 : index
    %c0_62 = arith.constant 0 : index
    %140 = vector.load %arg7[%139, %c64_61, %c0_62] : memref<10x72x256xf32, #tpu.memory_space<vmem>>, vector<1x8x256xf32>
    %141 = vector.shape_cast %140 : vector<1x8x256xf32> to vector<8x256xf32>
    %142 = vector.shape_cast %138 : vector<8x256xf32> to vector<1x8x256xf32>
    tpu.vector_store %arg7[%139, %c64_61, %c0_62], %142 {strides = array<i32>} : memref<10x72x256xf32, #tpu.memory_space<vmem>>, vector<1x8x256xf32>,
    %c2_i32 = arith.constant 2 : i32
    %c0_63 = arith.constant 0 : index
    %143 = arith.index_cast %c2_i32 : i32 to index
    %c0_64 = arith.constant 0 : index
    %c0_65 = arith.constant 0 : index
    %144 = vector.load %arg1[%c0_63, %143, %c0_64, %c0_65] : memref<1x10x8x256xf32, #tpu.memory_space<vmem>>, vector<1x1x8x256xf32>
    %145 = vector.shape_cast %144 : vector<1x1x8x256xf32> to vector<8x256xf32>
    %c17_i32_66 = arith.constant 17 : i32
    %146 = tpu.dynamic_rotate %145 by %c17_i32_66 dim 1 : vector<8x256xf32>, i32 -> vector<8x256xf32>
    %147 = vector.broadcast %3 : vector<1x256xf32> to vector<8x256xf32>
    %148 = arith.mulf %146, %147 : vector<8x256xf32>
    %149 = arith.index_cast %c2_i32 : i32 to index
    %c0_67 = arith.constant 0 : index
    %c0_68 = arith.constant 0 : index
    %150 = vector.load %arg7[%149, %c0_67, %c0_68] : memref<10x72x256xf32, #tpu.memory_space<vmem>>, vector<1x8x256xf32>
    %151 = vector.shape_cast %150 : vector<1x8x256xf32> to vector<8x256xf32>
    %152 = vector.shape_cast %148 : vector<8x256xf32> to vector<1x8x256xf32>
    tpu.vector_store %arg7[%149, %c0_67, %c0_68], %152 {strides = array<i32>} : memref<10x72x256xf32, #tpu.memory_space<vmem>>, vector<1x8x256xf32>,
    %c16_i32_69 = arith.constant 16 : i32
    %153 = tpu.dynamic_rotate %145 by %c16_i32_69 dim 1 : vector<8x256xf32>, i32 -> vector<8x256xf32>
    %154 = vector.broadcast %4 : vector<1x256xf32> to vector<8x256xf32>
    %155 = arith.mulf %153, %154 : vector<8x256xf32>
    %156 = arith.index_cast %c2_i32 : i32 to index
    %c8_70 = arith.constant 8 : index
    %c0_71 = arith.constant 0 : index
    %157 = vector.load %arg7[%156, %c8_70, %c0_71] : memref<10x72x256xf32, #tpu.memory_space<vmem>>, vector<1x8x256xf32>
    %158 = vector.shape_cast %157 : vector<1x8x256xf32> to vector<8x256xf32>
    %159 = vector.shape_cast %155 : vector<8x256xf32> to vector<1x8x256xf32>
    tpu.vector_store %arg7[%156, %c8_70, %c0_71], %159 {strides = array<i32>} : memref<10x72x256xf32, #tpu.memory_space<vmem>>, vector<1x8x256xf32>,
    %c15_i32_72 = arith.constant 15 : i32
    %160 = tpu.dynamic_rotate %145 by %c15_i32_72 dim 1 : vector<8x256xf32>, i32 -> vector<8x256xf32>
    %161 = vector.broadcast %5 : vector<1x256xf32> to vector<8x256xf32>
    %162 = arith.mulf %160, %161 : vector<8x256xf32>
    %163 = arith.index_cast %c2_i32 : i32 to index
    %c16_73 = arith.constant 16 : index
    %c0_74 = arith.constant 0 : index
    %164 = vector.load %arg7[%163, %c16_73, %c0_74] : memref<10x72x256xf32, #tpu.memory_space<vmem>>, vector<1x8x256xf32>
    %165 = vector.shape_cast %164 : vector<1x8x256xf32> to vector<8x256xf32>
    %166 = vector.shape_cast %162 : vector<8x256xf32> to vector<1x8x256xf32>
    tpu.vector_store %arg7[%163, %c16_73, %c0_74], %166 {strides = array<i32>} : memref<10x72x256xf32, #tpu.memory_space<vmem>>, vector<1x8x256xf32>,
    %c1_i32_75 = arith.constant 1 : i32
    %167 = tpu.dynamic_rotate %145 by %c1_i32_75 dim 1 : vector<8x256xf32>, i32 -> vector<8x256xf32>
    %168 = vector.broadcast %6 : vector<1x256xf32> to vector<8x256xf32>
    %169 = arith.mulf %167, %168 : vector<8x256xf32>
    %170 = arith.index_cast %c2_i32 : i32 to index
    %c24_76 = arith.constant 24 : index
    %c0_77 = arith.constant 0 : index
    %171 = vector.load %arg7[%170, %c24_76, %c0_77] : memref<10x72x256xf32, #tpu.memory_space<vmem>>, vector<1x8x256xf32>
    %172 = vector.shape_cast %171 : vector<1x8x256xf32> to vector<8x256xf32>
    %173 = vector.shape_cast %169 : vector<8x256xf32> to vector<1x8x256xf32>
    tpu.vector_store %arg7[%170, %c24_76, %c0_77], %173 {strides = array<i32>} : memref<10x72x256xf32, #tpu.memory_space<vmem>>, vector<1x8x256xf32>,
    %174 = arith.index_cast %c2_i32 : i32 to index
    %c32_78 = arith.constant 32 : index
    %c0_79 = arith.constant 0 : index
    %175 = vector.load %arg7[%174, %c32_78, %c0_79] : memref<10x72x256xf32, #tpu.memory_space<vmem>>, vector<1x8x256xf32>
    %176 = vector.shape_cast %175 : vector<1x8x256xf32> to vector<8x256xf32>
    %177 = vector.shape_cast %145 : vector<8x256xf32> to vector<1x8x256xf32>
    tpu.vector_store %arg7[%174, %c32_78, %c0_79], %177 {strides = array<i32>} : memref<10x72x256xf32, #tpu.memory_space<vmem>>, vector<1x8x256xf32>,
    %c255_i32_80 = arith.constant 255 : i32
    %178 = tpu.dynamic_rotate %145 by %c255_i32_80 dim 1 : vector<8x256xf32>, i32 -> vector<8x256xf32>
    %179 = vector.broadcast %7 : vector<1x256xf32> to vector<8x256xf32>
    %180 = arith.mulf %178, %179 : vector<8x256xf32>
    %181 = arith.index_cast %c2_i32 : i32 to index
    %c40_81 = arith.constant 40 : index
    %c0_82 = arith.constant 0 : index
    %182 = vector.load %arg7[%181, %c40_81, %c0_82] : memref<10x72x256xf32, #tpu.memory_space<vmem>>, vector<1x8x256xf32>
    %183 = vector.shape_cast %182 : vector<1x8x256xf32> to vector<8x256xf32>
    %184 = vector.shape_cast %180 : vector<8x256xf32> to vector<1x8x256xf32>
    tpu.vector_store %arg7[%181, %c40_81, %c0_82], %184 {strides = array<i32>} : memref<10x72x256xf32, #tpu.memory_space<vmem>>, vector<1x8x256xf32>,
    %c241_i32_83 = arith.constant 241 : i32
    %185 = tpu.dynamic_rotate %145 by %c241_i32_83 dim 1 : vector<8x256xf32>, i32 -> vector<8x256xf32>
    %186 = vector.broadcast %8 : vector<1x256xf32> to vector<8x256xf32>
    %187 = arith.mulf %185, %186 : vector<8x256xf32>
    %188 = arith.index_cast %c2_i32 : i32 to index
    %c48_84 = arith.constant 48 : index
    %c0_85 = arith.constant 0 : index
    %189 = vector.load %arg7[%188, %c48_84, %c0_85] : memref<10x72x256xf32, #tpu.memory_space<vmem>>, vector<1x8x256xf32>
    %190 = vector.shape_cast %189 : vector<1x8x256xf32> to vector<8x256xf32>
    %191 = vector.shape_cast %187 : vector<8x256xf32> to vector<1x8x256xf32>
    tpu.vector_store %arg7[%188, %c48_84, %c0_85], %191 {strides = array<i32>} : memref<10x72x256xf32, #tpu.memory_space<vmem>>, vector<1x8x256xf32>,
    %c240_i32_86 = arith.constant 240 : i32
    %192 = tpu.dynamic_rotate %145 by %c240_i32_86 dim 1 : vector<8x256xf32>, i32 -> vector<8x256xf32>
    %193 = vector.broadcast %9 : vector<1x256xf32> to vector<8x256xf32>
    %194 = arith.mulf %192, %193 : vector<8x256xf32>
    %195 = arith.index_cast %c2_i32 : i32 to index
    %c56_87 = arith.constant 56 : index
    %c0_88 = arith.constant 0 : index
    %196 = vector.load %arg7[%195, %c56_87, %c0_88] : memref<10x72x256xf32, #tpu.memory_space<vmem>>, vector<1x8x256xf32>
    %197 = vector.shape_cast %196 : vector<1x8x256xf32> to vector<8x256xf32>
    %198 = vector.shape_cast %194 : vector<8x256xf32> to vector<1x8x256xf32>
    tpu.vector_store %arg7[%195, %c56_87, %c0_88], %198 {strides = array<i32>} : memref<10x72x256xf32, #tpu.memory_space<vmem>>, vector<1x8x256xf32>,
    %c239_i32_89 = arith.constant 239 : i32
    %199 = tpu.dynamic_rotate %145 by %c239_i32_89 dim 1 : vector<8x256xf32>, i32 -> vector<8x256xf32>
    %200 = vector.broadcast %10 : vector<1x256xf32> to vector<8x256xf32>
    %201 = arith.mulf %199, %200 : vector<8x256xf32>
    %202 = arith.index_cast %c2_i32 : i32 to index
    %c64_90 = arith.constant 64 : index
    %c0_91 = arith.constant 0 : index
    %203 = vector.load %arg7[%202, %c64_90, %c0_91] : memref<10x72x256xf32, #tpu.memory_space<vmem>>, vector<1x8x256xf32>
    %204 = vector.shape_cast %203 : vector<1x8x256xf32> to vector<8x256xf32>
    %205 = vector.shape_cast %201 : vector<8x256xf32> to vector<1x8x256xf32>
    tpu.vector_store %arg7[%202, %c64_90, %c0_91], %205 {strides = array<i32>} : memref<10x72x256xf32, #tpu.memory_space<vmem>>, vector<1x8x256xf32>,
    %c3_i32 = arith.constant 3 : i32
    %c0_92 = arith.constant 0 : index
    %206 = arith.index_cast %c3_i32 : i32 to index
    %c0_93 = arith.constant 0 : index
    %c0_94 = arith.constant 0 : index
    %207 = vector.load %arg1[%c0_92, %206, %c0_93, %c0_94] : memref<1x10x8x256xf32, #tpu.memory_space<vmem>>, vector<1x1x8x256xf32>
    %208 = vector.shape_cast %207 : vector<1x1x8x256xf32> to vector<8x256xf32>
    %c17_i32_95 = arith.constant 17 : i32
    %209 = tpu.dynamic_rotate %208 by %c17_i32_95 dim 1 : vector<8x256xf32>, i32 -> vector<8x256xf32>
    %210 = vector.broadcast %3 : vector<1x256xf32> to vector<8x256xf32>
    %211 = arith.mulf %209, %210 : vector<8x256xf32>
    %212 = arith.index_cast %c3_i32 : i32 to index
    %c0_96 = arith.constant 0 : index
    %c0_97 = arith.constant 0 : index
    %213 = vector.load %arg7[%212, %c0_96, %c0_97] : memref<10x72x256xf32, #tpu.memory_space<vmem>>, vector<1x8x256xf32>
    %214 = vector.shape_cast %213 : vector<1x8x256xf32> to vector<8x256xf32>
    %215 = vector.shape_cast %211 : vector<8x256xf32> to vector<1x8x256xf32>
    tpu.vector_store %arg7[%212, %c0_96, %c0_97], %215 {strides = array<i32>} : memref<10x72x256xf32, #tpu.memory_space<vmem>>, vector<1x8x256xf32>,
    %c16_i32_98 = arith.constant 16 : i32
    %216 = tpu.dynamic_rotate %208 by %c16_i32_98 dim 1 : vector<8x256xf32>, i32 -> vector<8x256xf32>
    %217 = vector.broadcast %4 : vector<1x256xf32> to vector<8x256xf32>
    %218 = arith.mulf %216, %217 : vector<8x256xf32>
    %219 = arith.index_cast %c3_i32 : i32 to index
    %c8_99 = arith.constant 8 : index
    %c0_100 = arith.constant 0 : index
    %220 = vector.load %arg7[%219, %c8_99, %c0_100] : memref<10x72x256xf32, #tpu.memory_space<vmem>>, vector<1x8x256xf32>
    %221 = vector.shape_cast %220 : vector<1x8x256xf32> to vector<8x256xf32>
    %222 = vector.shape_cast %218 : vector<8x256xf32> to vector<1x8x256xf32>
    tpu.vector_store %arg7[%219, %c8_99, %c0_100], %222 {strides = array<i32>} : memref<10x72x256xf32, #tpu.memory_space<vmem>>, vector<1x8x256xf32>,
    %c15_i32_101 = arith.constant 15 : i32
    %223 = tpu.dynamic_rotate %208 by %c15_i32_101 dim 1 : vector<8x256xf32>, i32 -> vector<8x256xf32>
    %224 = vector.broadcast %5 : vector<1x256xf32> to vector<8x256xf32>
    %225 = arith.mulf %223, %224 : vector<8x256xf32>
    %226 = arith.index_cast %c3_i32 : i32 to index
    %c16_102 = arith.constant 16 : index
    %c0_103 = arith.constant 0 : index
    %227 = vector.load %arg7[%226, %c16_102, %c0_103] : memref<10x72x256xf32, #tpu.memory_space<vmem>>, vector<1x8x256xf32>
    %228 = vector.shape_cast %227 : vector<1x8x256xf32> to vector<8x256xf32>
    %229 = vector.shape_cast %225 : vector<8x256xf32> to vector<1x8x256xf32>
    tpu.vector_store %arg7[%226, %c16_102, %c0_103], %229 {strides = array<i32>} : memref<10x72x256xf32, #tpu.memory_space<vmem>>, vector<1x8x256xf32>,
    %c1_i32_104 = arith.constant 1 : i32
    %230 = tpu.dynamic_rotate %208 by %c1_i32_104 dim 1 : vector<8x256xf32>, i32 -> vector<8x256xf32>
    %231 = vector.broadcast %6 : vector<1x256xf32> to vector<8x256xf32>
    %232 = arith.mulf %230, %231 : vector<8x256xf32>
    %233 = arith.index_cast %c3_i32 : i32 to index
    %c24_105 = arith.constant 24 : index
    %c0_106 = arith.constant 0 : index
    %234 = vector.load %arg7[%233, %c24_105, %c0_106] : memref<10x72x256xf32, #tpu.memory_space<vmem>>, vector<1x8x256xf32>
    %235 = vector.shape_cast %234 : vector<1x8x256xf32> to vector<8x256xf32>
    %236 = vector.shape_cast %232 : vector<8x256xf32> to vector<1x8x256xf32>
    tpu.vector_store %arg7[%233, %c24_105, %c0_106], %236 {strides = array<i32>} : memref<10x72x256xf32, #tpu.memory_space<vmem>>, vector<1x8x256xf32>,
    %237 = arith.index_cast %c3_i32 : i32 to index
    %c32_107 = arith.constant 32 : index
    %c0_108 = arith.constant 0 : index
    %238 = vector.load %arg7[%237, %c32_107, %c0_108] : memref<10x72x256xf32, #tpu.memory_space<vmem>>, vector<1x8x256xf32>
    %239 = vector.shape_cast %238 : vector<1x8x256xf32> to vector<8x256xf32>
    %240 = vector.shape_cast %208 : vector<8x256xf32> to vector<1x8x256xf32>
    tpu.vector_store %arg7[%237, %c32_107, %c0_108], %240 {strides = array<i32>} : memref<10x72x256xf32, #tpu.memory_space<vmem>>, vector<1x8x256xf32>,
    %c255_i32_109 = arith.constant 255 : i32
    %241 = tpu.dynamic_rotate %208 by %c255_i32_109 dim 1 : vector<8x256xf32>, i32 -> vector<8x256xf32>
    %242 = vector.broadcast %7 : vector<1x256xf32> to vector<8x256xf32>
    %243 = arith.mulf %241, %242 : vector<8x256xf32>
    %244 = arith.index_cast %c3_i32 : i32 to index
    %c40_110 = arith.constant 40 : index
    %c0_111 = arith.constant 0 : index
    %245 = vector.load %arg7[%244, %c40_110, %c0_111] : memref<10x72x256xf32, #tpu.memory_space<vmem>>, vector<1x8x256xf32>
    %246 = vector.shape_cast %245 : vector<1x8x256xf32> to vector<8x256xf32>
    %247 = vector.shape_cast %243 : vector<8x256xf32> to vector<1x8x256xf32>
    tpu.vector_store %arg7[%244, %c40_110, %c0_111], %247 {strides = array<i32>} : memref<10x72x256xf32, #tpu.memory_space<vmem>>, vector<1x8x256xf32>,
    %c241_i32_112 = arith.constant 241 : i32
    %248 = tpu.dynamic_rotate %208 by %c241_i32_112 dim 1 : vector<8x256xf32>, i32 -> vector<8x256xf32>
    %249 = vector.broadcast %8 : vector<1x256xf32> to vector<8x256xf32>
    %250 = arith.mulf %248, %249 : vector<8x256xf32>
    %251 = arith.index_cast %c3_i32 : i32 to index
    %c48_113 = arith.constant 48 : index
    %c0_114 = arith.constant 0 : index
    %252 = vector.load %arg7[%251, %c48_113, %c0_114] : memref<10x72x256xf32, #tpu.memory_space<vmem>>, vector<1x8x256xf32>
    %253 = vector.shape_cast %252 : vector<1x8x256xf32> to vector<8x256xf32>
    %254 = vector.shape_cast %250 : vector<8x256xf32> to vector<1x8x256xf32>
    tpu.vector_store %arg7[%251, %c48_113, %c0_114], %254 {strides = array<i32>} : memref<10x72x256xf32, #tpu.memory_space<vmem>>, vector<1x8x256xf32>,
    %c240_i32_115 = arith.constant 240 : i32
    %255 = tpu.dynamic_rotate %208 by %c240_i32_115 dim 1 : vector<8x256xf32>, i32 -> vector<8x256xf32>
    %256 = vector.broadcast %9 : vector<1x256xf32> to vector<8x256xf32>
    %257 = arith.mulf %255, %256 : vector<8x256xf32>
    %258 = arith.index_cast %c3_i32 : i32 to index
    %c56_116 = arith.constant 56 : index
    %c0_117 = arith.constant 0 : index
    %259 = vector.load %arg7[%258, %c56_116, %c0_117] : memref<10x72x256xf32, #tpu.memory_space<vmem>>, vector<1x8x256xf32>
    %260 = vector.shape_cast %259 : vector<1x8x256xf32> to vector<8x256xf32>
    %261 = vector.shape_cast %257 : vector<8x256xf32> to vector<1x8x256xf32>
    tpu.vector_store %arg7[%258, %c56_116, %c0_117], %261 {strides = array<i32>} : memref<10x72x256xf32, #tpu.memory_space<vmem>>, vector<1x8x256xf32>,
    %c239_i32_118 = arith.constant 239 : i32
    %262 = tpu.dynamic_rotate %208 by %c239_i32_118 dim 1 : vector<8x256xf32>, i32 -> vector<8x256xf32>
    %263 = vector.broadcast %10 : vector<1x256xf32> to vector<8x256xf32>
    %264 = arith.mulf %262, %263 : vector<8x256xf32>
    %265 = arith.index_cast %c3_i32 : i32 to index
    %c64_119 = arith.constant 64 : index
    %c0_120 = arith.constant 0 : index
    %266 = vector.load %arg7[%265, %c64_119, %c0_120] : memref<10x72x256xf32, #tpu.memory_space<vmem>>, vector<1x8x256xf32>
    %267 = vector.shape_cast %266 : vector<1x8x256xf32> to vector<8x256xf32>
    %268 = vector.shape_cast %264 : vector<8x256xf32> to vector<1x8x256xf32>
    tpu.vector_store %arg7[%265, %c64_119, %c0_120], %268 {strides = array<i32>} : memref<10x72x256xf32, #tpu.memory_space<vmem>>, vector<1x8x256xf32>,
    %c4_i32 = arith.constant 4 : i32
    %c0_121 = arith.constant 0 : index
    %269 = arith.index_cast %c4_i32 : i32 to index
    %c0_122 = arith.constant 0 : index
    %c0_123 = arith.constant 0 : index
    %270 = vector.load %arg1[%c0_121, %269, %c0_122, %c0_123] : memref<1x10x8x256xf32, #tpu.memory_space<vmem>>, vector<1x1x8x256xf32>
    %271 = vector.shape_cast %270 : vector<1x1x8x256xf32> to vector<8x256xf32>
    %c17_i32_124 = arith.constant 17 : i32
    %272 = tpu.dynamic_rotate %271 by %c17_i32_124 dim 1 : vector<8x256xf32>, i32 -> vector<8x256xf32>
    %273 = vector.broadcast %3 : vector<1x256xf32> to vector<8x256xf32>
    %274 = arith.mulf %272, %273 : vector<8x256xf32>
    %275 = arith.index_cast %c4_i32 : i32 to index
    %c0_125 = arith.constant 0 : index
    %c0_126 = arith.constant 0 : index
    %276 = vector.load %arg7[%275, %c0_125, %c0_126] : memref<10x72x256xf32, #tpu.memory_space<vmem>>, vector<1x8x256xf32>
    %277 = vector.shape_cast %276 : vector<1x8x256xf32> to vector<8x256xf32>
    %278 = vector.shape_cast %274 : vector<8x256xf32> to vector<1x8x256xf32>
    tpu.vector_store %arg7[%275, %c0_125, %c0_126], %278 {strides = array<i32>} : memref<10x72x256xf32, #tpu.memory_space<vmem>>, vector<1x8x256xf32>,
    %c16_i32_127 = arith.constant 16 : i32
    %279 = tpu.dynamic_rotate %271 by %c16_i32_127 dim 1 : vector<8x256xf32>, i32 -> vector<8x256xf32>
    %280 = vector.broadcast %4 : vector<1x256xf32> to vector<8x256xf32>
    %281 = arith.mulf %279, %280 : vector<8x256xf32>
    %282 = arith.index_cast %c4_i32 : i32 to index
    %c8_128 = arith.constant 8 : index
    %c0_129 = arith.constant 0 : index
    %283 = vector.load %arg7[%282, %c8_128, %c0_129] : memref<10x72x256xf32, #tpu.memory_space<vmem>>, vector<1x8x256xf32>
    %284 = vector.shape_cast %283 : vector<1x8x256xf32> to vector<8x256xf32>
    %285 = vector.shape_cast %281 : vector<8x256xf32> to vector<1x8x256xf32>
    tpu.vector_store %arg7[%282, %c8_128, %c0_129], %285 {strides = array<i32>} : memref<10x72x256xf32, #tpu.memory_space<vmem>>, vector<1x8x256xf32>,
    %c15_i32_130 = arith.constant 15 : i32
    %286 = tpu.dynamic_rotate %271 by %c15_i32_130 dim 1 : vector<8x256xf32>, i32 -> vector<8x256xf32>
    %287 = vector.broadcast %5 : vector<1x256xf32> to vector<8x256xf32>
    %288 = arith.mulf %286, %287 : vector<8x256xf32>
    %289 = arith.index_cast %c4_i32 : i32 to index
    %c16_131 = arith.constant 16 : index
    %c0_132 = arith.constant 0 : index
    %290 = vector.load %arg7[%289, %c16_131, %c0_132] : memref<10x72x256xf32, #tpu.memory_space<vmem>>, vector<1x8x256xf32>
    %291 = vector.shape_cast %290 : vector<1x8x256xf32> to vector<8x256xf32>
    %292 = vector.shape_cast %288 : vector<8x256xf32> to vector<1x8x256xf32>
    tpu.vector_store %arg7[%289, %c16_131, %c0_132], %292 {strides = array<i32>} : memref<10x72x256xf32, #tpu.memory_space<vmem>>, vector<1x8x256xf32>,
    %c1_i32_133 = arith.constant 1 : i32
    %293 = tpu.dynamic_rotate %271 by %c1_i32_133 dim 1 : vector<8x256xf32>, i32 -> vector<8x256xf32>
    %294 = vector.broadcast %6 : vector<1x256xf32> to vector<8x256xf32>
    %295 = arith.mulf %293, %294 : vector<8x256xf32>
    %296 = arith.index_cast %c4_i32 : i32 to index
    %c24_134 = arith.constant 24 : index
    %c0_135 = arith.constant 0 : index
    %297 = vector.load %arg7[%296, %c24_134, %c0_135] : memref<10x72x256xf32, #tpu.memory_space<vmem>>, vector<1x8x256xf32>
    %298 = vector.shape_cast %297 : vector<1x8x256xf32> to vector<8x256xf32>
    %299 = vector.shape_cast %295 : vector<8x256xf32> to vector<1x8x256xf32>
    tpu.vector_store %arg7[%296, %c24_134, %c0_135], %299 {strides = array<i32>} : memref<10x72x256xf32, #tpu.memory_space<vmem>>, vector<1x8x256xf32>,
    %300 = arith.index_cast %c4_i32 : i32 to index
    %c32_136 = arith.constant 32 : index
    %c0_137 = arith.constant 0 : index
    %301 = vector.load %arg7[%300, %c32_136, %c0_137] : memref<10x72x256xf32, #tpu.memory_space<vmem>>, vector<1x8x256xf32>
    %302 = vector.shape_cast %301 : vector<1x8x256xf32> to vector<8x256xf32>
    %303 = vector.shape_cast %271 : vector<8x256xf32> to vector<1x8x256xf32>
    tpu.vector_store %arg7[%300, %c32_136, %c0_137], %303 {strides = array<i32>} : memref<10x72x256xf32, #tpu.memory_space<vmem>>, vector<1x8x256xf32>,
    %c255_i32_138 = arith.constant 255 : i32
    %304 = tpu.dynamic_rotate %271 by %c255_i32_138 dim 1 : vector<8x256xf32>, i32 -> vector<8x256xf32>
    %305 = vector.broadcast %7 : vector<1x256xf32> to vector<8x256xf32>
    %306 = arith.mulf %304, %305 : vector<8x256xf32>
    %307 = arith.index_cast %c4_i32 : i32 to index
    %c40_139 = arith.constant 40 : index
    %c0_140 = arith.constant 0 : index
    %308 = vector.load %arg7[%307, %c40_139, %c0_140] : memref<10x72x256xf32, #tpu.memory_space<vmem>>, vector<1x8x256xf32>
    %309 = vector.shape_cast %308 : vector<1x8x256xf32> to vector<8x256xf32>
    %310 = vector.shape_cast %306 : vector<8x256xf32> to vector<1x8x256xf32>
    tpu.vector_store %arg7[%307, %c40_139, %c0_140], %310 {strides = array<i32>} : memref<10x72x256xf32, #tpu.memory_space<vmem>>, vector<1x8x256xf32>,
    %c241_i32_141 = arith.constant 241 : i32
    %311 = tpu.dynamic_rotate %271 by %c241_i32_141 dim 1 : vector<8x256xf32>, i32 -> vector<8x256xf32>
    %312 = vector.broadcast %8 : vector<1x256xf32> to vector<8x256xf32>
    %313 = arith.mulf %311, %312 : vector<8x256xf32>
    %314 = arith.index_cast %c4_i32 : i32 to index
    %c48_142 = arith.constant 48 : index
    %c0_143 = arith.constant 0 : index
    %315 = vector.load %arg7[%314, %c48_142, %c0_143] : memref<10x72x256xf32, #tpu.memory_space<vmem>>, vector<1x8x256xf32>
    %316 = vector.shape_cast %315 : vector<1x8x256xf32> to vector<8x256xf32>
    %317 = vector.shape_cast %313 : vector<8x256xf32> to vector<1x8x256xf32>
    tpu.vector_store %arg7[%314, %c48_142, %c0_143], %317 {strides = array<i32>} : memref<10x72x256xf32, #tpu.memory_space<vmem>>, vector<1x8x256xf32>,
    %c240_i32_144 = arith.constant 240 : i32
    %318 = tpu.dynamic_rotate %271 by %c240_i32_144 dim 1 : vector<8x256xf32>, i32 -> vector<8x256xf32>
    %319 = vector.broadcast %9 : vector<1x256xf32> to vector<8x256xf32>
    %320 = arith.mulf %318, %319 : vector<8x256xf32>
    %321 = arith.index_cast %c4_i32 : i32 to index
    %c56_145 = arith.constant 56 : index
    %c0_146 = arith.constant 0 : index
    %322 = vector.load %arg7[%321, %c56_145, %c0_146] : memref<10x72x256xf32, #tpu.memory_space<vmem>>, vector<1x8x256xf32>
    %323 = vector.shape_cast %322 : vector<1x8x256xf32> to vector<8x256xf32>
    %324 = vector.shape_cast %320 : vector<8x256xf32> to vector<1x8x256xf32>
    tpu.vector_store %arg7[%321, %c56_145, %c0_146], %324 {strides = array<i32>} : memref<10x72x256xf32, #tpu.memory_space<vmem>>, vector<1x8x256xf32>,
    %c239_i32_147 = arith.constant 239 : i32
    %325 = tpu.dynamic_rotate %271 by %c239_i32_147 dim 1 : vector<8x256xf32>, i32 -> vector<8x256xf32>
    %326 = vector.broadcast %10 : vector<1x256xf32> to vector<8x256xf32>
    %327 = arith.mulf %325, %326 : vector<8x256xf32>
    %328 = arith.index_cast %c4_i32 : i32 to index
    %c64_148 = arith.constant 64 : index
    %c0_149 = arith.constant 0 : index
    %329 = vector.load %arg7[%328, %c64_148, %c0_149] : memref<10x72x256xf32, #tpu.memory_space<vmem>>, vector<1x8x256xf32>
    %330 = vector.shape_cast %329 : vector<1x8x256xf32> to vector<8x256xf32>
    %331 = vector.shape_cast %327 : vector<8x256xf32> to vector<1x8x256xf32>
    tpu.vector_store %arg7[%328, %c64_148, %c0_149], %331 {strides = array<i32>} : memref<10x72x256xf32, #tpu.memory_space<vmem>>, vector<1x8x256xf32>,
    %c5_i32 = arith.constant 5 : i32
    %c0_150 = arith.constant 0 : index
    %332 = arith.index_cast %c5_i32 : i32 to index
    %c0_151 = arith.constant 0 : index
    %c0_152 = arith.constant 0 : index
    %333 = vector.load %arg1[%c0_150, %332, %c0_151, %c0_152] : memref<1x10x8x256xf32, #tpu.memory_space<vmem>>, vector<1x1x8x256xf32>
    %334 = vector.shape_cast %333 : vector<1x1x8x256xf32> to vector<8x256xf32>
    %c17_i32_153 = arith.constant 17 : i32
    %335 = tpu.dynamic_rotate %334 by %c17_i32_153 dim 1 : vector<8x256xf32>, i32 -> vector<8x256xf32>
    %336 = vector.broadcast %3 : vector<1x256xf32> to vector<8x256xf32>
    %337 = arith.mulf %335, %336 : vector<8x256xf32>
    %338 = arith.index_cast %c5_i32 : i32 to index
    %c0_154 = arith.constant 0 : index
    %c0_155 = arith.constant 0 : index
    %339 = vector.load %arg7[%338, %c0_154, %c0_155] : memref<10x72x256xf32, #tpu.memory_space<vmem>>, vector<1x8x256xf32>
    %340 = vector.shape_cast %339 : vector<1x8x256xf32> to vector<8x256xf32>
    %341 = vector.shape_cast %337 : vector<8x256xf32> to vector<1x8x256xf32>
    tpu.vector_store %arg7[%338, %c0_154, %c0_155], %341 {strides = array<i32>} : memref<10x72x256xf32, #tpu.memory_space<vmem>>, vector<1x8x256xf32>,
    %c16_i32_156 = arith.constant 16 : i32
    %342 = tpu.dynamic_rotate %334 by %c16_i32_156 dim 1 : vector<8x256xf32>, i32 -> vector<8x256xf32>
    %343 = vector.broadcast %4 : vector<1x256xf32> to vector<8x256xf32>
    %344 = arith.mulf %342, %343 : vector<8x256xf32>
    %345 = arith.index_cast %c5_i32 : i32 to index
    %c8_157 = arith.constant 8 : index
    %c0_158 = arith.constant 0 : index
    %346 = vector.load %arg7[%345, %c8_157, %c0_158] : memref<10x72x256xf32, #tpu.memory_space<vmem>>, vector<1x8x256xf32>
    %347 = vector.shape_cast %346 : vector<1x8x256xf32> to vector<8x256xf32>
    %348 = vector.shape_cast %344 : vector<8x256xf32> to vector<1x8x256xf32>
    tpu.vector_store %arg7[%345, %c8_157, %c0_158], %348 {strides = array<i32>} : memref<10x72x256xf32, #tpu.memory_space<vmem>>, vector<1x8x256xf32>,
    %c15_i32_159 = arith.constant 15 : i32
    %349 = tpu.dynamic_rotate %334 by %c15_i32_159 dim 1 : vector<8x256xf32>, i32 -> vector<8x256xf32>
    %350 = vector.broadcast %5 : vector<1x256xf32> to vector<8x256xf32>
    %351 = arith.mulf %349, %350 : vector<8x256xf32>
    %352 = arith.index_cast %c5_i32 : i32 to index
    %c16_160 = arith.constant 16 : index
    %c0_161 = arith.constant 0 : index
    %353 = vector.load %arg7[%352, %c16_160, %c0_161] : memref<10x72x256xf32, #tpu.memory_space<vmem>>, vector<1x8x256xf32>
    %354 = vector.shape_cast %353 : vector<1x8x256xf32> to vector<8x256xf32>
    %355 = vector.shape_cast %351 : vector<8x256xf32> to vector<1x8x256xf32>
    tpu.vector_store %arg7[%352, %c16_160, %c0_161], %355 {strides = array<i32>} : memref<10x72x256xf32, #tpu.memory_space<vmem>>, vector<1x8x256xf32>,
    %c1_i32_162 = arith.constant 1 : i32
    %356 = tpu.dynamic_rotate %334 by %c1_i32_162 dim 1 : vector<8x256xf32>, i32 -> vector<8x256xf32>
    %357 = vector.broadcast %6 : vector<1x256xf32> to vector<8x256xf32>
    %358 = arith.mulf %356, %357 : vector<8x256xf32>
    %359 = arith.index_cast %c5_i32 : i32 to index
    %c24_163 = arith.constant 24 : index
    %c0_164 = arith.constant 0 : index
    %360 = vector.load %arg7[%359, %c24_163, %c0_164] : memref<10x72x256xf32, #tpu.memory_space<vmem>>, vector<1x8x256xf32>
    %361 = vector.shape_cast %360 : vector<1x8x256xf32> to vector<8x256xf32>
    %362 = vector.shape_cast %358 : vector<8x256xf32> to vector<1x8x256xf32>
    tpu.vector_store %arg7[%359, %c24_163, %c0_164], %362 {strides = array<i32>} : memref<10x72x256xf32, #tpu.memory_space<vmem>>, vector<1x8x256xf32>,
    %363 = arith.index_cast %c5_i32 : i32 to index
    %c32_165 = arith.constant 32 : index
    %c0_166 = arith.constant 0 : index
    %364 = vector.load %arg7[%363, %c32_165, %c0_166] : memref<10x72x256xf32, #tpu.memory_space<vmem>>, vector<1x8x256xf32>
    %365 = vector.shape_cast %364 : vector<1x8x256xf32> to vector<8x256xf32>
    %366 = vector.shape_cast %334 : vector<8x256xf32> to vector<1x8x256xf32>
    tpu.vector_store %arg7[%363, %c32_165, %c0_166], %366 {strides = array<i32>} : memref<10x72x256xf32, #tpu.memory_space<vmem>>, vector<1x8x256xf32>,
    %c255_i32_167 = arith.constant 255 : i32
    %367 = tpu.dynamic_rotate %334 by %c255_i32_167 dim 1 : vector<8x256xf32>, i32 -> vector<8x256xf32>
    %368 = vector.broadcast %7 : vector<1x256xf32> to vector<8x256xf32>
    %369 = arith.mulf %367, %368 : vector<8x256xf32>
    %370 = arith.index_cast %c5_i32 : i32 to index
    %c40_168 = arith.constant 40 : index
    %c0_169 = arith.constant 0 : index
    %371 = vector.load %arg7[%370, %c40_168, %c0_169] : memref<10x72x256xf32, #tpu.memory_space<vmem>>, vector<1x8x256xf32>
    %372 = vector.shape_cast %371 : vector<1x8x256xf32> to vector<8x256xf32>
    %373 = vector.shape_cast %369 : vector<8x256xf32> to vector<1x8x256xf32>
    tpu.vector_store %arg7[%370, %c40_168, %c0_169], %373 {strides = array<i32>} : memref<10x72x256xf32, #tpu.memory_space<vmem>>, vector<1x8x256xf32>,
    %c241_i32_170 = arith.constant 241 : i32
    %374 = tpu.dynamic_rotate %334 by %c241_i32_170 dim 1 : vector<8x256xf32>, i32 -> vector<8x256xf32>
    %375 = vector.broadcast %8 : vector<1x256xf32> to vector<8x256xf32>
    %376 = arith.mulf %374, %375 : vector<8x256xf32>
    %377 = arith.index_cast %c5_i32 : i32 to index
    %c48_171 = arith.constant 48 : index
    %c0_172 = arith.constant 0 : index
    %378 = vector.load %arg7[%377, %c48_171, %c0_172] : memref<10x72x256xf32, #tpu.memory_space<vmem>>, vector<1x8x256xf32>
    %379 = vector.shape_cast %378 : vector<1x8x256xf32> to vector<8x256xf32>
    %380 = vector.shape_cast %376 : vector<8x256xf32> to vector<1x8x256xf32>
    tpu.vector_store %arg7[%377, %c48_171, %c0_172], %380 {strides = array<i32>} : memref<10x72x256xf32, #tpu.memory_space<vmem>>, vector<1x8x256xf32>,
    %c240_i32_173 = arith.constant 240 : i32
    %381 = tpu.dynamic_rotate %334 by %c240_i32_173 dim 1 : vector<8x256xf32>, i32 -> vector<8x256xf32>
    %382 = vector.broadcast %9 : vector<1x256xf32> to vector<8x256xf32>
    %383 = arith.mulf %381, %382 : vector<8x256xf32>
    %384 = arith.index_cast %c5_i32 : i32 to index
    %c56_174 = arith.constant 56 : index
    %c0_175 = arith.constant 0 : index
    %385 = vector.load %arg7[%384, %c56_174, %c0_175] : memref<10x72x256xf32, #tpu.memory_space<vmem>>, vector<1x8x256xf32>
    %386 = vector.shape_cast %385 : vector<1x8x256xf32> to vector<8x256xf32>
    %387 = vector.shape_cast %383 : vector<8x256xf32> to vector<1x8x256xf32>
    tpu.vector_store %arg7[%384, %c56_174, %c0_175], %387 {strides = array<i32>} : memref<10x72x256xf32, #tpu.memory_space<vmem>>, vector<1x8x256xf32>,
    %c239_i32_176 = arith.constant 239 : i32
    %388 = tpu.dynamic_rotate %334 by %c239_i32_176 dim 1 : vector<8x256xf32>, i32 -> vector<8x256xf32>
    %389 = vector.broadcast %10 : vector<1x256xf32> to vector<8x256xf32>
    %390 = arith.mulf %388, %389 : vector<8x256xf32>
    %391 = arith.index_cast %c5_i32 : i32 to index
    %c64_177 = arith.constant 64 : index
    %c0_178 = arith.constant 0 : index
    %392 = vector.load %arg7[%391, %c64_177, %c0_178] : memref<10x72x256xf32, #tpu.memory_space<vmem>>, vector<1x8x256xf32>
    %393 = vector.shape_cast %392 : vector<1x8x256xf32> to vector<8x256xf32>
    %394 = vector.shape_cast %390 : vector<8x256xf32> to vector<1x8x256xf32>
    tpu.vector_store %arg7[%391, %c64_177, %c0_178], %394 {strides = array<i32>} : memref<10x72x256xf32, #tpu.memory_space<vmem>>, vector<1x8x256xf32>,
    %c6_i32 = arith.constant 6 : i32
    %c0_179 = arith.constant 0 : index
    %395 = arith.index_cast %c6_i32 : i32 to index
    %c0_180 = arith.constant 0 : index
    %c0_181 = arith.constant 0 : index
    %396 = vector.load %arg1[%c0_179, %395, %c0_180, %c0_181] : memref<1x10x8x256xf32, #tpu.memory_space<vmem>>, vector<1x1x8x256xf32>
    %397 = vector.shape_cast %396 : vector<1x1x8x256xf32> to vector<8x256xf32>
    %c17_i32_182 = arith.constant 17 : i32
    %398 = tpu.dynamic_rotate %397 by %c17_i32_182 dim 1 : vector<8x256xf32>, i32 -> vector<8x256xf32>
    %399 = vector.broadcast %3 : vector<1x256xf32> to vector<8x256xf32>
    %400 = arith.mulf %398, %399 : vector<8x256xf32>
    %401 = arith.index_cast %c6_i32 : i32 to index
    %c0_183 = arith.constant 0 : index
    %c0_184 = arith.constant 0 : index
    %402 = vector.load %arg7[%401, %c0_183, %c0_184] : memref<10x72x256xf32, #tpu.memory_space<vmem>>, vector<1x8x256xf32>
    %403 = vector.shape_cast %402 : vector<1x8x256xf32> to vector<8x256xf32>
    %404 = vector.shape_cast %400 : vector<8x256xf32> to vector<1x8x256xf32>
    tpu.vector_store %arg7[%401, %c0_183, %c0_184], %404 {strides = array<i32>} : memref<10x72x256xf32, #tpu.memory_space<vmem>>, vector<1x8x256xf32>,
    %c16_i32_185 = arith.constant 16 : i32
    %405 = tpu.dynamic_rotate %397 by %c16_i32_185 dim 1 : vector<8x256xf32>, i32 -> vector<8x256xf32>
    %406 = vector.broadcast %4 : vector<1x256xf32> to vector<8x256xf32>
    %407 = arith.mulf %405, %406 : vector<8x256xf32>
    %408 = arith.index_cast %c6_i32 : i32 to index
    %c8_186 = arith.constant 8 : index
    %c0_187 = arith.constant 0 : index
    %409 = vector.load %arg7[%408, %c8_186, %c0_187] : memref<10x72x256xf32, #tpu.memory_space<vmem>>, vector<1x8x256xf32>
    %410 = vector.shape_cast %409 : vector<1x8x256xf32> to vector<8x256xf32>
    %411 = vector.shape_cast %407 : vector<8x256xf32> to vector<1x8x256xf32>
    tpu.vector_store %arg7[%408, %c8_186, %c0_187], %411 {strides = array<i32>} : memref<10x72x256xf32, #tpu.memory_space<vmem>>, vector<1x8x256xf32>,
    %c15_i32_188 = arith.constant 15 : i32
    %412 = tpu.dynamic_rotate %397 by %c15_i32_188 dim 1 : vector<8x256xf32>, i32 -> vector<8x256xf32>
    %413 = vector.broadcast %5 : vector<1x256xf32> to vector<8x256xf32>
    %414 = arith.mulf %412, %413 : vector<8x256xf32>
    %415 = arith.index_cast %c6_i32 : i32 to index
    %c16_189 = arith.constant 16 : index
    %c0_190 = arith.constant 0 : index
    %416 = vector.load %arg7[%415, %c16_189, %c0_190] : memref<10x72x256xf32, #tpu.memory_space<vmem>>, vector<1x8x256xf32>
    %417 = vector.shape_cast %416 : vector<1x8x256xf32> to vector<8x256xf32>
    %418 = vector.shape_cast %414 : vector<8x256xf32> to vector<1x8x256xf32>
    tpu.vector_store %arg7[%415, %c16_189, %c0_190], %418 {strides = array<i32>} : memref<10x72x256xf32, #tpu.memory_space<vmem>>, vector<1x8x256xf32>,
    %c1_i32_191 = arith.constant 1 : i32
    %419 = tpu.dynamic_rotate %397 by %c1_i32_191 dim 1 : vector<8x256xf32>, i32 -> vector<8x256xf32>
    %420 = vector.broadcast %6 : vector<1x256xf32> to vector<8x256xf32>
    %421 = arith.mulf %419, %420 : vector<8x256xf32>
    %422 = arith.index_cast %c6_i32 : i32 to index
    %c24_192 = arith.constant 24 : index
    %c0_193 = arith.constant 0 : index
    %423 = vector.load %arg7[%422, %c24_192, %c0_193] : memref<10x72x256xf32, #tpu.memory_space<vmem>>, vector<1x8x256xf32>
    %424 = vector.shape_cast %423 : vector<1x8x256xf32> to vector<8x256xf32>
    %425 = vector.shape_cast %421 : vector<8x256xf32> to vector<1x8x256xf32>
    tpu.vector_store %arg7[%422, %c24_192, %c0_193], %425 {strides = array<i32>} : memref<10x72x256xf32, #tpu.memory_space<vmem>>, vector<1x8x256xf32>,
    %426 = arith.index_cast %c6_i32 : i32 to index
    %c32_194 = arith.constant 32 : index
    %c0_195 = arith.constant 0 : index
    %427 = vector.load %arg7[%426, %c32_194, %c0_195] : memref<10x72x256xf32, #tpu.memory_space<vmem>>, vector<1x8x256xf32>
    %428 = vector.shape_cast %427 : vector<1x8x256xf32> to vector<8x256xf32>
    %429 = vector.shape_cast %397 : vector<8x256xf32> to vector<1x8x256xf32>
    tpu.vector_store %arg7[%426, %c32_194, %c0_195], %429 {strides = array<i32>} : memref<10x72x256xf32, #tpu.memory_space<vmem>>, vector<1x8x256xf32>,
    %c255_i32_196 = arith.constant 255 : i32
    %430 = tpu.dynamic_rotate %397 by %c255_i32_196 dim 1 : vector<8x256xf32>, i32 -> vector<8x256xf32>
    %431 = vector.broadcast %7 : vector<1x256xf32> to vector<8x256xf32>
    %432 = arith.mulf %430, %431 : vector<8x256xf32>
    %433 = arith.index_cast %c6_i32 : i32 to index
    %c40_197 = arith.constant 40 : index
    %c0_198 = arith.constant 0 : index
    %434 = vector.load %arg7[%433, %c40_197, %c0_198] : memref<10x72x256xf32, #tpu.memory_space<vmem>>, vector<1x8x256xf32>
    %435 = vector.shape_cast %434 : vector<1x8x256xf32> to vector<8x256xf32>
    %436 = vector.shape_cast %432 : vector<8x256xf32> to vector<1x8x256xf32>
    tpu.vector_store %arg7[%433, %c40_197, %c0_198], %436 {strides = array<i32>} : memref<10x72x256xf32, #tpu.memory_space<vmem>>, vector<1x8x256xf32>,
    %c241_i32_199 = arith.constant 241 : i32
    %437 = tpu.dynamic_rotate %397 by %c241_i32_199 dim 1 : vector<8x256xf32>, i32 -> vector<8x256xf32>
    %438 = vector.broadcast %8 : vector<1x256xf32> to vector<8x256xf32>
    %439 = arith.mulf %437, %438 : vector<8x256xf32>
    %440 = arith.index_cast %c6_i32 : i32 to index
    %c48_200 = arith.constant 48 : index
    %c0_201 = arith.constant 0 : index
    %441 = vector.load %arg7[%440, %c48_200, %c0_201] : memref<10x72x256xf32, #tpu.memory_space<vmem>>, vector<1x8x256xf32>
    %442 = vector.shape_cast %441 : vector<1x8x256xf32> to vector<8x256xf32>
    %443 = vector.shape_cast %439 : vector<8x256xf32> to vector<1x8x256xf32>
    tpu.vector_store %arg7[%440, %c48_200, %c0_201], %443 {strides = array<i32>} : memref<10x72x256xf32, #tpu.memory_space<vmem>>, vector<1x8x256xf32>,
    %c240_i32_202 = arith.constant 240 : i32
    %444 = tpu.dynamic_rotate %397 by %c240_i32_202 dim 1 : vector<8x256xf32>, i32 -> vector<8x256xf32>
    %445 = vector.broadcast %9 : vector<1x256xf32> to vector<8x256xf32>
    %446 = arith.mulf %444, %445 : vector<8x256xf32>
    %447 = arith.index_cast %c6_i32 : i32 to index
    %c56_203 = arith.constant 56 : index
    %c0_204 = arith.constant 0 : index
    %448 = vector.load %arg7[%447, %c56_203, %c0_204] : memref<10x72x256xf32, #tpu.memory_space<vmem>>, vector<1x8x256xf32>
    %449 = vector.shape_cast %448 : vector<1x8x256xf32> to vector<8x256xf32>
    %450 = vector.shape_cast %446 : vector<8x256xf32> to vector<1x8x256xf32>
    tpu.vector_store %arg7[%447, %c56_203, %c0_204], %450 {strides = array<i32>} : memref<10x72x256xf32, #tpu.memory_space<vmem>>, vector<1x8x256xf32>,
    %c239_i32_205 = arith.constant 239 : i32
    %451 = tpu.dynamic_rotate %397 by %c239_i32_205 dim 1 : vector<8x256xf32>, i32 -> vector<8x256xf32>
    %452 = vector.broadcast %10 : vector<1x256xf32> to vector<8x256xf32>
    %453 = arith.mulf %451, %452 : vector<8x256xf32>
    %454 = arith.index_cast %c6_i32 : i32 to index
    %c64_206 = arith.constant 64 : index
    %c0_207 = arith.constant 0 : index
    %455 = vector.load %arg7[%454, %c64_206, %c0_207] : memref<10x72x256xf32, #tpu.memory_space<vmem>>, vector<1x8x256xf32>
    %456 = vector.shape_cast %455 : vector<1x8x256xf32> to vector<8x256xf32>
    %457 = vector.shape_cast %453 : vector<8x256xf32> to vector<1x8x256xf32>
    tpu.vector_store %arg7[%454, %c64_206, %c0_207], %457 {strides = array<i32>} : memref<10x72x256xf32, #tpu.memory_space<vmem>>, vector<1x8x256xf32>,
    %c7_i32 = arith.constant 7 : i32
    %c0_208 = arith.constant 0 : index
    %458 = arith.index_cast %c7_i32 : i32 to index
    %c0_209 = arith.constant 0 : index
    %c0_210 = arith.constant 0 : index
    %459 = vector.load %arg1[%c0_208, %458, %c0_209, %c0_210] : memref<1x10x8x256xf32, #tpu.memory_space<vmem>>, vector<1x1x8x256xf32>
    %460 = vector.shape_cast %459 : vector<1x1x8x256xf32> to vector<8x256xf32>
    %c17_i32_211 = arith.constant 17 : i32
    %461 = tpu.dynamic_rotate %460 by %c17_i32_211 dim 1 : vector<8x256xf32>, i32 -> vector<8x256xf32>
    %462 = vector.broadcast %3 : vector<1x256xf32> to vector<8x256xf32>
    %463 = arith.mulf %461, %462 : vector<8x256xf32>
    %464 = arith.index_cast %c7_i32 : i32 to index
    %c0_212 = arith.constant 0 : index
    %c0_213 = arith.constant 0 : index
    %465 = vector.load %arg7[%464, %c0_212, %c0_213] : memref<10x72x256xf32, #tpu.memory_space<vmem>>, vector<1x8x256xf32>
    %466 = vector.shape_cast %465 : vector<1x8x256xf32> to vector<8x256xf32>
    %467 = vector.shape_cast %463 : vector<8x256xf32> to vector<1x8x256xf32>
    tpu.vector_store %arg7[%464, %c0_212, %c0_213], %467 {strides = array<i32>} : memref<10x72x256xf32, #tpu.memory_space<vmem>>, vector<1x8x256xf32>,
    %c16_i32_214 = arith.constant 16 : i32
    %468 = tpu.dynamic_rotate %460 by %c16_i32_214 dim 1 : vector<8x256xf32>, i32 -> vector<8x256xf32>
    %469 = vector.broadcast %4 : vector<1x256xf32> to vector<8x256xf32>
    %470 = arith.mulf %468, %469 : vector<8x256xf32>
    %471 = arith.index_cast %c7_i32 : i32 to index
    %c8_215 = arith.constant 8 : index
    %c0_216 = arith.constant 0 : index
    %472 = vector.load %arg7[%471, %c8_215, %c0_216] : memref<10x72x256xf32, #tpu.memory_space<vmem>>, vector<1x8x256xf32>
    %473 = vector.shape_cast %472 : vector<1x8x256xf32> to vector<8x256xf32>
    %474 = vector.shape_cast %470 : vector<8x256xf32> to vector<1x8x256xf32>
    tpu.vector_store %arg7[%471, %c8_215, %c0_216], %474 {strides = array<i32>} : memref<10x72x256xf32, #tpu.memory_space<vmem>>, vector<1x8x256xf32>,
    %c15_i32_217 = arith.constant 15 : i32
    %475 = tpu.dynamic_rotate %460 by %c15_i32_217 dim 1 : vector<8x256xf32>, i32 -> vector<8x256xf32>
    %476 = vector.broadcast %5 : vector<1x256xf32> to vector<8x256xf32>
    %477 = arith.mulf %475, %476 : vector<8x256xf32>
    %478 = arith.index_cast %c7_i32 : i32 to index
    %c16_218 = arith.constant 16 : index
    %c0_219 = arith.constant 0 : index
    %479 = vector.load %arg7[%478, %c16_218, %c0_219] : memref<10x72x256xf32, #tpu.memory_space<vmem>>, vector<1x8x256xf32>
    %480 = vector.shape_cast %479 : vector<1x8x256xf32> to vector<8x256xf32>
    %481 = vector.shape_cast %477 : vector<8x256xf32> to vector<1x8x256xf32>
    tpu.vector_store %arg7[%478, %c16_218, %c0_219], %481 {strides = array<i32>} : memref<10x72x256xf32, #tpu.memory_space<vmem>>, vector<1x8x256xf32>,
    %c1_i32_220 = arith.constant 1 : i32
    %482 = tpu.dynamic_rotate %460 by %c1_i32_220 dim 1 : vector<8x256xf32>, i32 -> vector<8x256xf32>
    %483 = vector.broadcast %6 : vector<1x256xf32> to vector<8x256xf32>
    %484 = arith.mulf %482, %483 : vector<8x256xf32>
    %485 = arith.index_cast %c7_i32 : i32 to index
    %c24_221 = arith.constant 24 : index
    %c0_222 = arith.constant 0 : index
    %486 = vector.load %arg7[%485, %c24_221, %c0_222] : memref<10x72x256xf32, #tpu.memory_space<vmem>>, vector<1x8x256xf32>
    %487 = vector.shape_cast %486 : vector<1x8x256xf32> to vector<8x256xf32>
    %488 = vector.shape_cast %484 : vector<8x256xf32> to vector<1x8x256xf32>
    tpu.vector_store %arg7[%485, %c24_221, %c0_222], %488 {strides = array<i32>} : memref<10x72x256xf32, #tpu.memory_space<vmem>>, vector<1x8x256xf32>,
    %489 = arith.index_cast %c7_i32 : i32 to index
    %c32_223 = arith.constant 32 : index
    %c0_224 = arith.constant 0 : index
    %490 = vector.load %arg7[%489, %c32_223, %c0_224] : memref<10x72x256xf32, #tpu.memory_space<vmem>>, vector<1x8x256xf32>
    %491 = vector.shape_cast %490 : vector<1x8x256xf32> to vector<8x256xf32>
    %492 = vector.shape_cast %460 : vector<8x256xf32> to vector<1x8x256xf32>
    tpu.vector_store %arg7[%489, %c32_223, %c0_224], %492 {strides = array<i32>} : memref<10x72x256xf32, #tpu.memory_space<vmem>>, vector<1x8x256xf32>,
    %c255_i32_225 = arith.constant 255 : i32
    %493 = tpu.dynamic_rotate %460 by %c255_i32_225 dim 1 : vector<8x256xf32>, i32 -> vector<8x256xf32>
    %494 = vector.broadcast %7 : vector<1x256xf32> to vector<8x256xf32>
    %495 = arith.mulf %493, %494 : vector<8x256xf32>
    %496 = arith.index_cast %c7_i32 : i32 to index
    %c40_226 = arith.constant 40 : index
    %c0_227 = arith.constant 0 : index
    %497 = vector.load %arg7[%496, %c40_226, %c0_227] : memref<10x72x256xf32, #tpu.memory_space<vmem>>, vector<1x8x256xf32>
    %498 = vector.shape_cast %497 : vector<1x8x256xf32> to vector<8x256xf32>
    %499 = vector.shape_cast %495 : vector<8x256xf32> to vector<1x8x256xf32>
    tpu.vector_store %arg7[%496, %c40_226, %c0_227], %499 {strides = array<i32>} : memref<10x72x256xf32, #tpu.memory_space<vmem>>, vector<1x8x256xf32>,
    %c241_i32_228 = arith.constant 241 : i32
    %500 = tpu.dynamic_rotate %460 by %c241_i32_228 dim 1 : vector<8x256xf32>, i32 -> vector<8x256xf32>
    %501 = vector.broadcast %8 : vector<1x256xf32> to vector<8x256xf32>
    %502 = arith.mulf %500, %501 : vector<8x256xf32>
    %503 = arith.index_cast %c7_i32 : i32 to index
    %c48_229 = arith.constant 48 : index
    %c0_230 = arith.constant 0 : index
    %504 = vector.load %arg7[%503, %c48_229, %c0_230] : memref<10x72x256xf32, #tpu.memory_space<vmem>>, vector<1x8x256xf32>
    %505 = vector.shape_cast %504 : vector<1x8x256xf32> to vector<8x256xf32>
    %506 = vector.shape_cast %502 : vector<8x256xf32> to vector<1x8x256xf32>
    tpu.vector_store %arg7[%503, %c48_229, %c0_230], %506 {strides = array<i32>} : memref<10x72x256xf32, #tpu.memory_space<vmem>>, vector<1x8x256xf32>,
    %c240_i32_231 = arith.constant 240 : i32
    %507 = tpu.dynamic_rotate %460 by %c240_i32_231 dim 1 : vector<8x256xf32>, i32 -> vector<8x256xf32>
    %508 = vector.broadcast %9 : vector<1x256xf32> to vector<8x256xf32>
    %509 = arith.mulf %507, %508 : vector<8x256xf32>
    %510 = arith.index_cast %c7_i32 : i32 to index
    %c56_232 = arith.constant 56 : index
    %c0_233 = arith.constant 0 : index
    %511 = vector.load %arg7[%510, %c56_232, %c0_233] : memref<10x72x256xf32, #tpu.memory_space<vmem>>, vector<1x8x256xf32>
    %512 = vector.shape_cast %511 : vector<1x8x256xf32> to vector<8x256xf32>
    %513 = vector.shape_cast %509 : vector<8x256xf32> to vector<1x8x256xf32>
    tpu.vector_store %arg7[%510, %c56_232, %c0_233], %513 {strides = array<i32>} : memref<10x72x256xf32, #tpu.memory_space<vmem>>, vector<1x8x256xf32>,
    %c239_i32_234 = arith.constant 239 : i32
    %514 = tpu.dynamic_rotate %460 by %c239_i32_234 dim 1 : vector<8x256xf32>, i32 -> vector<8x256xf32>
    %515 = vector.broadcast %10 : vector<1x256xf32> to vector<8x256xf32>
    %516 = arith.mulf %514, %515 : vector<8x256xf32>
    %517 = arith.index_cast %c7_i32 : i32 to index
    %c64_235 = arith.constant 64 : index
    %c0_236 = arith.constant 0 : index
    %518 = vector.load %arg7[%517, %c64_235, %c0_236] : memref<10x72x256xf32, #tpu.memory_space<vmem>>, vector<1x8x256xf32>
    %519 = vector.shape_cast %518 : vector<1x8x256xf32> to vector<8x256xf32>
    %520 = vector.shape_cast %516 : vector<8x256xf32> to vector<1x8x256xf32>
    tpu.vector_store %arg7[%517, %c64_235, %c0_236], %520 {strides = array<i32>} : memref<10x72x256xf32, #tpu.memory_space<vmem>>, vector<1x8x256xf32>,
    %c8_i32 = arith.constant 8 : i32
    %c0_237 = arith.constant 0 : index
    %521 = arith.index_cast %c8_i32 : i32 to index
    %c0_238 = arith.constant 0 : index
    %c0_239 = arith.constant 0 : index
    %522 = vector.load %arg1[%c0_237, %521, %c0_238, %c0_239] : memref<1x10x8x256xf32, #tpu.memory_space<vmem>>, vector<1x1x8x256xf32>
    %523 = vector.shape_cast %522 : vector<1x1x8x256xf32> to vector<8x256xf32>
    %c17_i32_240 = arith.constant 17 : i32
    %524 = tpu.dynamic_rotate %523 by %c17_i32_240 dim 1 : vector<8x256xf32>, i32 -> vector<8x256xf32>
    %525 = vector.broadcast %3 : vector<1x256xf32> to vector<8x256xf32>
    %526 = arith.mulf %524, %525 : vector<8x256xf32>
    %527 = arith.index_cast %c8_i32 : i32 to index
    %c0_241 = arith.constant 0 : index
    %c0_242 = arith.constant 0 : index
    %528 = vector.load %arg7[%527, %c0_241, %c0_242] : memref<10x72x256xf32, #tpu.memory_space<vmem>>, vector<1x8x256xf32>
    %529 = vector.shape_cast %528 : vector<1x8x256xf32> to vector<8x256xf32>
    %530 = vector.shape_cast %526 : vector<8x256xf32> to vector<1x8x256xf32>
    tpu.vector_store %arg7[%527, %c0_241, %c0_242], %530 {strides = array<i32>} : memref<10x72x256xf32, #tpu.memory_space<vmem>>, vector<1x8x256xf32>,
    %c16_i32_243 = arith.constant 16 : i32
    %531 = tpu.dynamic_rotate %523 by %c16_i32_243 dim 1 : vector<8x256xf32>, i32 -> vector<8x256xf32>
    %532 = vector.broadcast %4 : vector<1x256xf32> to vector<8x256xf32>
    %533 = arith.mulf %531, %532 : vector<8x256xf32>
    %534 = arith.index_cast %c8_i32 : i32 to index
    %c8_244 = arith.constant 8 : index
    %c0_245 = arith.constant 0 : index
    %535 = vector.load %arg7[%534, %c8_244, %c0_245] : memref<10x72x256xf32, #tpu.memory_space<vmem>>, vector<1x8x256xf32>
    %536 = vector.shape_cast %535 : vector<1x8x256xf32> to vector<8x256xf32>
    %537 = vector.shape_cast %533 : vector<8x256xf32> to vector<1x8x256xf32>
    tpu.vector_store %arg7[%534, %c8_244, %c0_245], %537 {strides = array<i32>} : memref<10x72x256xf32, #tpu.memory_space<vmem>>, vector<1x8x256xf32>,
    %c15_i32_246 = arith.constant 15 : i32
    %538 = tpu.dynamic_rotate %523 by %c15_i32_246 dim 1 : vector<8x256xf32>, i32 -> vector<8x256xf32>
    %539 = vector.broadcast %5 : vector<1x256xf32> to vector<8x256xf32>
    %540 = arith.mulf %538, %539 : vector<8x256xf32>
    %541 = arith.index_cast %c8_i32 : i32 to index
    %c16_247 = arith.constant 16 : index
    %c0_248 = arith.constant 0 : index
    %542 = vector.load %arg7[%541, %c16_247, %c0_248] : memref<10x72x256xf32, #tpu.memory_space<vmem>>, vector<1x8x256xf32>
    %543 = vector.shape_cast %542 : vector<1x8x256xf32> to vector<8x256xf32>
    %544 = vector.shape_cast %540 : vector<8x256xf32> to vector<1x8x256xf32>
    tpu.vector_store %arg7[%541, %c16_247, %c0_248], %544 {strides = array<i32>} : memref<10x72x256xf32, #tpu.memory_space<vmem>>, vector<1x8x256xf32>,
    %c1_i32_249 = arith.constant 1 : i32
    %545 = tpu.dynamic_rotate %523 by %c1_i32_249 dim 1 : vector<8x256xf32>, i32 -> vector<8x256xf32>
    %546 = vector.broadcast %6 : vector<1x256xf32> to vector<8x256xf32>
    %547 = arith.mulf %545, %546 : vector<8x256xf32>
    %548 = arith.index_cast %c8_i32 : i32 to index
    %c24_250 = arith.constant 24 : index
    %c0_251 = arith.constant 0 : index
    %549 = vector.load %arg7[%548, %c24_250, %c0_251] : memref<10x72x256xf32, #tpu.memory_space<vmem>>, vector<1x8x256xf32>
    %550 = vector.shape_cast %549 : vector<1x8x256xf32> to vector<8x256xf32>
    %551 = vector.shape_cast %547 : vector<8x256xf32> to vector<1x8x256xf32>
    tpu.vector_store %arg7[%548, %c24_250, %c0_251], %551 {strides = array<i32>} : memref<10x72x256xf32, #tpu.memory_space<vmem>>, vector<1x8x256xf32>,
    %552 = arith.index_cast %c8_i32 : i32 to index
    %c32_252 = arith.constant 32 : index
    %c0_253 = arith.constant 0 : index
    %553 = vector.load %arg7[%552, %c32_252, %c0_253] : memref<10x72x256xf32, #tpu.memory_space<vmem>>, vector<1x8x256xf32>
    %554 = vector.shape_cast %553 : vector<1x8x256xf32> to vector<8x256xf32>
    %555 = vector.shape_cast %523 : vector<8x256xf32> to vector<1x8x256xf32>
    tpu.vector_store %arg7[%552, %c32_252, %c0_253], %555 {strides = array<i32>} : memref<10x72x256xf32, #tpu.memory_space<vmem>>, vector<1x8x256xf32>,
    %c255_i32_254 = arith.constant 255 : i32
    %556 = tpu.dynamic_rotate %523 by %c255_i32_254 dim 1 : vector<8x256xf32>, i32 -> vector<8x256xf32>
    %557 = vector.broadcast %7 : vector<1x256xf32> to vector<8x256xf32>
    %558 = arith.mulf %556, %557 : vector<8x256xf32>
    %559 = arith.index_cast %c8_i32 : i32 to index
    %c40_255 = arith.constant 40 : index
    %c0_256 = arith.constant 0 : index
    %560 = vector.load %arg7[%559, %c40_255, %c0_256] : memref<10x72x256xf32, #tpu.memory_space<vmem>>, vector<1x8x256xf32>
    %561 = vector.shape_cast %560 : vector<1x8x256xf32> to vector<8x256xf32>
    %562 = vector.shape_cast %558 : vector<8x256xf32> to vector<1x8x256xf32>
    tpu.vector_store %arg7[%559, %c40_255, %c0_256], %562 {strides = array<i32>} : memref<10x72x256xf32, #tpu.memory_space<vmem>>, vector<1x8x256xf32>,
    %c241_i32_257 = arith.constant 241 : i32
    %563 = tpu.dynamic_rotate %523 by %c241_i32_257 dim 1 : vector<8x256xf32>, i32 -> vector<8x256xf32>
    %564 = vector.broadcast %8 : vector<1x256xf32> to vector<8x256xf32>
    %565 = arith.mulf %563, %564 : vector<8x256xf32>
    %566 = arith.index_cast %c8_i32 : i32 to index
    %c48_258 = arith.constant 48 : index
    %c0_259 = arith.constant 0 : index
    %567 = vector.load %arg7[%566, %c48_258, %c0_259] : memref<10x72x256xf32, #tpu.memory_space<vmem>>, vector<1x8x256xf32>
    %568 = vector.shape_cast %567 : vector<1x8x256xf32> to vector<8x256xf32>
    %569 = vector.shape_cast %565 : vector<8x256xf32> to vector<1x8x256xf32>
    tpu.vector_store %arg7[%566, %c48_258, %c0_259], %569 {strides = array<i32>} : memref<10x72x256xf32, #tpu.memory_space<vmem>>, vector<1x8x256xf32>,
    %c240_i32_260 = arith.constant 240 : i32
    %570 = tpu.dynamic_rotate %523 by %c240_i32_260 dim 1 : vector<8x256xf32>, i32 -> vector<8x256xf32>
    %571 = vector.broadcast %9 : vector<1x256xf32> to vector<8x256xf32>
    %572 = arith.mulf %570, %571 : vector<8x256xf32>
    %573 = arith.index_cast %c8_i32 : i32 to index
    %c56_261 = arith.constant 56 : index
    %c0_262 = arith.constant 0 : index
    %574 = vector.load %arg7[%573, %c56_261, %c0_262] : memref<10x72x256xf32, #tpu.memory_space<vmem>>, vector<1x8x256xf32>
    %575 = vector.shape_cast %574 : vector<1x8x256xf32> to vector<8x256xf32>
    %576 = vector.shape_cast %572 : vector<8x256xf32> to vector<1x8x256xf32>
    tpu.vector_store %arg7[%573, %c56_261, %c0_262], %576 {strides = array<i32>} : memref<10x72x256xf32, #tpu.memory_space<vmem>>, vector<1x8x256xf32>,
    %c239_i32_263 = arith.constant 239 : i32
    %577 = tpu.dynamic_rotate %523 by %c239_i32_263 dim 1 : vector<8x256xf32>, i32 -> vector<8x256xf32>
    %578 = vector.broadcast %10 : vector<1x256xf32> to vector<8x256xf32>
    %579 = arith.mulf %577, %578 : vector<8x256xf32>
    %580 = arith.index_cast %c8_i32 : i32 to index
    %c64_264 = arith.constant 64 : index
    %c0_265 = arith.constant 0 : index
    %581 = vector.load %arg7[%580, %c64_264, %c0_265] : memref<10x72x256xf32, #tpu.memory_space<vmem>>, vector<1x8x256xf32>
    %582 = vector.shape_cast %581 : vector<1x8x256xf32> to vector<8x256xf32>
    %583 = vector.shape_cast %579 : vector<8x256xf32> to vector<1x8x256xf32>
    tpu.vector_store %arg7[%580, %c64_264, %c0_265], %583 {strides = array<i32>} : memref<10x72x256xf32, #tpu.memory_space<vmem>>, vector<1x8x256xf32>,
    %c9_i32 = arith.constant 9 : i32
    %c0_266 = arith.constant 0 : index
    %584 = arith.index_cast %c9_i32 : i32 to index
    %c0_267 = arith.constant 0 : index
    %c0_268 = arith.constant 0 : index
    %585 = vector.load %arg1[%c0_266, %584, %c0_267, %c0_268] : memref<1x10x8x256xf32, #tpu.memory_space<vmem>>, vector<1x1x8x256xf32>
    %586 = vector.shape_cast %585 : vector<1x1x8x256xf32> to vector<8x256xf32>
    %c17_i32_269 = arith.constant 17 : i32
    %587 = tpu.dynamic_rotate %586 by %c17_i32_269 dim 1 : vector<8x256xf32>, i32 -> vector<8x256xf32>
    %588 = vector.broadcast %3 : vector<1x256xf32> to vector<8x256xf32>
    %589 = arith.mulf %587, %588 : vector<8x256xf32>
    %590 = arith.index_cast %c9_i32 : i32 to index
    %c0_270 = arith.constant 0 : index
    %c0_271 = arith.constant 0 : index
    %591 = vector.load %arg7[%590, %c0_270, %c0_271] : memref<10x72x256xf32, #tpu.memory_space<vmem>>, vector<1x8x256xf32>
    %592 = vector.shape_cast %591 : vector<1x8x256xf32> to vector<8x256xf32>
    %593 = vector.shape_cast %589 : vector<8x256xf32> to vector<1x8x256xf32>
    tpu.vector_store %arg7[%590, %c0_270, %c0_271], %593 {strides = array<i32>} : memref<10x72x256xf32, #tpu.memory_space<vmem>>, vector<1x8x256xf32>,
    %c16_i32_272 = arith.constant 16 : i32
    %594 = tpu.dynamic_rotate %586 by %c16_i32_272 dim 1 : vector<8x256xf32>, i32 -> vector<8x256xf32>
    %595 = vector.broadcast %4 : vector<1x256xf32> to vector<8x256xf32>
    %596 = arith.mulf %594, %595 : vector<8x256xf32>
    %597 = arith.index_cast %c9_i32 : i32 to index
    %c8_273 = arith.constant 8 : index
    %c0_274 = arith.constant 0 : index
    %598 = vector.load %arg7[%597, %c8_273, %c0_274] : memref<10x72x256xf32, #tpu.memory_space<vmem>>, vector<1x8x256xf32>
    %599 = vector.shape_cast %598 : vector<1x8x256xf32> to vector<8x256xf32>
    %600 = vector.shape_cast %596 : vector<8x256xf32> to vector<1x8x256xf32>
    tpu.vector_store %arg7[%597, %c8_273, %c0_274], %600 {strides = array<i32>} : memref<10x72x256xf32, #tpu.memory_space<vmem>>, vector<1x8x256xf32>,
    %c15_i32_275 = arith.constant 15 : i32
    %601 = tpu.dynamic_rotate %586 by %c15_i32_275 dim 1 : vector<8x256xf32>, i32 -> vector<8x256xf32>
    %602 = vector.broadcast %5 : vector<1x256xf32> to vector<8x256xf32>
    %603 = arith.mulf %601, %602 : vector<8x256xf32>
    %604 = arith.index_cast %c9_i32 : i32 to index
    %c16_276 = arith.constant 16 : index
    %c0_277 = arith.constant 0 : index
    %605 = vector.load %arg7[%604, %c16_276, %c0_277] : memref<10x72x256xf32, #tpu.memory_space<vmem>>, vector<1x8x256xf32>
    %606 = vector.shape_cast %605 : vector<1x8x256xf32> to vector<8x256xf32>
    %607 = vector.shape_cast %603 : vector<8x256xf32> to vector<1x8x256xf32>
    tpu.vector_store %arg7[%604, %c16_276, %c0_277], %607 {strides = array<i32>} : memref<10x72x256xf32, #tpu.memory_space<vmem>>, vector<1x8x256xf32>,
    %c1_i32_278 = arith.constant 1 : i32
    %608 = tpu.dynamic_rotate %586 by %c1_i32_278 dim 1 : vector<8x256xf32>, i32 -> vector<8x256xf32>
    %609 = vector.broadcast %6 : vector<1x256xf32> to vector<8x256xf32>
    %610 = arith.mulf %608, %609 : vector<8x256xf32>
    %611 = arith.index_cast %c9_i32 : i32 to index
    %c24_279 = arith.constant 24 : index
    %c0_280 = arith.constant 0 : index
    %612 = vector.load %arg7[%611, %c24_279, %c0_280] : memref<10x72x256xf32, #tpu.memory_space<vmem>>, vector<1x8x256xf32>
    %613 = vector.shape_cast %612 : vector<1x8x256xf32> to vector<8x256xf32>
    %614 = vector.shape_cast %610 : vector<8x256xf32> to vector<1x8x256xf32>
    tpu.vector_store %arg7[%611, %c24_279, %c0_280], %614 {strides = array<i32>} : memref<10x72x256xf32, #tpu.memory_space<vmem>>, vector<1x8x256xf32>,
    %615 = arith.index_cast %c9_i32 : i32 to index
    %c32_281 = arith.constant 32 : index
    %c0_282 = arith.constant 0 : index
    %616 = vector.load %arg7[%615, %c32_281, %c0_282] : memref<10x72x256xf32, #tpu.memory_space<vmem>>, vector<1x8x256xf32>
    %617 = vector.shape_cast %616 : vector<1x8x256xf32> to vector<8x256xf32>
    %618 = vector.shape_cast %586 : vector<8x256xf32> to vector<1x8x256xf32>
    tpu.vector_store %arg7[%615, %c32_281, %c0_282], %618 {strides = array<i32>} : memref<10x72x256xf32, #tpu.memory_space<vmem>>, vector<1x8x256xf32>,
    %c255_i32_283 = arith.constant 255 : i32
    %619 = tpu.dynamic_rotate %586 by %c255_i32_283 dim 1 : vector<8x256xf32>, i32 -> vector<8x256xf32>
    %620 = vector.broadcast %7 : vector<1x256xf32> to vector<8x256xf32>
    %621 = arith.mulf %619, %620 : vector<8x256xf32>
    %622 = arith.index_cast %c9_i32 : i32 to index
    %c40_284 = arith.constant 40 : index
    %c0_285 = arith.constant 0 : index
    %623 = vector.load %arg7[%622, %c40_284, %c0_285] : memref<10x72x256xf32, #tpu.memory_space<vmem>>, vector<1x8x256xf32>
    %624 = vector.shape_cast %623 : vector<1x8x256xf32> to vector<8x256xf32>
    %625 = vector.shape_cast %621 : vector<8x256xf32> to vector<1x8x256xf32>
    tpu.vector_store %arg7[%622, %c40_284, %c0_285], %625 {strides = array<i32>} : memref<10x72x256xf32, #tpu.memory_space<vmem>>, vector<1x8x256xf32>,
    %c241_i32_286 = arith.constant 241 : i32
    %626 = tpu.dynamic_rotate %586 by %c241_i32_286 dim 1 : vector<8x256xf32>, i32 -> vector<8x256xf32>
    %627 = vector.broadcast %8 : vector<1x256xf32> to vector<8x256xf32>
    %628 = arith.mulf %626, %627 : vector<8x256xf32>
    %629 = arith.index_cast %c9_i32 : i32 to index
    %c48_287 = arith.constant 48 : index
    %c0_288 = arith.constant 0 : index
    %630 = vector.load %arg7[%629, %c48_287, %c0_288] : memref<10x72x256xf32, #tpu.memory_space<vmem>>, vector<1x8x256xf32>
    %631 = vector.shape_cast %630 : vector<1x8x256xf32> to vector<8x256xf32>
    %632 = vector.shape_cast %628 : vector<8x256xf32> to vector<1x8x256xf32>
    tpu.vector_store %arg7[%629, %c48_287, %c0_288], %632 {strides = array<i32>} : memref<10x72x256xf32, #tpu.memory_space<vmem>>, vector<1x8x256xf32>,
    %c240_i32_289 = arith.constant 240 : i32
    %633 = tpu.dynamic_rotate %586 by %c240_i32_289 dim 1 : vector<8x256xf32>, i32 -> vector<8x256xf32>
    %634 = vector.broadcast %9 : vector<1x256xf32> to vector<8x256xf32>
    %635 = arith.mulf %633, %634 : vector<8x256xf32>
    %636 = arith.index_cast %c9_i32 : i32 to index
    %c56_290 = arith.constant 56 : index
    %c0_291 = arith.constant 0 : index
    %637 = vector.load %arg7[%636, %c56_290, %c0_291] : memref<10x72x256xf32, #tpu.memory_space<vmem>>, vector<1x8x256xf32>
    %638 = vector.shape_cast %637 : vector<1x8x256xf32> to vector<8x256xf32>
    %639 = vector.shape_cast %635 : vector<8x256xf32> to vector<1x8x256xf32>
    tpu.vector_store %arg7[%636, %c56_290, %c0_291], %639 {strides = array<i32>} : memref<10x72x256xf32, #tpu.memory_space<vmem>>, vector<1x8x256xf32>,
    %c239_i32_292 = arith.constant 239 : i32
    %640 = tpu.dynamic_rotate %586 by %c239_i32_292 dim 1 : vector<8x256xf32>, i32 -> vector<8x256xf32>
    %641 = vector.broadcast %10 : vector<1x256xf32> to vector<8x256xf32>
    %642 = arith.mulf %640, %641 : vector<8x256xf32>
    %643 = arith.index_cast %c9_i32 : i32 to index
    %c64_293 = arith.constant 64 : index
    %c0_294 = arith.constant 0 : index
    %644 = vector.load %arg7[%643, %c64_293, %c0_294] : memref<10x72x256xf32, #tpu.memory_space<vmem>>, vector<1x8x256xf32>
    %645 = vector.shape_cast %644 : vector<1x8x256xf32> to vector<8x256xf32>
    %646 = vector.shape_cast %642 : vector<8x256xf32> to vector<1x8x256xf32>
    tpu.vector_store %arg7[%643, %c64_293, %c0_294], %646 {strides = array<i32>} : memref<10x72x256xf32, #tpu.memory_space<vmem>>, vector<1x8x256xf32>,
    %c10_i32 = arith.constant 10 : i32
    %c0_i32_295 = arith.constant 0 : i32
    %cst = arith.constant 0.000000e+00 : f32
    %647 = vector.broadcast %cst : f32 to vector<8x256xf32>
    %c0_i32_296 = arith.constant 0 : i32
    %648 = arith.addi %c0_i32_295, %c0_i32_296 : i32
    %649 = arith.index_cast %648 : i32 to index
    %c0_297 = arith.constant 0 : index
    %c0_298 = arith.constant 0 : index
    %650 = vector.load %arg7[%649, %c0_297, %c0_298] : memref<10x72x256xf32, #tpu.memory_space<vmem>>, vector<1x72x256xf32>
    %651 = vector.shape_cast %650 : vector<1x72x256xf32> to vector<72x256xf32>
    %cst_299 = arith.constant dense<0.000000e+00> : vector<8x256xf32>
    %652 = tpu.matmul %12, %651, %cst_299 {dimension_numbers = #tpu.dot_dimension_numbers<[1], [0], [0], [1], [0, 0, 1, 1], [], []>} : vector<8x72xf32>, vector<72x256xf32>, vector<8x256xf32> -> vector<8x256xf32>
    %653 = arith.addf %647, %652 : vector<8x256xf32>
    %c1_i32_300 = arith.constant 1 : i32
    %654 = arith.addi %c0_i32_295, %c1_i32_300 : i32
    %655 = arith.index_cast %654 : i32 to index
    %c0_301 = arith.constant 0 : index
    %c0_302 = arith.constant 0 : index
    %656 = vector.load %arg7[%655, %c0_301, %c0_302] : memref<10x72x256xf32, #tpu.memory_space<vmem>>, vector<1x72x256xf32>
    %657 = vector.shape_cast %656 : vector<1x72x256xf32> to vector<72x256xf32>
    %cst_303 = arith.constant dense<0.000000e+00> : vector<8x256xf32>
    %658 = tpu.matmul %14, %657, %cst_303 {dimension_numbers = #tpu.dot_dimension_numbers<[1], [0], [0], [1], [0, 0, 1, 1], [], []>} : vector<8x72xf32>, vector<72x256xf32>, vector<8x256xf32> -> vector<8x256xf32>
    %659 = arith.addf %653, %658 : vector<8x256xf32>
    %c2_i32_304 = arith.constant 2 : i32
    %660 = arith.addi %c0_i32_295, %c2_i32_304 : i32
    %661 = arith.index_cast %660 : i32 to index
    %c0_305 = arith.constant 0 : index
    %c0_306 = arith.constant 0 : index
    %662 = vector.load %arg7[%661, %c0_305, %c0_306] : memref<10x72x256xf32, #tpu.memory_space<vmem>>, vector<1x72x256xf32>
    %663 = vector.shape_cast %662 : vector<1x72x256xf32> to vector<72x256xf32>
    %cst_307 = arith.constant dense<0.000000e+00> : vector<8x256xf32>
    %664 = tpu.matmul %16, %663, %cst_307 {dimension_numbers = #tpu.dot_dimension_numbers<[1], [0], [0], [1], [0, 0, 1, 1], [], []>} : vector<8x72xf32>, vector<72x256xf32>, vector<8x256xf32> -> vector<8x256xf32>
    %665 = arith.addf %659, %664 : vector<8x256xf32>
    %c8_i32_308 = arith.constant 8 : i32
    %666 = arith.muli %arg0, %c8_i32_308 : i32
    %667 = arith.addi %666, %c0_i32_295 : i32
    %668 = arith.index_cast %667 : i32 to index
    %c0_309 = arith.constant 0 : index
    %c0_310 = arith.constant 0 : index
    %669 = vector.load %arg6[%668, %c0_309, %c0_310] : memref<16x8x256xf32, #tpu.memory_space<vmem>>, vector<1x8x256xf32>
    %670 = vector.shape_cast %669 : vector<1x8x256xf32> to vector<8x256xf32>
    %671 = vector.shape_cast %665 : vector<8x256xf32> to vector<1x8x256xf32>
    tpu.vector_store %arg6[%668, %c0_309, %c0_310], %671 {strides = array<i32>} : memref<16x8x256xf32, #tpu.memory_space<vmem>>, vector<1x8x256xf32>,
    %c0_311 = arith.constant 0 : index
    %c0_312 = arith.constant 0 : index
    %672 = vector.load %arg8[%c0_311, %c0_312] : memref<8x256xf32, #tpu.memory_space<vmem>>, vector<8x256xf32>
    %673 = arith.addf %672, %665 : vector<8x256xf32>
    %c0_313 = arith.constant 0 : index
    %c0_314 = arith.constant 0 : index
    %674 = vector.load %arg8[%c0_313, %c0_314] : memref<8x256xf32, #tpu.memory_space<vmem>>, vector<8x256xf32>
    tpu.vector_store %arg8[%c0_313, %c0_314], %673 {strides = array<i32>} : memref<8x256xf32, #tpu.memory_space<vmem>>, vector<8x256xf32>,
    %c0_315 = arith.constant 0 : index
    %c0_316 = arith.constant 0 : index
    %675 = vector.load %arg9[%c0_315, %c0_316] : memref<8x256xf32, #tpu.memory_space<vmem>>, vector<8x256xf32>
    %676 = arith.mulf %665, %665 : vector<8x256xf32>
    %677 = arith.addf %675, %676 : vector<8x256xf32>
    %c0_317 = arith.constant 0 : index
    %c0_318 = arith.constant 0 : index
    %678 = vector.load %arg9[%c0_317, %c0_318] : memref<8x256xf32, #tpu.memory_space<vmem>>, vector<8x256xf32>
    tpu.vector_store %arg9[%c0_317, %c0_318], %677 {strides = array<i32>} : memref<8x256xf32, #tpu.memory_space<vmem>>, vector<8x256xf32>,
    %c1_i32_319 = arith.constant 1 : i32
    %cst_320 = arith.constant 0.000000e+00 : f32
    %679 = vector.broadcast %cst_320 : f32 to vector<8x256xf32>
    %c0_i32_321 = arith.constant 0 : i32
    %680 = arith.addi %c1_i32_319, %c0_i32_321 : i32
    %681 = arith.index_cast %680 : i32 to index
    %c0_322 = arith.constant 0 : index
    %c0_323 = arith.constant 0 : index
    %682 = vector.load %arg7[%681, %c0_322, %c0_323] : memref<10x72x256xf32, #tpu.memory_space<vmem>>, vector<1x72x256xf32>
    %683 = vector.shape_cast %682 : vector<1x72x256xf32> to vector<72x256xf32>
    %cst_324 = arith.constant dense<0.000000e+00> : vector<8x256xf32>
    %684 = tpu.matmul %12, %683, %cst_324 {dimension_numbers = #tpu.dot_dimension_numbers<[1], [0], [0], [1], [0, 0, 1, 1], [], []>} : vector<8x72xf32>, vector<72x256xf32>, vector<8x256xf32> -> vector<8x256xf32>
    %685 = arith.addf %679, %684 : vector<8x256xf32>
    %c1_i32_325 = arith.constant 1 : i32
    %686 = arith.addi %c1_i32_319, %c1_i32_325 : i32
    %687 = arith.index_cast %686 : i32 to index
    %c0_326 = arith.constant 0 : index
    %c0_327 = arith.constant 0 : index
    %688 = vector.load %arg7[%687, %c0_326, %c0_327] : memref<10x72x256xf32, #tpu.memory_space<vmem>>, vector<1x72x256xf32>
    %689 = vector.shape_cast %688 : vector<1x72x256xf32> to vector<72x256xf32>
    %cst_328 = arith.constant dense<0.000000e+00> : vector<8x256xf32>
    %690 = tpu.matmul %14, %689, %cst_328 {dimension_numbers = #tpu.dot_dimension_numbers<[1], [0], [0], [1], [0, 0, 1, 1], [], []>} : vector<8x72xf32>, vector<72x256xf32>, vector<8x256xf32> -> vector<8x256xf32>
    %691 = arith.addf %685, %690 : vector<8x256xf32>
    %c2_i32_329 = arith.constant 2 : i32
    %692 = arith.addi %c1_i32_319, %c2_i32_329 : i32
    %693 = arith.index_cast %692 : i32 to index
    %c0_330 = arith.constant 0 : index
    %c0_331 = arith.constant 0 : index
    %694 = vector.load %arg7[%693, %c0_330, %c0_331] : memref<10x72x256xf32, #tpu.memory_space<vmem>>, vector<1x72x256xf32>
    %695 = vector.shape_cast %694 : vector<1x72x256xf32> to vector<72x256xf32>
    %cst_332 = arith.constant dense<0.000000e+00> : vector<8x256xf32>
    %696 = tpu.matmul %16, %695, %cst_332 {dimension_numbers = #tpu.dot_dimension_numbers<[1], [0], [0], [1], [0, 0, 1, 1], [], []>} : vector<8x72xf32>, vector<72x256xf32>, vector<8x256xf32> -> vector<8x256xf32>
    %697 = arith.addf %691, %696 : vector<8x256xf32>
    %c8_i32_333 = arith.constant 8 : i32
    %698 = arith.muli %arg0, %c8_i32_333 : i32
    %699 = arith.addi %698, %c1_i32_319 : i32
    %700 = arith.index_cast %699 : i32 to index
    %c0_334 = arith.constant 0 : index
    %c0_335 = arith.constant 0 : index
    %701 = vector.load %arg6[%700, %c0_334, %c0_335] : memref<16x8x256xf32, #tpu.memory_space<vmem>>, vector<1x8x256xf32>
    %702 = vector.shape_cast %701 : vector<1x8x256xf32> to vector<8x256xf32>
    %703 = vector.shape_cast %697 : vector<8x256xf32> to vector<1x8x256xf32>
    tpu.vector_store %arg6[%700, %c0_334, %c0_335], %703 {strides = array<i32>} : memref<16x8x256xf32, #tpu.memory_space<vmem>>, vector<1x8x256xf32>,
    %c0_336 = arith.constant 0 : index
    %c0_337 = arith.constant 0 : index
    %704 = vector.load %arg8[%c0_336, %c0_337] : memref<8x256xf32, #tpu.memory_space<vmem>>, vector<8x256xf32>
    %705 = arith.addf %704, %697 : vector<8x256xf32>
    %c0_338 = arith.constant 0 : index
    %c0_339 = arith.constant 0 : index
    %706 = vector.load %arg8[%c0_338, %c0_339] : memref<8x256xf32, #tpu.memory_space<vmem>>, vector<8x256xf32>
    tpu.vector_store %arg8[%c0_338, %c0_339], %705 {strides = array<i32>} : memref<8x256xf32, #tpu.memory_space<vmem>>, vector<8x256xf32>,
    %c0_340 = arith.constant 0 : index
    %c0_341 = arith.constant 0 : index
    %707 = vector.load %arg9[%c0_340, %c0_341] : memref<8x256xf32, #tpu.memory_space<vmem>>, vector<8x256xf32>
    %708 = arith.mulf %697, %697 : vector<8x256xf32>
    %709 = arith.addf %707, %708 : vector<8x256xf32>
    %c0_342 = arith.constant 0 : index
    %c0_343 = arith.constant 0 : index
    %710 = vector.load %arg9[%c0_342, %c0_343] : memref<8x256xf32, #tpu.memory_space<vmem>>, vector<8x256xf32>
    tpu.vector_store %arg9[%c0_342, %c0_343], %709 {strides = array<i32>} : memref<8x256xf32, #tpu.memory_space<vmem>>, vector<8x256xf32>,
    %c2_i32_344 = arith.constant 2 : i32
    %cst_345 = arith.constant 0.000000e+00 : f32
    %711 = vector.broadcast %cst_345 : f32 to vector<8x256xf32>
    %c0_i32_346 = arith.constant 0 : i32
    %712 = arith.addi %c2_i32_344, %c0_i32_346 : i32
    %713 = arith.index_cast %712 : i32 to index
    %c0_347 = arith.constant 0 : index
    %c0_348 = arith.constant 0 : index
    %714 = vector.load %arg7[%713, %c0_347, %c0_348] : memref<10x72x256xf32, #tpu.memory_space<vmem>>, vector<1x72x256xf32>
    %715 = vector.shape_cast %714 : vector<1x72x256xf32> to vector<72x256xf32>
    %cst_349 = arith.constant dense<0.000000e+00> : vector<8x256xf32>
    %716 = tpu.matmul %12, %715, %cst_349 {dimension_numbers = #tpu.dot_dimension_numbers<[1], [0], [0], [1], [0, 0, 1, 1], [], []>} : vector<8x72xf32>, vector<72x256xf32>, vector<8x256xf32> -> vector<8x256xf32>
    %717 = arith.addf %711, %716 : vector<8x256xf32>
    %c1_i32_350 = arith.constant 1 : i32
    %718 = arith.addi %c2_i32_344, %c1_i32_350 : i32
    %719 = arith.index_cast %718 : i32 to index
    %c0_351 = arith.constant 0 : index
    %c0_352 = arith.constant 0 : index
    %720 = vector.load %arg7[%719, %c0_351, %c0_352] : memref<10x72x256xf32, #tpu.memory_space<vmem>>, vector<1x72x256xf32>
    %721 = vector.shape_cast %720 : vector<1x72x256xf32> to vector<72x256xf32>
    %cst_353 = arith.constant dense<0.000000e+00> : vector<8x256xf32>
    %722 = tpu.matmul %14, %721, %cst_353 {dimension_numbers = #tpu.dot_dimension_numbers<[1], [0], [0], [1], [0, 0, 1, 1], [], []>} : vector<8x72xf32>, vector<72x256xf32>, vector<8x256xf32> -> vector<8x256xf32>
    %723 = arith.addf %717, %722 : vector<8x256xf32>
    %c2_i32_354 = arith.constant 2 : i32
    %724 = arith.addi %c2_i32_344, %c2_i32_354 : i32
    %725 = arith.index_cast %724 : i32 to index
    %c0_355 = arith.constant 0 : index
    %c0_356 = arith.constant 0 : index
    %726 = vector.load %arg7[%725, %c0_355, %c0_356] : memref<10x72x256xf32, #tpu.memory_space<vmem>>, vector<1x72x256xf32>
    %727 = vector.shape_cast %726 : vector<1x72x256xf32> to vector<72x256xf32>
    %cst_357 = arith.constant dense<0.000000e+00> : vector<8x256xf32>
    %728 = tpu.matmul %16, %727, %cst_357 {dimension_numbers = #tpu.dot_dimension_numbers<[1], [0], [0], [1], [0, 0, 1, 1], [], []>} : vector<8x72xf32>, vector<72x256xf32>, vector<8x256xf32> -> vector<8x256xf32>
    %729 = arith.addf %723, %728 : vector<8x256xf32>
    %c8_i32_358 = arith.constant 8 : i32
    %730 = arith.muli %arg0, %c8_i32_358 : i32
    %731 = arith.addi %730, %c2_i32_344 : i32
    %732 = arith.index_cast %731 : i32 to index
    %c0_359 = arith.constant 0 : index
    %c0_360 = arith.constant 0 : index
    %733 = vector.load %arg6[%732, %c0_359, %c0_360] : memref<16x8x256xf32, #tpu.memory_space<vmem>>, vector<1x8x256xf32>
    %734 = vector.shape_cast %733 : vector<1x8x256xf32> to vector<8x256xf32>
    %735 = vector.shape_cast %729 : vector<8x256xf32> to vector<1x8x256xf32>
    tpu.vector_store %arg6[%732, %c0_359, %c0_360], %735 {strides = array<i32>} : memref<16x8x256xf32, #tpu.memory_space<vmem>>, vector<1x8x256xf32>,
    %c0_361 = arith.constant 0 : index
    %c0_362 = arith.constant 0 : index
    %736 = vector.load %arg8[%c0_361, %c0_362] : memref<8x256xf32, #tpu.memory_space<vmem>>, vector<8x256xf32>
    %737 = arith.addf %736, %729 : vector<8x256xf32>
    %c0_363 = arith.constant 0 : index
    %c0_364 = arith.constant 0 : index
    %738 = vector.load %arg8[%c0_363, %c0_364] : memref<8x256xf32, #tpu.memory_space<vmem>>, vector<8x256xf32>
    tpu.vector_store %arg8[%c0_363, %c0_364], %737 {strides = array<i32>} : memref<8x256xf32, #tpu.memory_space<vmem>>, vector<8x256xf32>,
    %c0_365 = arith.constant 0 : index
    %c0_366 = arith.constant 0 : index
    %739 = vector.load %arg9[%c0_365, %c0_366] : memref<8x256xf32, #tpu.memory_space<vmem>>, vector<8x256xf32>
    %740 = arith.mulf %729, %729 : vector<8x256xf32>
    %741 = arith.addf %739, %740 : vector<8x256xf32>
    %c0_367 = arith.constant 0 : index
    %c0_368 = arith.constant 0 : index
    %742 = vector.load %arg9[%c0_367, %c0_368] : memref<8x256xf32, #tpu.memory_space<vmem>>, vector<8x256xf32>
    tpu.vector_store %arg9[%c0_367, %c0_368], %741 {strides = array<i32>} : memref<8x256xf32, #tpu.memory_space<vmem>>, vector<8x256xf32>,
    %c3_i32_369 = arith.constant 3 : i32
    %cst_370 = arith.constant 0.000000e+00 : f32
    %743 = vector.broadcast %cst_370 : f32 to vector<8x256xf32>
    %c0_i32_371 = arith.constant 0 : i32
    %744 = arith.addi %c3_i32_369, %c0_i32_371 : i32
    %745 = arith.index_cast %744 : i32 to index
    %c0_372 = arith.constant 0 : index
    %c0_373 = arith.constant 0 : index
    %746 = vector.load %arg7[%745, %c0_372, %c0_373] : memref<10x72x256xf32, #tpu.memory_space<vmem>>, vector<1x72x256xf32>
    %747 = vector.shape_cast %746 : vector<1x72x256xf32> to vector<72x256xf32>
    %cst_374 = arith.constant dense<0.000000e+00> : vector<8x256xf32>
    %748 = tpu.matmul %12, %747, %cst_374 {dimension_numbers = #tpu.dot_dimension_numbers<[1], [0], [0], [1], [0, 0, 1, 1], [], []>} : vector<8x72xf32>, vector<72x256xf32>, vector<8x256xf32> -> vector<8x256xf32>
    %749 = arith.addf %743, %748 : vector<8x256xf32>
    %c1_i32_375 = arith.constant 1 : i32
    %750 = arith.addi %c3_i32_369, %c1_i32_375 : i32
    %751 = arith.index_cast %750 : i32 to index
    %c0_376 = arith.constant 0 : index
    %c0_377 = arith.constant 0 : index
    %752 = vector.load %arg7[%751, %c0_376, %c0_377] : memref<10x72x256xf32, #tpu.memory_space<vmem>>, vector<1x72x256xf32>
    %753 = vector.shape_cast %752 : vector<1x72x256xf32> to vector<72x256xf32>
    %cst_378 = arith.constant dense<0.000000e+00> : vector<8x256xf32>
    %754 = tpu.matmul %14, %753, %cst_378 {dimension_numbers = #tpu.dot_dimension_numbers<[1], [0], [0], [1], [0, 0, 1, 1], [], []>} : vector<8x72xf32>, vector<72x256xf32>, vector<8x256xf32> -> vector<8x256xf32>
    %755 = arith.addf %749, %754 : vector<8x256xf32>
    %c2_i32_379 = arith.constant 2 : i32
    %756 = arith.addi %c3_i32_369, %c2_i32_379 : i32
    %757 = arith.index_cast %756 : i32 to index
    %c0_380 = arith.constant 0 : index
    %c0_381 = arith.constant 0 : index
    %758 = vector.load %arg7[%757, %c0_380, %c0_381] : memref<10x72x256xf32, #tpu.memory_space<vmem>>, vector<1x72x256xf32>
    %759 = vector.shape_cast %758 : vector<1x72x256xf32> to vector<72x256xf32>
    %cst_382 = arith.constant dense<0.000000e+00> : vector<8x256xf32>
    %760 = tpu.matmul %16, %759, %cst_382 {dimension_numbers = #tpu.dot_dimension_numbers<[1], [0], [0], [1], [0, 0, 1, 1], [], []>} : vector<8x72xf32>, vector<72x256xf32>, vector<8x256xf32> -> vector<8x256xf32>
    %761 = arith.addf %755, %760 : vector<8x256xf32>
    %c8_i32_383 = arith.constant 8 : i32
    %762 = arith.muli %arg0, %c8_i32_383 : i32
    %763 = arith.addi %762, %c3_i32_369 : i32
    %764 = arith.index_cast %763 : i32 to index
    %c0_384 = arith.constant 0 : index
    %c0_385 = arith.constant 0 : index
    %765 = vector.load %arg6[%764, %c0_384, %c0_385] : memref<16x8x256xf32, #tpu.memory_space<vmem>>, vector<1x8x256xf32>
    %766 = vector.shape_cast %765 : vector<1x8x256xf32> to vector<8x256xf32>
    %767 = vector.shape_cast %761 : vector<8x256xf32> to vector<1x8x256xf32>
    tpu.vector_store %arg6[%764, %c0_384, %c0_385], %767 {strides = array<i32>} : memref<16x8x256xf32, #tpu.memory_space<vmem>>, vector<1x8x256xf32>,
    %c0_386 = arith.constant 0 : index
    %c0_387 = arith.constant 0 : index
    %768 = vector.load %arg8[%c0_386, %c0_387] : memref<8x256xf32, #tpu.memory_space<vmem>>, vector<8x256xf32>
    %769 = arith.addf %768, %761 : vector<8x256xf32>
    %c0_388 = arith.constant 0 : index
    %c0_389 = arith.constant 0 : index
    %770 = vector.load %arg8[%c0_388, %c0_389] : memref<8x256xf32, #tpu.memory_space<vmem>>, vector<8x256xf32>
    tpu.vector_store %arg8[%c0_388, %c0_389], %769 {strides = array<i32>} : memref<8x256xf32, #tpu.memory_space<vmem>>, vector<8x256xf32>,
    %c0_390 = arith.constant 0 : index
    %c0_391 = arith.constant 0 : index
    %771 = vector.load %arg9[%c0_390, %c0_391] : memref<8x256xf32, #tpu.memory_space<vmem>>, vector<8x256xf32>
    %772 = arith.mulf %761, %761 : vector<8x256xf32>
    %773 = arith.addf %771, %772 : vector<8x256xf32>
    %c0_392 = arith.constant 0 : index
    %c0_393 = arith.constant 0 : index
    %774 = vector.load %arg9[%c0_392, %c0_393] : memref<8x256xf32, #tpu.memory_space<vmem>>, vector<8x256xf32>
    tpu.vector_store %arg9[%c0_392, %c0_393], %773 {strides = array<i32>} : memref<8x256xf32, #tpu.memory_space<vmem>>, vector<8x256xf32>,
    %c4_i32_394 = arith.constant 4 : i32
    %cst_395 = arith.constant 0.000000e+00 : f32
    %775 = vector.broadcast %cst_395 : f32 to vector<8x256xf32>
    %c0_i32_396 = arith.constant 0 : i32
    %776 = arith.addi %c4_i32_394, %c0_i32_396 : i32
    %777 = arith.index_cast %776 : i32 to index
    %c0_397 = arith.constant 0 : index
    %c0_398 = arith.constant 0 : index
    %778 = vector.load %arg7[%777, %c0_397, %c0_398] : memref<10x72x256xf32, #tpu.memory_space<vmem>>, vector<1x72x256xf32>
    %779 = vector.shape_cast %778 : vector<1x72x256xf32> to vector<72x256xf32>
    %cst_399 = arith.constant dense<0.000000e+00> : vector<8x256xf32>
    %780 = tpu.matmul %12, %779, %cst_399 {dimension_numbers = #tpu.dot_dimension_numbers<[1], [0], [0], [1], [0, 0, 1, 1], [], []>} : vector<8x72xf32>, vector<72x256xf32>, vector<8x256xf32> -> vector<8x256xf32>
    %781 = arith.addf %775, %780 : vector<8x256xf32>
    %c1_i32_400 = arith.constant 1 : i32
    %782 = arith.addi %c4_i32_394, %c1_i32_400 : i32
    %783 = arith.index_cast %782 : i32 to index
    %c0_401 = arith.constant 0 : index
    %c0_402 = arith.constant 0 : index
    %784 = vector.load %arg7[%783, %c0_401, %c0_402] : memref<10x72x256xf32, #tpu.memory_space<vmem>>, vector<1x72x256xf32>
    %785 = vector.shape_cast %784 : vector<1x72x256xf32> to vector<72x256xf32>
    %cst_403 = arith.constant dense<0.000000e+00> : vector<8x256xf32>
    %786 = tpu.matmul %14, %785, %cst_403 {dimension_numbers = #tpu.dot_dimension_numbers<[1], [0], [0], [1], [0, 0, 1, 1], [], []>} : vector<8x72xf32>, vector<72x256xf32>, vector<8x256xf32> -> vector<8x256xf32>
    %787 = arith.addf %781, %786 : vector<8x256xf32>
    %c2_i32_404 = arith.constant 2 : i32
    %788 = arith.addi %c4_i32_394, %c2_i32_404 : i32
    %789 = arith.index_cast %788 : i32 to index
    %c0_405 = arith.constant 0 : index
    %c0_406 = arith.constant 0 : index
    %790 = vector.load %arg7[%789, %c0_405, %c0_406] : memref<10x72x256xf32, #tpu.memory_space<vmem>>, vector<1x72x256xf32>
    %791 = vector.shape_cast %790 : vector<1x72x256xf32> to vector<72x256xf32>
    %cst_407 = arith.constant dense<0.000000e+00> : vector<8x256xf32>
    %792 = tpu.matmul %16, %791, %cst_407 {dimension_numbers = #tpu.dot_dimension_numbers<[1], [0], [0], [1], [0, 0, 1, 1], [], []>} : vector<8x72xf32>, vector<72x256xf32>, vector<8x256xf32> -> vector<8x256xf32>
    %793 = arith.addf %787, %792 : vector<8x256xf32>
    %c8_i32_408 = arith.constant 8 : i32
    %794 = arith.muli %arg0, %c8_i32_408 : i32
    %795 = arith.addi %794, %c4_i32_394 : i32
    %796 = arith.index_cast %795 : i32 to index
    %c0_409 = arith.constant 0 : index
    %c0_410 = arith.constant 0 : index
    %797 = vector.load %arg6[%796, %c0_409, %c0_410] : memref<16x8x256xf32, #tpu.memory_space<vmem>>, vector<1x8x256xf32>
    %798 = vector.shape_cast %797 : vector<1x8x256xf32> to vector<8x256xf32>
    %799 = vector.shape_cast %793 : vector<8x256xf32> to vector<1x8x256xf32>
    tpu.vector_store %arg6[%796, %c0_409, %c0_410], %799 {strides = array<i32>} : memref<16x8x256xf32, #tpu.memory_space<vmem>>, vector<1x8x256xf32>,
    %c0_411 = arith.constant 0 : index
    %c0_412 = arith.constant 0 : index
    %800 = vector.load %arg8[%c0_411, %c0_412] : memref<8x256xf32, #tpu.memory_space<vmem>>, vector<8x256xf32>
    %801 = arith.addf %800, %793 : vector<8x256xf32>
    %c0_413 = arith.constant 0 : index
    %c0_414 = arith.constant 0 : index
    %802 = vector.load %arg8[%c0_413, %c0_414] : memref<8x256xf32, #tpu.memory_space<vmem>>, vector<8x256xf32>
    tpu.vector_store %arg8[%c0_413, %c0_414], %801 {strides = array<i32>} : memref<8x256xf32, #tpu.memory_space<vmem>>, vector<8x256xf32>,
    %c0_415 = arith.constant 0 : index
    %c0_416 = arith.constant 0 : index
    %803 = vector.load %arg9[%c0_415, %c0_416] : memref<8x256xf32, #tpu.memory_space<vmem>>, vector<8x256xf32>
    %804 = arith.mulf %793, %793 : vector<8x256xf32>
    %805 = arith.addf %803, %804 : vector<8x256xf32>
    %c0_417 = arith.constant 0 : index
    %c0_418 = arith.constant 0 : index
    %806 = vector.load %arg9[%c0_417, %c0_418] : memref<8x256xf32, #tpu.memory_space<vmem>>, vector<8x256xf32>
    tpu.vector_store %arg9[%c0_417, %c0_418], %805 {strides = array<i32>} : memref<8x256xf32, #tpu.memory_space<vmem>>, vector<8x256xf32>,
    %c5_i32_419 = arith.constant 5 : i32
    %cst_420 = arith.constant 0.000000e+00 : f32
    %807 = vector.broadcast %cst_420 : f32 to vector<8x256xf32>
    %c0_i32_421 = arith.constant 0 : i32
    %808 = arith.addi %c5_i32_419, %c0_i32_421 : i32
    %809 = arith.index_cast %808 : i32 to index
    %c0_422 = arith.constant 0 : index
    %c0_423 = arith.constant 0 : index
    %810 = vector.load %arg7[%809, %c0_422, %c0_423] : memref<10x72x256xf32, #tpu.memory_space<vmem>>, vector<1x72x256xf32>
    %811 = vector.shape_cast %810 : vector<1x72x256xf32> to vector<72x256xf32>
    %cst_424 = arith.constant dense<0.000000e+00> : vector<8x256xf32>
    %812 = tpu.matmul %12, %811, %cst_424 {dimension_numbers = #tpu.dot_dimension_numbers<[1], [0], [0], [1], [0, 0, 1, 1], [], []>} : vector<8x72xf32>, vector<72x256xf32>, vector<8x256xf32> -> vector<8x256xf32>
    %813 = arith.addf %807, %812 : vector<8x256xf32>
    %c1_i32_425 = arith.constant 1 : i32
    %814 = arith.addi %c5_i32_419, %c1_i32_425 : i32
    %815 = arith.index_cast %814 : i32 to index
    %c0_426 = arith.constant 0 : index
    %c0_427 = arith.constant 0 : index
    %816 = vector.load %arg7[%815, %c0_426, %c0_427] : memref<10x72x256xf32, #tpu.memory_space<vmem>>, vector<1x72x256xf32>
    %817 = vector.shape_cast %816 : vector<1x72x256xf32> to vector<72x256xf32>
    %cst_428 = arith.constant dense<0.000000e+00> : vector<8x256xf32>
    %818 = tpu.matmul %14, %817, %cst_428 {dimension_numbers = #tpu.dot_dimension_numbers<[1], [0], [0], [1], [0, 0, 1, 1], [], []>} : vector<8x72xf32>, vector<72x256xf32>, vector<8x256xf32> -> vector<8x256xf32>
    %819 = arith.addf %813, %818 : vector<8x256xf32>
    %c2_i32_429 = arith.constant 2 : i32
    %820 = arith.addi %c5_i32_419, %c2_i32_429 : i32
    %821 = arith.index_cast %820 : i32 to index
    %c0_430 = arith.constant 0 : index
    %c0_431 = arith.constant 0 : index
    %822 = vector.load %arg7[%821, %c0_430, %c0_431] : memref<10x72x256xf32, #tpu.memory_space<vmem>>, vector<1x72x256xf32>
    %823 = vector.shape_cast %822 : vector<1x72x256xf32> to vector<72x256xf32>
    %cst_432 = arith.constant dense<0.000000e+00> : vector<8x256xf32>
    %824 = tpu.matmul %16, %823, %cst_432 {dimension_numbers = #tpu.dot_dimension_numbers<[1], [0], [0], [1], [0, 0, 1, 1], [], []>} : vector<8x72xf32>, vector<72x256xf32>, vector<8x256xf32> -> vector<8x256xf32>
    %825 = arith.addf %819, %824 : vector<8x256xf32>
    %c8_i32_433 = arith.constant 8 : i32
    %826 = arith.muli %arg0, %c8_i32_433 : i32
    %827 = arith.addi %826, %c5_i32_419 : i32
    %828 = arith.index_cast %827 : i32 to index
    %c0_434 = arith.constant 0 : index
    %c0_435 = arith.constant 0 : index
    %829 = vector.load %arg6[%828, %c0_434, %c0_435] : memref<16x8x256xf32, #tpu.memory_space<vmem>>, vector<1x8x256xf32>
    %830 = vector.shape_cast %829 : vector<1x8x256xf32> to vector<8x256xf32>
    %831 = vector.shape_cast %825 : vector<8x256xf32> to vector<1x8x256xf32>
    tpu.vector_store %arg6[%828, %c0_434, %c0_435], %831 {strides = array<i32>} : memref<16x8x256xf32, #tpu.memory_space<vmem>>, vector<1x8x256xf32>,
    %c0_436 = arith.constant 0 : index
    %c0_437 = arith.constant 0 : index
    %832 = vector.load %arg8[%c0_436, %c0_437] : memref<8x256xf32, #tpu.memory_space<vmem>>, vector<8x256xf32>
    %833 = arith.addf %832, %825 : vector<8x256xf32>
    %c0_438 = arith.constant 0 : index
    %c0_439 = arith.constant 0 : index
    %834 = vector.load %arg8[%c0_438, %c0_439] : memref<8x256xf32, #tpu.memory_space<vmem>>, vector<8x256xf32>
    tpu.vector_store %arg8[%c0_438, %c0_439], %833 {strides = array<i32>} : memref<8x256xf32, #tpu.memory_space<vmem>>, vector<8x256xf32>,
    %c0_440 = arith.constant 0 : index
    %c0_441 = arith.constant 0 : index
    %835 = vector.load %arg9[%c0_440, %c0_441] : memref<8x256xf32, #tpu.memory_space<vmem>>, vector<8x256xf32>
    %836 = arith.mulf %825, %825 : vector<8x256xf32>
    %837 = arith.addf %835, %836 : vector<8x256xf32>
    %c0_442 = arith.constant 0 : index
    %c0_443 = arith.constant 0 : index
    %838 = vector.load %arg9[%c0_442, %c0_443] : memref<8x256xf32, #tpu.memory_space<vmem>>, vector<8x256xf32>
    tpu.vector_store %arg9[%c0_442, %c0_443], %837 {strides = array<i32>} : memref<8x256xf32, #tpu.memory_space<vmem>>, vector<8x256xf32>,
    %c6_i32_444 = arith.constant 6 : i32
    %cst_445 = arith.constant 0.000000e+00 : f32
    %839 = vector.broadcast %cst_445 : f32 to vector<8x256xf32>
    %c0_i32_446 = arith.constant 0 : i32
    %840 = arith.addi %c6_i32_444, %c0_i32_446 : i32
    %841 = arith.index_cast %840 : i32 to index
    %c0_447 = arith.constant 0 : index
    %c0_448 = arith.constant 0 : index
    %842 = vector.load %arg7[%841, %c0_447, %c0_448] : memref<10x72x256xf32, #tpu.memory_space<vmem>>, vector<1x72x256xf32>
    %843 = vector.shape_cast %842 : vector<1x72x256xf32> to vector<72x256xf32>
    %cst_449 = arith.constant dense<0.000000e+00> : vector<8x256xf32>
    %844 = tpu.matmul %12, %843, %cst_449 {dimension_numbers = #tpu.dot_dimension_numbers<[1], [0], [0], [1], [0, 0, 1, 1], [], []>} : vector<8x72xf32>, vector<72x256xf32>, vector<8x256xf32> -> vector<8x256xf32>
    %845 = arith.addf %839, %844 : vector<8x256xf32>
    %c1_i32_450 = arith.constant 1 : i32
    %846 = arith.addi %c6_i32_444, %c1_i32_450 : i32
    %847 = arith.index_cast %846 : i32 to index
    %c0_451 = arith.constant 0 : index
    %c0_452 = arith.constant 0 : index
    %848 = vector.load %arg7[%847, %c0_451, %c0_452] : memref<10x72x256xf32, #tpu.memory_space<vmem>>, vector<1x72x256xf32>
    %849 = vector.shape_cast %848 : vector<1x72x256xf32> to vector<72x256xf32>
    %cst_453 = arith.constant dense<0.000000e+00> : vector<8x256xf32>
    %850 = tpu.matmul %14, %849, %cst_453 {dimension_numbers = #tpu.dot_dimension_numbers<[1], [0], [0], [1], [0, 0, 1, 1], [], []>} : vector<8x72xf32>, vector<72x256xf32>, vector<8x256xf32> -> vector<8x256xf32>
    %851 = arith.addf %845, %850 : vector<8x256xf32>
    %c2_i32_454 = arith.constant 2 : i32
    %852 = arith.addi %c6_i32_444, %c2_i32_454 : i32
    %853 = arith.index_cast %852 : i32 to index
    %c0_455 = arith.constant 0 : index
    %c0_456 = arith.constant 0 : index
    %854 = vector.load %arg7[%853, %c0_455, %c0_456] : memref<10x72x256xf32, #tpu.memory_space<vmem>>, vector<1x72x256xf32>
    %855 = vector.shape_cast %854 : vector<1x72x256xf32> to vector<72x256xf32>
    %cst_457 = arith.constant dense<0.000000e+00> : vector<8x256xf32>
    %856 = tpu.matmul %16, %855, %cst_457 {dimension_numbers = #tpu.dot_dimension_numbers<[1], [0], [0], [1], [0, 0, 1, 1], [], []>} : vector<8x72xf32>, vector<72x256xf32>, vector<8x256xf32> -> vector<8x256xf32>
    %857 = arith.addf %851, %856 : vector<8x256xf32>
    %c8_i32_458 = arith.constant 8 : i32
    %858 = arith.muli %arg0, %c8_i32_458 : i32
    %859 = arith.addi %858, %c6_i32_444 : i32
    %860 = arith.index_cast %859 : i32 to index
    %c0_459 = arith.constant 0 : index
    %c0_460 = arith.constant 0 : index
    %861 = vector.load %arg6[%860, %c0_459, %c0_460] : memref<16x8x256xf32, #tpu.memory_space<vmem>>, vector<1x8x256xf32>
    %862 = vector.shape_cast %861 : vector<1x8x256xf32> to vector<8x256xf32>
    %863 = vector.shape_cast %857 : vector<8x256xf32> to vector<1x8x256xf32>
    tpu.vector_store %arg6[%860, %c0_459, %c0_460], %863 {strides = array<i32>} : memref<16x8x256xf32, #tpu.memory_space<vmem>>, vector<1x8x256xf32>,
    %c0_461 = arith.constant 0 : index
    %c0_462 = arith.constant 0 : index
    %864 = vector.load %arg8[%c0_461, %c0_462] : memref<8x256xf32, #tpu.memory_space<vmem>>, vector<8x256xf32>
    %865 = arith.addf %864, %857 : vector<8x256xf32>
    %c0_463 = arith.constant 0 : index
    %c0_464 = arith.constant 0 : index
    %866 = vector.load %arg8[%c0_463, %c0_464] : memref<8x256xf32, #tpu.memory_space<vmem>>, vector<8x256xf32>
    tpu.vector_store %arg8[%c0_463, %c0_464], %865 {strides = array<i32>} : memref<8x256xf32, #tpu.memory_space<vmem>>, vector<8x256xf32>,
    %c0_465 = arith.constant 0 : index
    %c0_466 = arith.constant 0 : index
    %867 = vector.load %arg9[%c0_465, %c0_466] : memref<8x256xf32, #tpu.memory_space<vmem>>, vector<8x256xf32>
    %868 = arith.mulf %857, %857 : vector<8x256xf32>
    %869 = arith.addf %867, %868 : vector<8x256xf32>
    %c0_467 = arith.constant 0 : index
    %c0_468 = arith.constant 0 : index
    %870 = vector.load %arg9[%c0_467, %c0_468] : memref<8x256xf32, #tpu.memory_space<vmem>>, vector<8x256xf32>
    tpu.vector_store %arg9[%c0_467, %c0_468], %869 {strides = array<i32>} : memref<8x256xf32, #tpu.memory_space<vmem>>, vector<8x256xf32>,
    %c7_i32_469 = arith.constant 7 : i32
    %cst_470 = arith.constant 0.000000e+00 : f32
    %871 = vector.broadcast %cst_470 : f32 to vector<8x256xf32>
    %c0_i32_471 = arith.constant 0 : i32
    %872 = arith.addi %c7_i32_469, %c0_i32_471 : i32
    %873 = arith.index_cast %872 : i32 to index
    %c0_472 = arith.constant 0 : index
    %c0_473 = arith.constant 0 : index
    %874 = vector.load %arg7[%873, %c0_472, %c0_473] : memref<10x72x256xf32, #tpu.memory_space<vmem>>, vector<1x72x256xf32>
    %875 = vector.shape_cast %874 : vector<1x72x256xf32> to vector<72x256xf32>
    %cst_474 = arith.constant dense<0.000000e+00> : vector<8x256xf32>
    %876 = tpu.matmul %12, %875, %cst_474 {dimension_numbers = #tpu.dot_dimension_numbers<[1], [0], [0], [1], [0, 0, 1, 1], [], []>} : vector<8x72xf32>, vector<72x256xf32>, vector<8x256xf32> -> vector<8x256xf32>
    %877 = arith.addf %871, %876 : vector<8x256xf32>
    %c1_i32_475 = arith.constant 1 : i32
    %878 = arith.addi %c7_i32_469, %c1_i32_475 : i32
    %879 = arith.index_cast %878 : i32 to index
    %c0_476 = arith.constant 0 : index
    %c0_477 = arith.constant 0 : index
    %880 = vector.load %arg7[%879, %c0_476, %c0_477] : memref<10x72x256xf32, #tpu.memory_space<vmem>>, vector<1x72x256xf32>
    %881 = vector.shape_cast %880 : vector<1x72x256xf32> to vector<72x256xf32>
    %cst_478 = arith.constant dense<0.000000e+00> : vector<8x256xf32>
    %882 = tpu.matmul %14, %881, %cst_478 {dimension_numbers = #tpu.dot_dimension_numbers<[1], [0], [0], [1], [0, 0, 1, 1], [], []>} : vector<8x72xf32>, vector<72x256xf32>, vector<8x256xf32> -> vector<8x256xf32>
    %883 = arith.addf %877, %882 : vector<8x256xf32>
    %c2_i32_479 = arith.constant 2 : i32
    %884 = arith.addi %c7_i32_469, %c2_i32_479 : i32
    %885 = arith.index_cast %884 : i32 to index
    %c0_480 = arith.constant 0 : index
    %c0_481 = arith.constant 0 : index
    %886 = vector.load %arg7[%885, %c0_480, %c0_481] : memref<10x72x256xf32, #tpu.memory_space<vmem>>, vector<1x72x256xf32>
    %887 = vector.shape_cast %886 : vector<1x72x256xf32> to vector<72x256xf32>
    %cst_482 = arith.constant dense<0.000000e+00> : vector<8x256xf32>
    %888 = tpu.matmul %16, %887, %cst_482 {dimension_numbers = #tpu.dot_dimension_numbers<[1], [0], [0], [1], [0, 0, 1, 1], [], []>} : vector<8x72xf32>, vector<72x256xf32>, vector<8x256xf32> -> vector<8x256xf32>
    %889 = arith.addf %883, %888 : vector<8x256xf32>
    %c8_i32_483 = arith.constant 8 : i32
    %890 = arith.muli %arg0, %c8_i32_483 : i32
    %891 = arith.addi %890, %c7_i32_469 : i32
    %892 = arith.index_cast %891 : i32 to index
    %c0_484 = arith.constant 0 : index
    %c0_485 = arith.constant 0 : index
    %893 = vector.load %arg6[%892, %c0_484, %c0_485] : memref<16x8x256xf32, #tpu.memory_space<vmem>>, vector<1x8x256xf32>
    %894 = vector.shape_cast %893 : vector<1x8x256xf32> to vector<8x256xf32>
    %895 = vector.shape_cast %889 : vector<8x256xf32> to vector<1x8x256xf32>
    tpu.vector_store %arg6[%892, %c0_484, %c0_485], %895 {strides = array<i32>} : memref<16x8x256xf32, #tpu.memory_space<vmem>>, vector<1x8x256xf32>,
    %c0_486 = arith.constant 0 : index
    %c0_487 = arith.constant 0 : index
    %896 = vector.load %arg8[%c0_486, %c0_487] : memref<8x256xf32, #tpu.memory_space<vmem>>, vector<8x256xf32>
    %897 = arith.addf %896, %889 : vector<8x256xf32>
    %c0_488 = arith.constant 0 : index
    %c0_489 = arith.constant 0 : index
    %898 = vector.load %arg8[%c0_488, %c0_489] : memref<8x256xf32, #tpu.memory_space<vmem>>, vector<8x256xf32>
    tpu.vector_store %arg8[%c0_488, %c0_489], %897 {strides = array<i32>} : memref<8x256xf32, #tpu.memory_space<vmem>>, vector<8x256xf32>,
    %c0_490 = arith.constant 0 : index
    %c0_491 = arith.constant 0 : index
    %899 = vector.load %arg9[%c0_490, %c0_491] : memref<8x256xf32, #tpu.memory_space<vmem>>, vector<8x256xf32>
    %900 = arith.mulf %889, %889 : vector<8x256xf32>
    %901 = arith.addf %899, %900 : vector<8x256xf32>
    %c0_492 = arith.constant 0 : index
    %c0_493 = arith.constant 0 : index
    %902 = vector.load %arg9[%c0_492, %c0_493] : memref<8x256xf32, #tpu.memory_space<vmem>>, vector<8x256xf32>
    tpu.vector_store %arg9[%c0_492, %c0_493], %901 {strides = array<i32>} : memref<8x256xf32, #tpu.memory_space<vmem>>, vector<8x256xf32>,
    %c8_i32_494 = arith.constant 8 : i32
    %c1_i32_495 = arith.constant 1 : i32
    %903 = arith.cmpi eq, %arg0, %c1_i32_495 : i32
    %904 = arith.extui %903 : i1 to i32
    %c0_i32_496 = arith.constant 0 : i32
    %905 = arith.cmpi ne, %904, %c0_i32_496 : i32
    scf.if %905 {
      %c0_497 = arith.constant 0 : index
      %c0_498 = arith.constant 0 : index
      %906 = vector.load %arg8[%c0_497, %c0_498] : memref<8x256xf32, #tpu.memory_space<vmem>>, vector<8x256xf32>
      %cst_499 = arith.constant dense<0.000000e+00> : vector<8xf32>
      %907 = vector.multi_reduction <add>, %906, %cst_499 [1] : vector<8x256xf32> to vector<8xf32>
      %908 = vector.shape_cast %907 : vector<8xf32> to vector<8x1xf32>
      %cst_500 = arith.constant 2.44140625E-4 : f32
      %909 = vector.broadcast %cst_500 : f32 to vector<8x1xf32>
      %910 = arith.mulf %908, %909 : vector<8x1xf32>
      %c0_501 = arith.constant 0 : index
      %c0_502 = arith.constant 0 : index
      %911 = vector.load %arg9[%c0_501, %c0_502] : memref<8x256xf32, #tpu.memory_space<vmem>>, vector<8x256xf32>
      %cst_503 = arith.constant dense<0.000000e+00> : vector<8xf32>
      %912 = vector.multi_reduction <add>, %911, %cst_503 [1] : vector<8x256xf32> to vector<8xf32>
      %913 = vector.shape_cast %912 : vector<8xf32> to vector<8x1xf32>
      %cst_504 = arith.constant 2.44140625E-4 : f32
      %914 = vector.broadcast %cst_504 : f32 to vector<8x1xf32>
      %915 = arith.mulf %913, %914 : vector<8x1xf32>
      %916 = arith.mulf %910, %910 : vector<8x1xf32>
      %917 = arith.subf %915, %916 : vector<8x1xf32>
      %c0_505 = arith.constant 0 : index
      %c0_506 = arith.constant 0 : index
      %918 = vector.load %arg4[%c0_505, %c0_506] : memref<8x1xf32, #tpu.memory_space<vmem>>, vector<8x1xf32>
      %cst_507 = arith.constant 9.99999974E-6 : f32
      %919 = vector.broadcast %cst_507 : f32 to vector<8x1xf32>
      %920 = arith.addf %917, %919 : vector<8x1xf32>
      %921 = math.rsqrt %920 : vector<8x1xf32>
      %922 = arith.mulf %918, %921 : vector<8x1xf32>
      %c0_508 = arith.constant 0 : index
      %c0_509 = arith.constant 0 : index
      %923 = vector.load %arg5[%c0_508, %c0_509] : memref<8x1xf32, #tpu.memory_space<vmem>>, vector<8x1xf32>
      %924 = arith.mulf %910, %922 : vector<8x1xf32>
      %925 = arith.subf %923, %924 : vector<8x1xf32>
      %926 = vector.shape_cast %922 : vector<8x1xf32> to vector<1x8x1xf32>
      %927 = vector.shape_cast %925 : vector<8x1xf32> to vector<1x8x1xf32>
      %c0_i32_510 = arith.constant 0 : i32
      %c8_i32_511 = arith.constant 8 : i32
      %928 = arith.muli %c0_i32_510, %c8_i32_511 : i32
      %929 = arith.index_cast %928 : i32 to index
      %c0_512 = arith.constant 0 : index
      %c0_513 = arith.constant 0 : index
      %930 = vector.load %arg6[%929, %c0_512, %c0_513] : memref<16x8x256xf32, #tpu.memory_space<vmem>>, vector<8x8x256xf32>
      %931 = vector.broadcast %926 : vector<1x8x1xf32> to vector<8x8x256xf32>
      %932 = arith.mulf %930, %931 : vector<8x8x256xf32>
      %933 = vector.broadcast %927 : vector<1x8x1xf32> to vector<8x8x256xf32>
      %934 = arith.addf %932, %933 : vector<8x8x256xf32>
      %cst_514 = arith.constant 0.000000e+00 : f32
      %935 = vector.broadcast %cst_514 : f32 to vector<8x8x256xf32>
      %936 = arith.cmpf oge, %934, %935 : vector<8x8x256xf32>
      %cst_515 = arith.constant 0.00999999977 : f32
      %937 = vector.broadcast %cst_515 : f32 to vector<8x8x256xf32>
      %938 = arith.mulf %937, %934 : vector<8x8x256xf32>
      %939 = arith.select %936, %934, %938 : vector<8x8x256xi1>, vector<8x8x256xf32>
      %c8_i32_516 = arith.constant 8 : i32
      %940 = arith.muli %c0_i32_510, %c8_i32_516 : i32
      %941 = arith.index_cast %940 : i32 to index
      %c0_517 = arith.constant 0 : index
      %c0_518 = arith.constant 0 : index
      %942 = vector.load %arg6[%941, %c0_517, %c0_518] : memref<16x8x256xf32, #tpu.memory_space<vmem>>, vector<8x8x256xf32>
      tpu.vector_store %arg6[%941, %c0_517, %c0_518], %939 {strides = array<i32>} : memref<16x8x256xf32, #tpu.memory_space<vmem>>, vector<8x8x256xf32>,
      %c1_i32_519 = arith.constant 1 : i32
      %c8_i32_520 = arith.constant 8 : i32
      %943 = arith.muli %c1_i32_519, %c8_i32_520 : i32
      %944 = arith.index_cast %943 : i32 to index
      %c0_521 = arith.constant 0 : index
      %c0_522 = arith.constant 0 : index
      %945 = vector.load %arg6[%944, %c0_521, %c0_522] : memref<16x8x256xf32, #tpu.memory_space<vmem>>, vector<8x8x256xf32>
      %946 = vector.broadcast %926 : vector<1x8x1xf32> to vector<8x8x256xf32>
      %947 = arith.mulf %945, %946 : vector<8x8x256xf32>
      %948 = vector.broadcast %927 : vector<1x8x1xf32> to vector<8x8x256xf32>
      %949 = arith.addf %947, %948 : vector<8x8x256xf32>
      %cst_523 = arith.constant 0.000000e+00 : f32
      %950 = vector.broadcast %cst_523 : f32 to vector<8x8x256xf32>
      %951 = arith.cmpf oge, %949, %950 : vector<8x8x256xf32>
      %cst_524 = arith.constant 0.00999999977 : f32
      %952 = vector.broadcast %cst_524 : f32 to vector<8x8x256xf32>
      %953 = arith.mulf %952, %949 : vector<8x8x256xf32>
      %954 = arith.select %951, %949, %953 : vector<8x8x256xi1>, vector<8x8x256xf32>
      %c8_i32_525 = arith.constant 8 : i32
      %955 = arith.muli %c1_i32_519, %c8_i32_525 : i32
      %956 = arith.index_cast %955 : i32 to index
      %c0_526 = arith.constant 0 : index
      %c0_527 = arith.constant 0 : index
      %957 = vector.load %arg6[%956, %c0_526, %c0_527] : memref<16x8x256xf32, #tpu.memory_space<vmem>>, vector<8x8x256xf32>
      tpu.vector_store %arg6[%956, %c0_526, %c0_527], %954 {strides = array<i32>} : memref<16x8x256xf32, #tpu.memory_space<vmem>>, vector<8x8x256xf32>,
      %c2_i32_528 = arith.constant 2 : i32
    } else {
    }
    return
  }
  func.func @transform_0(%arg0: i32) -> (i32, i32, i32, i32) {
    %c0_i32 = arith.constant 0 : i32
    %c0_i32_0 = arith.constant 0 : i32
    %c0_i32_1 = arith.constant 0 : i32
    %c0_i32_2 = arith.constant 0 : i32
    return %arg0, %c0_i32, %c0_i32_0, %c0_i32_1 : i32, i32, i32, i32
  }
  func.func @transform_1(%arg0: i32) -> (i32, i32, i32) {
    %c0_i32 = arith.constant 0 : i32
    %c0_i32_0 = arith.constant 0 : i32
    %c0_i32_1 = arith.constant 0 : i32
    %c0_i32_2 = arith.constant 0 : i32
    return %c0_i32, %c0_i32_0, %c0_i32_1 : i32, i32, i32
  }
  func.func @transform_2(%arg0: i32) -> (i32, i32) {
    %c0_i32 = arith.constant 0 : i32
    %c0_i32_0 = arith.constant 0 : i32
    %c0_i32_1 = arith.constant 0 : i32
    return %c0_i32, %c0_i32_0 : i32, i32
  }
  func.func @transform_3(%arg0: i32) -> (i32, i32) {
    %c0_i32 = arith.constant 0 : i32
    %c0_i32_0 = arith.constant 0 : i32
    %c0_i32_1 = arith.constant 0 : i32
    return %c0_i32, %c0_i32_0 : i32, i32
  }
  func.func @transform_4(%arg0: i32) -> (i32, i32) {
    %c0_i32 = arith.constant 0 : i32
    %c0_i32_0 = arith.constant 0 : i32
    %c0_i32_1 = arith.constant 0 : i32
    return %c0_i32, %c0_i32_0 : i32, i32
  }
  func.func @transform_5(%arg0: i32) -> (i32, i32, i32) {
    %c0_i32 = arith.constant 0 : i32
    %c0_i32_0 = arith.constant 0 : i32
    %c0_i32_1 = arith.constant 0 : i32
    %c0_i32_2 = arith.constant 0 : i32
    return %c0_i32, %c0_i32_0, %c0_i32_1 : i32, i32, i32
  }
}

</mosaic_0001>

<bundles_post_ra>
// kernel: tre_block_forward.1
= control target key start
LH: loop header
LB: loop body
LE: loop exit
PB: predicated region body
PF: predicated region fallthrough
CT: control target
= control target key end

     0   :  { %s4458_s18 = smov 0   ;;  %s6228_s0 = inlined_call_operand.vmem [shape: f32[2,10,8,256], index: 0, kind: input, shape index: {}]   ;;  %s6229_s1 = inlined_call_operand.vmem [shape: f32[3,8,72], index: 1, kind: input, shape index: {}]   ;;  %s6230_s2 = inlined_call_operand.vmem [shape: f32[9,256], index: 2, kind: input, shape index: {}]   ;;  %s6231_s3 = inlined_call_operand.vmem [shape: f32[8,1], index: 3, kind: input, shape index: {}]   ;;  %s6232_s4 = inlined_call_operand.vmem [shape: f32[8,1], index: 4, kind: input, shape index: {}]   ;;  %s6233_s5 = inlined_call_operand.vmem [shape: f32[16,8,256], index: 5, kind: output, shape index: {}]  }
   0x1 LB: > { %s4464_s19 = sadd.s32 4294967295, %s4415_s18   ;;  %p3837_p0 = scmp.ge.s32.totalorder %s4415_s18, 1  ;;  %s4415_s18 = sphi %s4458_s18, %s15_s18  }
   0x2   : > { %p182_p1 = scmp.lt.s32.totalorder %s4415_s18, 3 }
   0x4   : > { %p183_p2 = pnand %p3837_p0, %p182_p1 }
   0x5   : > { %p205_p3 = scmp.lt.s32.totalorder (!%p183_p2), %s4464_s19, 1  ;;  %p3839_p4 = scmp.ne.s32.totalorder (!%p183_p2), %s4464_s19, 0 }
   0x6   : > { %186 = sbr.rel (%p183_p2) target bundleno = 1031 (0x407), region = 40 }
   0xd   : > { %s206_s20 = scalar_select %p205_p3, %s4464_s19, 1 }
   0xe   : > { %213 = sbr.rel (%p3839_p4) target bundleno = 21 (0x15), region = 44  ;;  %v4417_v0 = vmov (!%p3839_p4), 0.0  }
   0xf   : > { %s4382_s21 = smul.u32 160, %s206_s20  ;;  %214 = vst [vmem:[#allocation3] sm:$0xff] (!%p3839_p4), %v4417_v0  ;;  %215 = vst [vmem:[#allocation3 + $0x8] sm:$0xff] (!%p3839_p4), %v4417_v0 }
  0x10   : > { %216 = vst [vmem:[#allocation4] sm:$0xff] (!%p3839_p4), %v4417_v0  ;;  %217 = vst [vmem:[#allocation4 + $0x8] sm:$0xff] (!%p3839_p4), %v4417_v0 }
  0x11   : > { %s4473_s24 = scalar_lea.vmem %s6228_s0, %s4382_s21 }
  0x15 PF: > { %v4477_v1 = vld [vmem:[%s4473_s24 + $0x10] sm:$0xff]  ;;  %s4418_s25 = smov 16   ;;  %s4419_s26 = smov 17   ;;  %v4484_v2 = vld [vmem:[%s4473_s24 + $0x18] sm:$0xff]  ;;  %v4503_v3 = vld [vmem:[%s4473_s24 + $0x28] sm:$0xff]  ;;  %v4425_v7 = vmov 0.0   ;;  %v244_v10 = vlaneseq }
  0x16   : > { %434 = vrot.lane.b32.xlu1 %v4477_v1, %s4418_s25  ;;  %423 = vrot.lane.b32.xlu0 %v4477_v1, %s4419_s26  ;;  %s4420_s27 = smov 15   ;;  %s4421_s28 = smov 1   ;;  %v4506_v4 = vld [vmem:[%s4473_s24 + $0x20] sm:$0xff]  ;;  %v4533_v5 = vld [vmem:[%s4473_s24 + $0x8] sm:$0xff]  ;;  %vm1230_vm8 = vcmask 588800  }
  0x17   : > { %s4422_s29 = smov 127   ;;  %s4423_s30 = smov 113   ;;  %v4536_v6 = vld [vmem:[%s4473_s24] sm:$0xff]  ;;  %1298 = vmatprep.mubr.f32.mxu0 %v4425_v7  ;;  %1593 = vmatprep.mubr.f32.mxu1 %v4425_v7  ;;  %v4593_v8 = vld [vmem:[%s4473_s24 + $0x38] sm:$0xff]  ;;  %v4596_v9 = vld [vmem:[%s4473_s24 + $0x30] sm:$0xff]  ;;  %v251_v11 = vshrl.u32 %v244_v10, 7 }
  0x18   : > { %s4424_s6 = smov 112   ;;  %s4426_s7 = smov 111   ;;  %v4614_v12 = vand.u32 127, %v244_v10  ;;  %v218_v15 = vld [vmem:[%s6230_s2] ss:$8 sm:$0x3] }
  0x19   : > { %v4620_v13 = vsub.s32 0, %v251_v11  ;;  %v4622_v14 = vsub.s32 1, %v251_v11  ;;  %v3840_v16 = vld [vmem:[%s6230_s2 + $0x1] ss:$8 sm:$0x3]  ;;  %p3922_p5 = scmp.ne.s32.totalorder %s4464_s19, 1 }
  0x1a   : > { %436 = vrot.lane.b32.xlu1 %v4484_v2, %s4418_s25  ;;  %425 = vrot.lane.b32.xlu0 %v4484_v2, %s4419_s26  ;;  %vm268_vm0 = vcmp.lt.s32.totalorder %v4614_v12, 16  ;;  %vm246_vm1 = vcmp.lt.s32.totalorder %v4614_v12, 17  ;;  %v3841_v29 = vld [vmem:[%s6230_s2 + $0x2] ss:$8 sm:$0x3]  ;;  %vm290_vm2 = vcmp.lt.s32.totalorder %v4614_v12, 15 }
  0x1b   : > { %v4637_v19 = vrot.slane %v218_v15, %v4622_v14  ;;  %v4640_v20 = vrot.slane %v3840_v16, %v4622_v14  ;;  %v4643_v21 = vrot.slane %v218_v15, %v4620_v13  ;;  %v4646_v22 = vrot.slane %v3840_v16, %v4620_v13  ;;  %v3842_v34 = vld [vmem:[%s6230_s2 + $0x3] ss:$8 sm:$0x3]  ;;  %v3843_v41 = vld [vmem:[%s6230_s2 + $0x5] ss:$8 sm:$0x3] }
  0x1c   : > { %v4674_v38 = vrot.slane %v3841_v29, %v4620_v13  ;;  %v4677_v39 = vrot.slane %v3841_v29, %v4622_v14  ;;  %vm312_vm3 = vcmp.lt.s32.totalorder %v4614_v12, 1  ;;  %v4692_v43 = vrot.slane %v3842_v34, %v4620_v13  ;;  %v4701_v46 = vld [vmem:[%s4473_s24 + $0x48] sm:$0xff]  ;;  %v4704_v47 = vld [vmem:[%s4473_s24 + $0x40] sm:$0xff] }
  0x1d   : > { %v4695_v44 = vrot.slane %v3842_v34, %v4622_v14  ;;  %v4708_v50 = vrot.slane %v3843_v41, %v4620_v13  ;;  %v4716_v54 = vrot.slane %v3843_v41, %v4622_v14  ;;  %vm336_vm4 = vcmp.lt.s32.totalorder %v4614_v12, 127 }
  0x1e   : > { %446 = vrot.lane.b32.xlu1 %v4484_v2, %s4420_s27  ;;  %444 = vrot.lane.b32.xlu0 %v4477_v1, %s4420_s27  ;;  %vm358_vm5 = vcmp.lt.s32.totalorder %v4614_v12, 113  ;;  %vm380_vm6 = vcmp.lt.s32.totalorder %v4614_v12, 112  ;;  %vm402_vm7 = vcmp.lt.s32.totalorder %v4614_v12, 111 }
  0x22   : > { %456 = vrot.lane.b32.xlu1 %v4484_v2, %s4421_s28  ;;  %454 = vrot.lane.b32.xlu0 %v4477_v1, %s4421_s28 }
  0x26   : > { %468 = vrot.lane.b32.xlu1 %v4484_v2, %s4422_s29  ;;  %466 = vrot.lane.b32.xlu0 %v4477_v1, %s4422_s29 }
  0x2a   : > { %511 = vrot.lane.b32.xlu1 %v4503_v3, %s4419_s26  ;;  %509 = vrot.lane.b32.xlu0 %v4506_v4, %s4419_s26 }
  0x2e   : > { %522 = vrot.lane.b32.xlu1 %v4503_v3, %s4418_s25  ;;  %520 = vrot.lane.b32.xlu0 %v4506_v4, %s4418_s25 }
  0x32   : > { %478 = vrot.lane.b32.xlu1 %v4484_v2, %s4423_s30  ;;  %476 = vrot.lane.b32.xlu0 %v4477_v1, %s4423_s30 }
  0x36   : > { %488 = vrot.lane.b32.xlu1 %v4484_v2, %s4424_s6  ;;  %486 = vrot.lane.b32.xlu0 %v4477_v1, %s4424_s6 }
  0x3a   : > { %532 = vrot.lane.b32.xlu1 %v4503_v3, %s4420_s27  ;;  %530 = vrot.lane.b32.xlu0 %v4506_v4, %s4420_s27 }
  0x3e   : > { %542 = vrot.lane.b32.xlu1 %v4503_v3, %s4421_s28  ;;  %540 = vrot.lane.b32.xlu0 %v4506_v4, %s4421_s28 }
  0x42   : > { %242 = vrot.lane.b32.xlu1 %v4533_v5, %s4419_s26  ;;  %240 = vrot.lane.b32.xlu0 %v4536_v6, %s4419_s26 }
  0x46   : > { %266 = vrot.lane.b32.xlu1 %v4533_v5, %s4418_s25  ;;  %264 = vrot.lane.b32.xlu0 %v4536_v6, %s4418_s25 }
  0x4a   : > { %498 = vrot.lane.b32.xlu1 %v4484_v2, %s4426_s7  ;;  %496 = vrot.lane.b32.xlu0 %v4477_v1, %s4426_s7 }
  0x4e   : > { %554 = vrot.lane.b32.xlu1 %v4503_v3, %s4422_s29  ;;  %552 = vrot.lane.b32.xlu0 %v4506_v4, %s4422_s29 }
  0x52   : > { %288 = vrot.lane.b32.xlu1 %v4533_v5, %s4420_s27  ;;  %286 = vrot.lane.b32.xlu0 %v4536_v6, %s4420_s27 }
  0x56   : > { %310 = vrot.lane.b32.xlu1 %v4533_v5, %s4421_s28  ;;  %308 = vrot.lane.b32.xlu0 %v4536_v6, %s4421_s28 }
  0x5a   : > { %564 = vrot.lane.b32.xlu1 %v4503_v3, %s4423_s30  ;;  %562 = vrot.lane.b32.xlu0 %v4506_v4, %s4423_s30 }
  0x5e   : > { %574 = vrot.lane.b32.xlu1 %v4503_v3, %s4424_s6  ;;  %572 = vrot.lane.b32.xlu0 %v4506_v4, %s4424_s6 }
  0x62   : > { %334 = vrot.lane.b32.xlu1 %v4533_v5, %s4422_s29  ;;  %332 = vrot.lane.b32.xlu0 %v4536_v6, %s4422_s29 }
  0x66   : > { %584 = vrot.lane.b32.xlu1 %v4503_v3, %s4426_s7  ;;  %582 = vrot.lane.b32.xlu0 %v4506_v4, %s4426_s7 }
  0x6a   : > { %356 = vrot.lane.b32.xlu1 %v4533_v5, %s4423_s30  ;;  %354 = vrot.lane.b32.xlu0 %v4536_v6, %s4423_s30 }
  0x6e   : > { %378 = vrot.lane.b32.xlu1 %v4533_v5, %s4424_s6  ;;  %376 = vrot.lane.b32.xlu0 %v4536_v6, %s4424_s6 }
  0x72   : > { %400 = vrot.lane.b32.xlu1 %v4533_v5, %s4426_s7  ;;  %398 = vrot.lane.b32.xlu0 %v4536_v6, %s4426_s7 }
  0x76   : > { %597 = vrot.lane.b32.xlu1 %v4593_v8, %s4419_s26  ;;  %595 = vrot.lane.b32.xlu0 %v4596_v9, %s4419_s26 }
  0x7a   : > { %608 = vrot.lane.b32.xlu1 %v4593_v8, %s4418_s25  ;;  %606 = vrot.lane.b32.xlu0 %v4596_v9, %s4418_s25 }
  0x7e   : > { %618 = vrot.lane.b32.xlu1 %v4593_v8, %s4420_s27  ;;  %616 = vrot.lane.b32.xlu0 %v4596_v9, %s4420_s27 }
  0x82   : > { %628 = vrot.lane.b32.xlu1 %v4593_v8, %s4421_s28  ;;  %626 = vrot.lane.b32.xlu0 %v4596_v9, %s4421_s28 }
  0x86   : > { %640 = vrot.lane.b32.xlu1 %v4593_v8, %s4422_s29  ;;  %638 = vrot.lane.b32.xlu0 %v4596_v9, %s4422_s29 }
  0x88   : > { %v435_v17 = vpop.permute.xlu1 %434  ;;  %v424_v18 = vpop.permute.xlu0 %423 }
  0x8a   : > { %650 = vrot.lane.b32.xlu1 %v4593_v8, %s4423_s30  ;;  %648 = vrot.lane.b32.xlu0 %v4596_v9, %s4423_s30 }
  0x8c   : > { %v437_v23 = vpop.permute.xlu1 %436  ;;  %v426_v24 = vpop.permute.xlu0 %425 }
  0x8d   : > { %v438_v25 = vsel %vm268_vm0, %v435_v17, %v437_v23  ;;  %v439_v26 = vsel %vm268_vm0, %v437_v23, %v435_v17  ;;  %v427_v27 = vsel %vm246_vm1, %v424_v18, %v426_v24  ;;  %v428_v28 = vsel %vm246_vm1, %v426_v24, %v424_v18 }
  0x8e   : > { %660 = vrot.lane.b32.xlu1 %v4593_v8, %s4424_s6  ;;  %658 = vrot.lane.b32.xlu0 %v4596_v9, %s4424_s6  ;;  %v430_v30 = vmul.f32 %v427_v27, %v4637_v19  ;;  %v441_v31 = vmul.f32 %v438_v25, %v4640_v20  ;;  %v429_v32 = vmul.f32 %v428_v28, %v4643_v21 }
  0x8f   : > { %v440_v33 = vmul.f32 %v439_v26, %v4646_v22 }
  0x90   : > { %v447_v35 = vpop.permute.xlu1 %446  ;;  %v445_v36 = vpop.permute.xlu0 %444  ;;  %v4671_v37 = vpack.c.bf16 %v441_v31, %v430_v30  ;;  %v3844_v30 = vld [vmem:[%s6230_s2 + $0x6] ss:$8 sm:$0x3]  ;;  %v3845_v31 = vld [vmem:[%s6230_s2 + $0x7] ss:$8 sm:$0x3] }
  0x91   : > { %v4679_v40 = vpack.c.bf16 %v440_v33, %v429_v32  ;;  %v449_v42 = vsel %vm290_vm2, %v447_v35, %v445_v36  ;;  %v448_v45 = vsel %vm290_vm2, %v445_v36, %v447_v35  ;;  %v4782_v36 = vrot.slane %v3844_v30, %v4620_v13 }
  0x92   : > { %670 = vrot.lane.b32.xlu1 %v4593_v8, %s4426_s7  ;;  %668 = vrot.lane.b32.xlu0 %v4596_v9, %s4426_s7  ;;  %v450_v51 = vmul.f32 %v449_v42, %v4674_v38  ;;  %v451_v55 = vmul.f32 %v448_v45, %v4677_v39  ;;  %v4785_v41 = vrot.slane %v3844_v30, %v4622_v14 }
  0x93   : > { %3967 = vmatprep.subr.bf16.mxu0 %v4671_v37  ;;  %v4795_v45 = vrot.slane %v3845_v31, %v4620_v13 }
  0x94   : > { %3969 = vmatpush1.bf16.msra.mxu0 %v4679_v40  ;;  %v457_v48 = vpop.permute.xlu1 %456  ;;  %v455_v49 = vpop.permute.xlu0 %454 }
  0x95   : > { %v458_v52 = vsel %vm312_vm3, %v455_v49, %v457_v48  ;;  %v459_v53 = vsel %vm312_vm3, %v457_v48, %v455_v49  ;;  %v4798_v48 = vrot.slane %v3845_v31, %v4622_v14 }
  0x96   : > { %v460_v56 = vmul.f32 %v459_v53, %v4692_v43  ;;  %v461_v57 = vmul.f32 %v458_v52, %v4695_v44  ;;  %683 = vrot.lane.b32.xlu1 %v4701_v46, %s4419_s26  ;;  %681 = vrot.lane.b32.xlu0 %v4704_v47, %s4419_s26 }
  0x98   : > { %v469_v58 = vpop.permute.xlu1 %468  ;;  %v467_v59 = vpop.permute.xlu0 %466  ;;  %v4726_v60 = vpack.c.bf16 %v461_v57, %v451_v55  ;;  %v4728_v61 = vpack.c.bf16 %v460_v56, %v450_v51 }
  0x99   : > { %v470_v62 = vsel %vm336_vm4, %v467_v59, %v469_v58  ;;  %v471_v63 = vsel %vm336_vm4, %v469_v58, %v467_v59 }
  0x9a   : > { %v472_v0 = vmul.f32 %v470_v62, %v4708_v50  ;;  %v473_v10 = vmul.f32 %v471_v63, %v4716_v54  ;;  %694 = vrot.lane.b32.xlu1 %v4701_v46, %s4418_s25  ;;  %692 = vrot.lane.b32.xlu0 %v4704_v47, %s4418_s25 }
  0x9b   : > { %3971 = vmatprep.subr.bf16.mxu0 %v4726_v60 }
  0x9c   : > { %3973 = vmatpush1.bf16.msra.mxu0 %v4728_v61  ;;  %v512_v11 = vpop.permute.xlu1 %511  ;;  %v510_v15 = vpop.permute.xlu0 %509  ;;  %v4743_v16 = vpack.c.bf16 %v473_v10, %v4484_v2  ;;  %v4746_v17 = vpack.c.bf16 %v472_v0, %v4477_v1 }
  0x9d   : > { %v514_v18 = vsel %vm246_vm1, %v512_v11, %v510_v15  ;;  %v513_v23 = vsel %vm246_vm1, %v510_v15, %v512_v11 }
  0x9e   : > { %704 = vrot.lane.b32.xlu1 %v4701_v46, %s4420_s27  ;;  %702 = vrot.lane.b32.xlu0 %v4704_v47, %s4420_s27  ;;  %v515_v1 = vmul.f32 %v514_v18, %v4643_v21  ;;  %v516_v27 = vmul.f32 %v513_v23, %v4637_v19 }
  0x9f   : > { %3975 = vmatprep.subr.bf16.mxu0 %v4743_v16 }
  0xa0   : > { %3977 = vmatpush1.bf16.msra.mxu0 %v4746_v17  ;;  %v523_v2 = vpop.permute.xlu1 %522  ;;  %v521_v24 = vpop.permute.xlu0 %520 }
  0xa1   : > { %v524_v25 = vsel %vm268_vm0, %v521_v24, %v523_v2  ;;  %v525_v26 = vsel %vm268_vm0, %v523_v2, %v521_v24 }
  0xa2   : > { %v526_v28 = vmul.f32 %v525_v26, %v4646_v22  ;;  %v527_v29 = vmul.f32 %v524_v25, %v4640_v20  ;;  %714 = vrot.lane.b32.xlu1 %v4701_v46, %s4421_s28  ;;  %712 = vrot.lane.b32.xlu0 %v4704_v47, %s4421_s28 }
  0xa4   : > { %v479_v32 = vpop.permute.xlu1 %478  ;;  %v477_v33 = vpop.permute.xlu0 %476  ;;  %v4777_v34 = vpack.c.bf16 %v527_v29, %v516_v27  ;;  %v4779_v35 = vpack.c.bf16 %v526_v28, %v515_v1  ;;  %v4843_v28 = vld [vmem:[%s4473_s24 + $0x58] sm:$0xff]  ;;  %v4846_v29 = vld [vmem:[%s4473_s24 + $0x50] sm:$0xff] }
  0xa5   : > { %v480_v42 = vsel %vm358_vm5, %v477_v33, %v479_v32  ;;  %v481_v49 = vsel %vm358_vm5, %v479_v32, %v477_v33 }
  0xa6   : > { %726 = vrot.lane.b32.xlu1 %v4701_v46, %s4422_s29  ;;  %724 = vrot.lane.b32.xlu0 %v4704_v47, %s4422_s29  ;;  %v482_v53 = vmul.f32 %v480_v42, %v4782_v36  ;;  %v483_v57 = vmul.f32 %v481_v49, %v4785_v41  ;;  %v3846_v42 = vld [vmem:[%s6230_s2 + $0x10] ss:$8 sm:$0x3] }
  0xa7   : > { %4015 = vmatprep.subr.bf16.mxu1 %v4777_v34 }
  0xa8   : > { %4017 = vmatpush1.bf16.msra.mxu1 %v4779_v35  ;;  %v489_v51 = vpop.permute.xlu1 %488  ;;  %v487_v52 = vpop.permute.xlu0 %486 }
  0xa9   : > { %v490_v55 = vsel %vm380_vm6, %v487_v52, %v489_v51  ;;  %v491_v56 = vsel %vm380_vm6, %v489_v51, %v487_v52 }
  0xaa   : > { %v492_v58 = vmul.f32 %v490_v55, %v4795_v45  ;;  %v493_v59 = vmul.f32 %v491_v56, %v4798_v48  ;;  %736 = vrot.lane.b32.xlu1 %v4701_v46, %s4423_s30  ;;  %734 = vrot.lane.b32.xlu0 %v4704_v47, %s4423_s30  ;;  %v4872_v55 = vrot.slane %v3846_v42, %v4620_v13 }
  0xac   : > { %v533_v62 = vpop.permute.xlu1 %532  ;;  %v531_v63 = vpop.permute.xlu0 %530  ;;  %v4816_v0 = vpack.c.bf16 %v493_v59, %v483_v57  ;;  %v4818_v10 = vpack.c.bf16 %v492_v58, %v482_v53  ;;  %v4869_v53 = vrot.slane %v3846_v42, %v4622_v14 }
  0xad   : > { %v535_v11 = vsel %vm290_vm2, %v533_v62, %v531_v63  ;;  %v534_v15 = vsel %vm290_vm2, %v531_v63, %v533_v62 }
  0xae   : > { %746 = vrot.lane.b32.xlu1 %v4701_v46, %s4424_s6  ;;  %744 = vrot.lane.b32.xlu0 %v4704_v47, %s4424_s6  ;;  %v536_v2 = vmul.f32 %v535_v11, %v4674_v38  ;;  %v537_v25 = vmul.f32 %v534_v15, %v4677_v39 }
  0xaf   : > { %3979 = vmatprep.subr.bf16.mxu0 %v4816_v0 }
  0xb0   : > { %3981 = vmatpush1.bf16.msra.mxu0 %v4818_v10  ;;  %v543_v18 = vpop.permute.xlu1 %542  ;;  %v541_v23 = vpop.permute.xlu0 %540 }
  0xb1   : > { %v544_v24 = vsel %vm312_vm3, %v541_v23, %v543_v18  ;;  %v545_v1 = vsel %vm312_vm3, %v543_v18, %v541_v23 }
  0xb2   : > { %v546_v26 = vmul.f32 %v545_v1, %v4692_v43  ;;  %v547_v27 = vmul.f32 %v544_v24, %v4695_v44  ;;  %756 = vrot.lane.b32.xlu1 %v4701_v46, %s4426_s7  ;;  %754 = vrot.lane.b32.xlu0 %v4704_v47, %s4426_s7 }
  0xb4   : > { %v243_v30 = vpop.permute.xlu1 %242  ;;  %v241_v31 = vpop.permute.xlu0 %240  ;;  %v4848_v32 = vpack.c.bf16 %v547_v27, %v537_v25  ;;  %v4850_v33 = vpack.c.bf16 %v546_v26, %v536_v2  ;;  %v4902_v25 = vld [vmem:[%s6229_s1 + $0x8] sm:$0xff] }
  0xb5   : > { %v247_v57 = vsel %vm246_vm1, %v241_v31, %v243_v30  ;;  %v248_v62 = vsel %vm246_vm1, %v243_v30, %v241_v31 }
  0xb6   : > { %769 = vrot.lane.b32.xlu1 %v4843_v28, %s4419_s26  ;;  %767 = vrot.lane.b32.xlu0 %v4846_v29, %s4419_s26  ;;  %v261_v23 = vmul.f32 %v4637_v19, %v247_v57  ;;  %v260_v2 = vmul.f32 %v4643_v21, %v248_v62 }
  0xb7   : > { %4019 = vmatprep.subr.bf16.mxu1 %v4848_v32 }
  0xb8   : > { %4021 = vmatpush1.bf16.msra.mxu1 %v4850_v33  ;;  %v267_v49 = vpop.permute.xlu1 %266  ;;  %v265_v51 = vpop.permute.xlu0 %264 }
  0xb9   : > { %v269_v52 = vsel %vm268_vm0, %v265_v51, %v267_v49  ;;  %v270_v56 = vsel %vm268_vm0, %v267_v49, %v265_v51 }
  0xba   : > { %780 = vrot.lane.b32.xlu1 %v4843_v28, %s4418_s25  ;;  %778 = vrot.lane.b32.xlu0 %v4846_v29, %s4418_s25  ;;  %v283_v63 = vmul.f32 %v4640_v20, %v269_v52  ;;  %v282_v11 = vmul.f32 %v4646_v22, %v270_v56 }
  0xbc   : > { %v499_v58 = vpop.permute.xlu1 %498  ;;  %v497_v59 = vpop.permute.xlu0 %496  ;;  %v3982_v30 = vpack.c.bf16 %v283_v63, %v261_v23  ;;  %v3984_v31 = vpack.c.bf16 %v282_v11, %v260_v2 }
  0xbd   : > { %v500_v14 = vsel %vm402_vm7, %v497_v59, %v499_v58  ;;  %v501_v13 = vsel %vm402_vm7, %v499_v58, %v497_v59 }
  0xbe   : > { %790 = vrot.lane.b32.xlu1 %v4843_v28, %s4420_s27  ;;  %788 = vrot.lane.b32.xlu0 %v4846_v29, %s4420_s27  ;;  %v4891_v15 = vmul.f32 %v501_v13, %v4869_v53  ;;  %v4894_v18 = vmul.f32 %v500_v14, %v4872_v55 }
  0xc0   : > { %v555_v24 = vpop.permute.xlu1 %554  ;;  %v553_v1 = vpop.permute.xlu0 %552  ;;  %1250 = vmatprep.subr.mxu0 %v4891_v15 }
  0xc1   : > { %v556_v26 = vsel %vm336_vm4, %v553_v1, %v555_v24  ;;  %v557_v27 = vsel %vm336_vm4, %v555_v24, %v553_v1  ;;  %1251 = vmatpush1.msra.mxu0 %v4894_v18 }
  0xc2   : > { %v558_v42 = vmul.f32 %v556_v26, %v4708_v50  ;;  %v559_v49 = vmul.f32 %v557_v27, %v4716_v54  ;;  %800 = vrot.lane.b32.xlu1 %v4843_v28, %s4421_s28  ;;  %798 = vrot.lane.b32.xlu0 %v4846_v29, %s4421_s28 }
  0xc3   : > { %3983 = vmatprep.subr.bf16.mxu0 %v3982_v30  ;;  %3867 = vmatmul.mubr.msk.f32.vlgmr.msra.gmra.mrb[0].mxu0 %vm1230_vm8, %v4902_v25 }
  0xc4   : > { %3985 = vmatpush1.bf16.msra.mxu0 %v3984_v31  ;;  %v289_v51 = vpop.permute.xlu1 %288  ;;  %v287_v52 = vpop.permute.xlu0 %286  ;;  %v4918_v56 = vpack.c.bf16 %v559_v49, %v4503_v3  ;;  %v4921_v57 = vpack.c.bf16 %v558_v42, %v4506_v4  ;;  %1372 = vmatprep.mubr.f32.mxu0 %v4425_v7 }
  0xc5   : > { %v292_v58 = vsel %vm290_vm2, %v289_v51, %v287_v52  ;;  %v291_v59 = vsel %vm290_vm2, %v287_v52, %v289_v51 }
  0xc6   : > { %812 = vrot.lane.b32.xlu1 %v4843_v28, %s4422_s29  ;;  %810 = vrot.lane.b32.xlu0 %v4846_v29, %s4422_s29  ;;  %v304_v62 = vmul.f32 %v4674_v38, %v292_v58  ;;  %v305_v13 = vmul.f32 %v4677_v39, %v291_v59 }
  0xc7   : > { %4023 = vmatprep.subr.bf16.mxu1 %v4918_v56 }
  0xc8   : > { %4025 = vmatpush1.bf16.msra.mxu1 %v4921_v57  ;;  %v311_v3 = vpop.permute.xlu1 %310  ;;  %v309_v4 = vpop.permute.xlu0 %308 }
  0xc9   : > { %v313_v63 = vsel %vm312_vm3, %v309_v4, %v311_v3  ;;  %v314_v14 = vsel %vm312_vm3, %v311_v3, %v309_v4  ;;  %v4967_v4 = vld [vmem:[%s4473_s24 + $0x68] sm:$0xff] }
  0xca   : > { %v326_v11 = vmul.f32 %v4692_v43, %v314_v14  ;;  %v327_v23 = vmul.f32 %v4695_v44, %v313_v63  ;;  %822 = vrot.lane.b32.xlu1 %v4843_v28, %s4423_s30  ;;  %820 = vrot.lane.b32.xlu0 %v4846_v29, %s4423_s30 }
  0xcc   : > { %v3988_v2 = vpack.c.bf16 %v326_v11, %v304_v62  ;;  %v565_v24 = vpop.permute.xlu1 %564  ;;  %v563_v1 = vpop.permute.xlu0 %562  ;;  %v3986_v26 = vpack.c.bf16 %v327_v23, %v305_v13  ;;  %v4970_v62 = vld [vmem:[%s4473_s24 + $0x60] sm:$0xff] }
  0xcd   : > { %v566_v27 = vsel %vm358_vm5, %v563_v1, %v565_v24  ;;  %v567_v30 = vsel %vm358_vm5, %v565_v24, %v563_v1 }
  0xce   : > { %832 = vrot.lane.b32.xlu1 %v4843_v28, %s4424_s6  ;;  %830 = vrot.lane.b32.xlu0 %v4846_v29, %s4424_s6  ;;  %v568_v49 = vmul.f32 %v566_v27, %v4782_v36  ;;  %v569_v58 = vmul.f32 %v567_v30, %v4785_v41 }
  0xcf   : > { %3987 = vmatprep.subr.bf16.mxu0 %v3986_v26 }
  0xd0   : > { %3989 = vmatpush1.bf16.msra.mxu0 %v3988_v2  ;;  %v575_v31 = vpop.permute.xlu1 %574  ;;  %v573_v42 = vpop.permute.xlu0 %572 }
  0xd1   : > { %v576_v51 = vsel %vm380_vm6, %v573_v42, %v575_v31  ;;  %v577_v52 = vsel %vm380_vm6, %v575_v31, %v573_v42 }
  0xd2   : > { %v578_v59 = vmul.f32 %v576_v51, %v4795_v45  ;;  %v579_v3 = vmul.f32 %v577_v52, %v4798_v48  ;;  %842 = vrot.lane.b32.xlu1 %v4843_v28, %s4426_s7  ;;  %840 = vrot.lane.b32.xlu0 %v4846_v29, %s4426_s7 }
  0xd4   : > { %v335_v63 = vpop.permute.xlu1 %334  ;;  %v333_v14 = vpop.permute.xlu0 %332  ;;  %v4972_v13 = vpack.c.bf16 %v579_v3, %v569_v58  ;;  %v4974_v11 = vpack.c.bf16 %v578_v59, %v568_v49 }
  0xd5   : > { %v337_v23 = vsel %vm336_vm4, %v333_v14, %v335_v63  ;;  %v338_v2 = vsel %vm336_vm4, %v335_v63, %v333_v14 }
  0xd6   : > { %v350_v24 = vmul.f32 %v4708_v50, %v337_v23  ;;  %v351_v1 = vmul.f32 %v4716_v54, %v338_v2  ;;  %855 = vrot.lane.b32.xlu1 %v4967_v4, %s4419_s26  ;;  %853 = vrot.lane.b32.xlu0 %v4970_v62, %s4419_s26 }
  0xd7   : > { %4027 = vmatprep.subr.bf16.mxu1 %v4972_v13 }
  0xd8   : > { %v3992_v26 = vpack.c.bf16 %v350_v24, %v4536_v6  ;;  %4029 = vmatpush1.bf16.msra.mxu1 %v4974_v11  ;;  %v585_v27 = vpop.permute.xlu1 %584  ;;  %v583_v30 = vpop.permute.xlu0 %582  ;;  %v3990_v31 = vpack.c.bf16 %v351_v1, %v4533_v5 }
  0xd9   : > { %v586_v42 = vsel %vm402_vm7, %v583_v30, %v585_v27  ;;  %v587_v49 = vsel %vm402_vm7, %v585_v27, %v583_v30 }
  0xda   : > { %866 = vrot.lane.b32.xlu1 %v4967_v4, %s4418_s25  ;;  %864 = vrot.lane.b32.xlu0 %v4970_v62, %s4418_s25  ;;  %v4999_v6 = vmul.f32 %v587_v49, %v4869_v53  ;;  %v5002_v51 = vmul.f32 %v586_v42, %v4872_v55 }
  0xdb   : > { %3991 = vmatprep.subr.bf16.mxu0 %v3990_v31 }
  0xdc   : > { %3993 = vmatpush1.bf16.msra.mxu0 %v3992_v26  ;;  %v357_v5 = vpop.permute.xlu1 %356  ;;  %v355_v52 = vpop.permute.xlu0 %354  ;;  %1545 = vmatprep.subr.mxu1 %v4999_v6 }
  0xdd   : > { %1546 = vmatpush1.msra.mxu1 %v5002_v51  ;;  %v359_v58 = vsel %vm358_vm5, %v355_v52, %v357_v5  ;;  %v360_v59 = vsel %vm358_vm5, %v357_v5, %v355_v52 }
  0xde   : > { %876 = vrot.lane.b32.xlu1 %v4967_v4, %s4420_s27  ;;  %874 = vrot.lane.b32.xlu0 %v4970_v62, %s4420_s27  ;;  %v372_v14 = vmul.f32 %v4782_v36, %v359_v58 }
  0xdf   : > { %4031 = vmatprep.subr.bf16.mxu1 %v4671_v37  ;;  %3873 = vmatmul.mubr.msk.f32.vlgmr.msra.gmra.mrb[0].mxu1 %vm1230_vm8, %v4902_v25  ;;  %v373_v37 = vmul.f32 %v4785_v41, %v360_v59 }
  0xe0   : > { %4033 = vmatpush1.bf16.msra.mxu1 %v4679_v40  ;;  %v379_v3 = vpop.permute.xlu1 %378  ;;  %v377_v63 = vpop.permute.xlu0 %376  ;;  %1664 = vmatprep.mubr.f32.mxu1 %v4425_v7 }
  0xe1   : > { %v381_v23 = vsel %vm380_vm6, %v377_v63, %v379_v3  ;;  %v382_v2 = vsel %vm380_vm6, %v379_v3, %v377_v63  ;;  %4035 = vmatprep.subr.bf16.mxu1 %v4726_v60 }
  0xe2   : > { %v394_v24 = vmul.f32 %v4795_v45, %v381_v23  ;;  %v395_v40 = vmul.f32 %v4798_v48, %v382_v2  ;;  %886 = vrot.lane.b32.xlu1 %v4967_v4, %s4421_s28  ;;  %884 = vrot.lane.b32.xlu0 %v4970_v62, %s4421_s28 }
  0xe4   : > { %v3996_v1 = vpack.c.bf16 %v394_v24, %v372_v14  ;;  %4037 = vmatpush1.bf16.msra.mxu1 %v4728_v61  ;;  %v401_v26 = vpop.permute.xlu1 %400  ;;  %v399_v27 = vpop.permute.xlu0 %398  ;;  %v3994_v30 = vpack.c.bf16 %v395_v40, %v373_v37 }
  0xe5   : > { %v404_v60 = vsel %vm402_vm7, %v401_v26, %v399_v27  ;;  %4039 = vmatprep.subr.bf16.mxu1 %v4743_v16  ;;  %v403_v42 = vsel %vm402_vm7, %v399_v27, %v401_v26 }
  0xe6   : > { %898 = vrot.lane.b32.xlu1 %v4967_v4, %s4422_s29  ;;  %896 = vrot.lane.b32.xlu0 %v4970_v62, %s4422_s29  ;;  %v417_v31 = vmul.f32 %v4869_v53, %v404_v60  ;;  %v416_v16 = vmul.f32 %v4872_v55, %v403_v42 }
  0xe7   : > { %3995 = vmatprep.subr.bf16.mxu0 %v3994_v30  ;;  %v5102_v30 = vld [vmem:[%s4473_s24 + $0x70] sm:$0xff] }
  0xe8   : > { %3997 = vmatpush1.bf16.msra.mxu0 %v3996_v1  ;;  %4041 = vmatpush1.bf16.msra.mxu1 %v4746_v17  ;;  %v598_v61 = vpop.permute.xlu1 %597  ;;  %v596_v49 = vpop.permute.xlu0 %595  ;;  %v5057_v17 = vld [vmem:[%s6229_s1] sm:$0xff]  ;;  %v5097_v1 = vld [vmem:[%s4473_s24 + $0x78] sm:$0xff] }
  0xe9   : > { %1324 = vmatprep.subr.mxu0 %v417_v31  ;;  %4043 = vmatprep.subr.bf16.mxu1 %v4816_v0  ;;  %v600_v5 = vsel %vm246_vm1, %v598_v61, %v596_v49  ;;  %v599_v52 = vsel %vm246_vm1, %v596_v49, %v598_v61 }
  0xea   : > { %908 = vrot.lane.b32.xlu1 %v4967_v4, %s4423_s30  ;;  %906 = vrot.lane.b32.xlu0 %v4970_v62, %s4423_s30  ;;  %v601_v59 = vmul.f32 %v600_v5, %v4643_v21  ;;  %v602_v14 = vmul.f32 %v599_v52, %v4637_v19 }
  0xec   : > { %1325 = vmatpush1.msra.mxu0 %v416_v16  ;;  %4045 = vmatpush1.bf16.msra.mxu1 %v4818_v10  ;;  %v609_v0 = vpop.permute.xlu1 %608  ;;  %v607_v58 = vpop.permute.xlu0 %606 }
  0xed   : > { %v610_v3 = vsel %vm268_vm0, %v607_v58, %v609_v0  ;;  %v611_v63 = vsel %vm268_vm0, %v609_v0, %v607_v58  ;;  %3999 = vmatprep.subr.bf16.mxu0 %v4777_v34  ;;  %1616 = vmatprep.subr.mxu1 %v4891_v15 }
  0xee   : > { %v612_v23 = vmul.f32 %v611_v63, %v4646_v22  ;;  %v613_v10 = vmul.f32 %v610_v3, %v4640_v20  ;;  %3868 = vmatmul.mubr.msk.f32.vlgmr.msra.gmra.mrb[0].mxu0 %vm1230_vm8, %v5057_v17  ;;  %918 = vrot.lane.b32.xlu1 %v4967_v4, %s4424_s6 }
  0xef   : > { %4001 = vmatpush1.bf16.msra.mxu0 %v4779_v35  ;;  %916 = vrot.lane.b32.xlu0 %v4970_v62, %s4424_s6 }
  0xf0   : > { %v5077_v2 = vpack.c.bf16 %v612_v23, %v601_v59  ;;  %4003 = vmatprep.subr.bf16.mxu0 %v4848_v32  ;;  %1617 = vmatpush1.msra.mxu1 %v4894_v18  ;;  %v619_v15 = vpop.permute.xlu1 %618  ;;  %v617_v37 = vpop.permute.xlu0 %616  ;;  %v5081_v24 = vpack.c.bf16 %v613_v10, %v602_v14 }
  0xf1   : > { %3874 = vmatmul.mubr.msk.f32.vlgmr.msra.gmra.mrb[0].mxu1 %vm1230_vm8, %v5057_v17  ;;  %1464 = vmatprep.mubr.f32.mxu0 %v4425_v7  ;;  %v620_v40 = vsel %vm290_vm2, %v617_v37, %v619_v15  ;;  %v621_v18 = vsel %vm290_vm2, %v619_v15, %v617_v37 }
  0xf2   : > { %928 = vrot.lane.b32.xlu1 %v4967_v4, %s4426_s7  ;;  %4047 = vmatprep.subr.bf16.mxu1 %v5081_v24  ;;  %v622_v42 = vmul.f32 %v621_v18, %v4674_v38  ;;  %v623_v61 = vmul.f32 %v620_v40, %v4677_v39  ;;  %v5146_v40 = vld [vmem:[%s6229_s1 + $0x10] sm:$0xff] }
  0xf3   : > { %4005 = vmatpush1.bf16.msra.mxu0 %v4850_v33  ;;  %926 = vrot.lane.b32.xlu0 %v4970_v62, %s4426_s7 }
  0xf4   : > { %4007 = vmatprep.subr.bf16.mxu0 %v4918_v56  ;;  %4049 = vmatpush1.bf16.msra.mxu1 %v5077_v2  ;;  %v629_v26 = vpop.permute.xlu1 %628  ;;  %v627_v27 = vpop.permute.xlu0 %626 }
  0xf5   : > { %v630_v60 = vsel %vm312_vm3, %v627_v27, %v629_v26  ;;  %v631_v31 = vsel %vm312_vm3, %v629_v26, %v627_v27  ;;  %1753 = vmatprep.mubr.f32.mxu1 %v4425_v7 }
  0xf6   : > { %v632_v49 = vmul.f32 %v631_v31, %v4692_v43  ;;  %v633_v16 = vmul.f32 %v630_v60, %v4695_v44  ;;  %941 = vrot.lane.b32.xlu1 %v5097_v1, %s4419_s26 }
  0xf7   : > { %4009 = vmatpush1.bf16.msra.mxu0 %v4921_v57  ;;  %939 = vrot.lane.b32.xlu0 %v5102_v30, %s4419_s26 }
  0xf8   : > { %v5118_v5 = vpack.c.bf16 %v632_v49, %v622_v42  ;;  %4011 = vmatprep.subr.bf16.mxu0 %v4972_v13  ;;  %v641_v52 = vpop.permute.xlu1 %640  ;;  %v639_v0 = vpop.permute.xlu0 %638  ;;  %v5121_v58 = vpack.c.bf16 %v633_v16, %v623_v61 }
  0xf9   : > { %v642_v59 = vsel %vm336_vm4, %v639_v0, %v641_v52  ;;  %v643_v3 = vsel %vm336_vm4, %v641_v52, %v639_v0 }
  0xfa   : > { %v644_v63 = vmul.f32 %v642_v59, %v4708_v50  ;;  %v645_v14 = vmul.f32 %v643_v3, %v4716_v54  ;;  %952 = vrot.lane.b32.xlu1 %v5097_v1, %s4418_s25  ;;  %4051 = vmatprep.subr.bf16.mxu1 %v5121_v58 }
  0xfb   : > { %4013 = vmatpush1.bf16.msra.mxu0 %v4974_v11  ;;  %950 = vrot.lane.b32.xlu0 %v5102_v30, %s4418_s25 }
  0xfc   : > { %1416 = vmatprep.subr.mxu0 %v4999_v6  ;;  %4053 = vmatpush1.bf16.msra.mxu1 %v5118_v5  ;;  %v651_v23 = vpop.permute.xlu1 %650  ;;  %v649_v10 = vpop.permute.xlu0 %648  ;;  %v5138_v15 = vpack.c.bf16 %v645_v14, %v4593_v8  ;;  %v5141_v37 = vpack.c.bf16 %v644_v63, %v4596_v9 }
  0xfd   : > { %v652_v18 = vsel %vm358_vm5, %v649_v10, %v651_v23  ;;  %v653_v8 = vsel %vm358_vm5, %v651_v23, %v649_v10 }
  0xfe   : > { %962 = vrot.lane.b32.xlu1 %v5097_v1, %s4420_s27  ;;  %4055 = vmatprep.subr.bf16.mxu1 %v5138_v15  ;;  %v654_v27 = vmul.f32 %v652_v18, %v4782_v36  ;;  %v655_v42 = vmul.f32 %v653_v8, %v4785_v41 }
  0xff   : > { %1417 = vmatpush1.msra.mxu0 %v5002_v51  ;;  %960 = vrot.lane.b32.xlu0 %v5102_v30, %s4420_s27 }
 0x100   : > { %4063 = vmatprep.subr.bf16.mxu0 %v5081_v24  ;;  %3869 = vmatmul.mubr.msk.f32.vlgmr.msra.gmra.mrb[0].mxu0 %vm1230_vm8, %v5146_v40  ;;  %v661_v9 = vpop.permute.xlu1 %660  ;;  %v659_v26 = vpop.permute.xlu0 %658 }
 0x101   : > { %4057 = vmatpush1.bf16.msra.mxu1 %v5141_v37  ;;  %4065 = vmatpush1.bf16.msra.mxu0 %v5077_v2  ;;  %v662_v60 = vsel %vm380_vm6, %v659_v26, %v661_v9  ;;  %v663_v31 = vsel %vm380_vm6, %v661_v9, %v659_v26 }
 0x102   : > { %v664_v61 = vmul.f32 %v662_v60, %v4795_v45  ;;  %v665_v49 = vmul.f32 %v663_v31, %v4798_v48  ;;  %4067 = vmatprep.subr.bf16.mxu0 %v5121_v58  ;;  %972 = vrot.lane.b32.xlu1 %v5097_v1, %s4421_s28 }
 0x103   : > { %970 = vrot.lane.b32.xlu0 %v5102_v30, %s4421_s28  ;;  %1882 = vmatprep.mubr.f32.mxu0 %v4425_v7 }
 0x104   : > { %v5177_v16 = vpack.c.bf16 %v664_v61, %v654_v27  ;;  %v671_v52 = vpop.permute.xlu1 %670  ;;  %v669_v0 = vpop.permute.xlu0 %668  ;;  %v5179_v59 = vpack.c.bf16 %v665_v49, %v655_v42 }
 0x105   : > { %4069 = vmatpush1.bf16.msra.mxu0 %v5118_v5  ;;  %v673_v3 = vsel %vm402_vm7, %v671_v52, %v669_v0  ;;  %v672_v14 = vsel %vm402_vm7, %v669_v0, %v671_v52 }
 0x106   : > { %v5185_v63 = vmul.f32 %v673_v3, %v4869_v53  ;;  %4071 = vmatprep.subr.bf16.mxu0 %v5138_v15  ;;  %984 = vrot.lane.b32.xlu1 %v5097_v1, %s4422_s29  ;;  %v5199_v18 = vmul.f32 %v672_v14, %v4872_v55 }
 0x107   : > { %982 = vrot.lane.b32.xlu0 %v5102_v30, %s4422_s29  ;;  %4059 = vmatprep.subr.bf16.mxu1 %v5179_v59 }
 0x108   : > { %4061 = vmatpush1.bf16.msra.mxu1 %v5177_v16  ;;  %v684_v23 = vpop.permute.xlu1 %683  ;;  %v682_v10 = vpop.permute.xlu0 %681 }
 0x109   : > { %4073 = vmatpush1.bf16.msra.mxu0 %v5141_v37  ;;  %1705 = vmatprep.subr.mxu1 %v5185_v63  ;;  %v685_v8 = vsel %vm246_vm1, %v682_v10, %v684_v23  ;;  %v686_v27 = vsel %vm246_vm1, %v684_v23, %v682_v10 }
 0x10a   : > { %4075 = vmatprep.subr.bf16.mxu0 %v5179_v59  ;;  %994 = vrot.lane.b32.xlu1 %v5097_v1, %s4423_s30  ;;  %v688_v49 = vmul.f32 %v685_v8, %v4637_v19  ;;  %v687_v52 = vmul.f32 %v686_v27, %v4643_v21 }
 0x10b   : > { %992 = vrot.lane.b32.xlu0 %v5102_v30, %s4423_s30 }
 0x10c   : > { %1706 = vmatpush1.msra.mxu1 %v5199_v18  ;;  %v695_v9 = vpop.permute.xlu1 %694  ;;  %v693_v26 = vpop.permute.xlu0 %692 }
 0x10d   : > { %4077 = vmatpush1.bf16.msra.mxu0 %v5177_v16  ;;  %v696_v60 = vsel %vm268_vm0, %v693_v26, %v695_v9  ;;  %v697_v31 = vsel %vm268_vm0, %v695_v9, %v693_v26  ;;  %3875 = vmatmul.mubr.msk.f32.vlgmr.msra.gmra.mrb[0].mxu1 %vm1230_vm8, %v5146_v40  ;;  %v5247_v26 = vld [vmem:[%s4473_s24 + $0x88] sm:$0xff] }
 0x10e   : > { %v698_v42 = vmul.f32 %v697_v31, %v4646_v22  ;;  %v699_v61 = vmul.f32 %v696_v60, %v4640_v20  ;;  %1834 = vmatprep.subr.mxu0 %v5185_v63  ;;  %1004 = vrot.lane.b32.xlu1 %v5097_v1, %s4424_s6  ;;  %v5255_v60 = vld [vmem:[%s4473_s24 + $0x80] sm:$0xff] }
 0x10f   : > { %1002 = vrot.lane.b32.xlu0 %v5102_v30, %s4424_s6  ;;  %2171 = vmatprep.mubr.f32.mxu1 %v4425_v7 }
 0x110   : > { %v705_v0 = vpop.permute.xlu1 %704  ;;  %v703_v3 = vpop.permute.xlu0 %702  ;;  %v5229_v14 = vpack.c.bf16 %v699_v61, %v688_v49  ;;  %v5231_v23 = vpack.c.bf16 %v698_v42, %v687_v52 }
 0x111   : > { %1835 = vmatpush1.msra.mxu0 %v5199_v18  ;;  %v706_v10 = vsel %vm290_vm2, %v703_v3, %v705_v0  ;;  %v707_v8 = vsel %vm290_vm2, %v705_v0, %v703_v3 }
 0x112   : > { %4079 = vmatprep.subr.bf16.mxu0 %v4777_v34  ;;  %3880 = vmatmul.mubr.msk.f32.vlgmr.msra.gmra.mrb[2].mxu0 %vm1230_vm8, %v4902_v25  ;;  %v709_v31 = vmul.f32 %v706_v10, %v4677_v39  ;;  %v708_v61 = vmul.f32 %v707_v8, %v4674_v38 }
 0x113   : > { %4081 = vmatpush1.bf16.msra.mxu0 %v4779_v35  ;;  %1014 = vrot.lane.b32.xlu1 %v5097_v1, %s4426_s7 }
 0x114   : > { %1012 = vrot.lane.b32.xlu0 %v5102_v30, %s4426_s7  ;;  %4083 = vmatprep.subr.bf16.mxu0 %v4848_v32  ;;  %v715_v34 = vpop.permute.xlu1 %714  ;;  %v713_v9 = vpop.permute.xlu0 %712 }
 0x115   : > { %4111 = vmatprep.subr.bf16.mxu1 %v5229_v14  ;;  %v716_v35 = vsel %vm312_vm3, %v713_v9, %v715_v34  ;;  %v717_v27 = vsel %vm312_vm3, %v715_v34, %v713_v9  ;;  %1953 = vmatprep.mubr.f32.mxu0 %v4425_v7 }
 0x116   : > { %4113 = vmatpush1.bf16.msra.mxu1 %v5231_v23  ;;  %v718_v32 = vmul.f32 %v717_v27, %v4692_v43  ;;  %v719_v42 = vmul.f32 %v716_v35, %v4695_v44 }
 0x117   : > { %4085 = vmatpush1.bf16.msra.mxu0 %v4850_v33  ;;  %1027 = vrot.lane.b32.xlu1 %v5247_v26, %s4419_s26 }
 0x118   : > { %1025 = vrot.lane.b32.xlu0 %v5255_v60, %s4419_s26  ;;  %4087 = vmatprep.subr.bf16.mxu0 %v4918_v56  ;;  %v727_v49 = vpop.permute.xlu1 %726  ;;  %v725_v52 = vpop.permute.xlu0 %724  ;;  %v5269_v0 = vpack.c.bf16 %v719_v42, %v709_v31  ;;  %v5271_v3 = vpack.c.bf16 %v718_v32, %v708_v61 }
 0x119   : > { %v728_v10 = vsel %vm336_vm4, %v725_v52, %v727_v49  ;;  %v729_v33 = vsel %vm336_vm4, %v727_v49, %v725_v52 }
 0x11a   : > { %v730_v8 = vmul.f32 %v728_v10, %v4708_v50  ;;  %v731_v34 = vmul.f32 %v729_v33, %v4716_v54  ;;  %4115 = vmatprep.subr.bf16.mxu1 %v5269_v0 }
 0x11b   : > { %4089 = vmatpush1.bf16.msra.mxu0 %v4921_v57  ;;  %1038 = vrot.lane.b32.xlu1 %v5247_v26, %s4418_s25 }
 0x11c   : > { %1036 = vrot.lane.b32.xlu0 %v5255_v60, %s4418_s25  ;;  %4091 = vmatprep.subr.bf16.mxu0 %v4972_v13  ;;  %v737_v56 = vpop.permute.xlu1 %736  ;;  %v735_v9 = vpop.permute.xlu0 %734  ;;  %v5287_v35 = vpack.c.bf16 %v731_v34, %v4701_v46  ;;  %v5290_v27 = vpack.c.bf16 %v730_v8, %v4704_v47 }
 0x11d   : > { %4117 = vmatpush1.bf16.msra.mxu1 %v5271_v3  ;;  %v738_v57 = vsel %vm358_vm5, %v735_v9, %v737_v56  ;;  %v739_v31 = vsel %vm358_vm5, %v737_v56, %v735_v9 }
 0x11e   : > { %4119 = vmatprep.subr.bf16.mxu1 %v5287_v35  ;;  %v741_v42 = vmul.f32 %v739_v31, %v4785_v41 }
 0x11f   : > { %4093 = vmatpush1.bf16.msra.mxu0 %v4974_v11  ;;  %1048 = vrot.lane.b32.xlu1 %v5247_v26, %s4420_s27  ;;  %v740_v11 = vmul.f32 %v738_v57, %v4782_v36 }
 0x120   : > { %1046 = vrot.lane.b32.xlu0 %v5255_v60, %s4420_s27  ;;  %1905 = vmatprep.subr.mxu0 %v4999_v6  ;;  %v747_v46 = vpop.permute.xlu1 %746  ;;  %v745_v47 = vpop.permute.xlu0 %744 }
 0x121   : > { %4121 = vmatpush1.bf16.msra.mxu1 %v5290_v27  ;;  %v748_v13 = vsel %vm380_vm6, %v745_v47, %v747_v46  ;;  %v749_v32 = vsel %vm380_vm6, %v747_v46, %v745_v47 }
 0x122   : > { %v750_v61 = vmul.f32 %v748_v13, %v4795_v45  ;;  %v751_v49 = vmul.f32 %v749_v32, %v4798_v48 }
 0x123   : > { %1906 = vmatpush1.msra.mxu0 %v5002_v51  ;;  %1058 = vrot.lane.b32.xlu1 %v5247_v26, %s4421_s28 }
 0x124   : > { %v5316_v6 = vpack.c.bf16 %v750_v61, %v740_v11  ;;  %1056 = vrot.lane.b32.xlu0 %v5255_v60, %s4421_s28  ;;  %4095 = vmatprep.subr.bf16.mxu0 %v5229_v14  ;;  %v757_v52 = vpop.permute.xlu1 %756  ;;  %v755_v10 = vpop.permute.xlu0 %754  ;;  %v5321_v33 = vpack.c.bf16 %v751_v49, %v741_v42 }
 0x125   : > { %3881 = vmatmul.mubr.msk.f32.vlgmr.msra.gmra.mrb[2].mxu0 %vm1230_vm8, %v5057_v17  ;;  %v759_v51 = vsel %vm402_vm7, %v757_v52, %v755_v10  ;;  %v758_v34 = vsel %vm402_vm7, %v755_v10, %v757_v52 }
 0x126   : > { %4097 = vmatpush1.bf16.msra.mxu0 %v5231_v23  ;;  %v5329_v8 = vmul.f32 %v759_v51, %v4869_v53  ;;  %4123 = vmatprep.subr.bf16.mxu1 %v5321_v33  ;;  %v5343_v57 = vmul.f32 %v758_v34, %v4872_v55 }
 0x127   : > { %4099 = vmatprep.subr.bf16.mxu0 %v5269_v0  ;;  %1070 = vrot.lane.b32.xlu1 %v5247_v26, %s4422_s29 }
 0x128   : > { %1068 = vrot.lane.b32.xlu0 %v5255_v60, %s4422_s29  ;;  %4125 = vmatpush1.bf16.msra.mxu1 %v5316_v6  ;;  %v770_v56 = vpop.permute.xlu1 %769  ;;  %v768_v9 = vpop.permute.xlu0 %767 }
 0x129   : > { %2123 = vmatprep.subr.mxu1 %v5329_v8  ;;  %2042 = vmatprep.mubr.f32.mxu0 %v4425_v7  ;;  %v772_v32 = vsel %vm246_vm1, %v770_v56, %v768_v9 }
 0x12a   : > { %4101 = vmatpush1.bf16.msra.mxu0 %v5271_v3  ;;  %v773_v49 = vmul.f32 %v772_v32, %v4643_v21 }
 0x12b   : > { %4103 = vmatprep.subr.bf16.mxu0 %v5287_v35  ;;  %1080 = vrot.lane.b32.xlu1 %v5247_v26, %s4423_s30 }
 0x12c   : > { %1078 = vrot.lane.b32.xlu0 %v5255_v60, %s4423_s30  ;;  %2124 = vmatpush1.msra.mxu1 %v5343_v57  ;;  %v781_v31 = vpop.permute.xlu1 %780  ;;  %v779_v46 = vpop.permute.xlu0 %778 }
 0x12d   : > { %v783_v47 = vsel %vm268_vm0, %v781_v31, %v779_v46  ;;  %4127 = vmatprep.subr.bf16.mxu1 %v5081_v24  ;;  %3887 = vmatmul.mubr.msk.f32.vlgmr.msra.gmra.mrb[2].mxu1 %vm1230_vm8, %v4902_v25  ;;  %v782_v13 = vsel %vm268_vm0, %v779_v46, %v781_v31  ;;  %v771_v24 = vsel %vm246_vm1, %v768_v9, %v770_v56 }
 0x12e   : > { %4105 = vmatpush1.bf16.msra.mxu0 %v5290_v27  ;;  %4129 = vmatpush1.bf16.msra.mxu1 %v5077_v2  ;;  %v784_v11 = vmul.f32 %v783_v47, %v4646_v22  ;;  %v785_v61 = vmul.f32 %v782_v13, %v4640_v20  ;;  %v774_v10 = vmul.f32 %v771_v24, %v4637_v19  ;;  %v5398_v47 = vld [vmem:[%s4473_s24 + $0x98] sm:$0xff]  ;;  %v5406_v24 = vld [vmem:[%s4473_s24 + $0x90] sm:$0xff] }
 0x12f   : > { %4107 = vmatprep.subr.bf16.mxu0 %v5321_v33  ;;  %1090 = vrot.lane.b32.xlu1 %v5247_v26, %s4424_s6 }
 0x130   : > { %1088 = vrot.lane.b32.xlu0 %v5255_v60, %s4424_s6  ;;  %4131 = vmatprep.subr.bf16.mxu1 %v5121_v58  ;;  %v791_v42 = vpop.permute.xlu1 %790  ;;  %v789_v2 = vpop.permute.xlu0 %788  ;;  %v5385_v51 = vpack.c.bf16 %v784_v11, %v773_v49  ;;  %v5395_v46 = vpack.c.bf16 %v785_v61, %v774_v10 }
 0x131   : > { %2242 = vmatprep.mubr.f32.mxu1 %v4425_v7  ;;  %v793_v52 = vsel %vm290_vm2, %v791_v42, %v789_v2  ;;  %v792_v58 = vsel %vm290_vm2, %v789_v2, %v791_v42 }
 0x132   : > { %4109 = vmatpush1.bf16.msra.mxu0 %v5316_v6  ;;  %4133 = vmatpush1.bf16.msra.mxu1 %v5118_v5  ;;  %v794_v56 = vmul.f32 %v793_v52, %v4674_v38  ;;  %v795_v13 = vmul.f32 %v792_v58, %v4677_v39 }
 0x133   : > { %1994 = vmatprep.subr.mxu0 %v5329_v8  ;;  %1100 = vrot.lane.b32.xlu1 %v5247_v26, %s4426_s7 }
 0x134   : > { %1098 = vrot.lane.b32.xlu0 %v5255_v60, %s4426_s7  ;;  %4135 = vmatprep.subr.bf16.mxu1 %v5138_v15  ;;  %v801_v34 = vpop.permute.xlu1 %800  ;;  %v799_v5 = vpop.permute.xlu0 %798 }
 0x135   : > { %v802_v9 = vsel %vm312_vm3, %v799_v5, %v801_v34  ;;  %v803_v31 = vsel %vm312_vm3, %v801_v34, %v799_v5 }
 0x136   : > { %1995 = vmatpush1.msra.mxu0 %v5343_v57  ;;  %v804_v15 = vmul.f32 %v803_v31, %v4692_v43  ;;  %v805_v32 = vmul.f32 %v802_v9, %v4695_v44  ;;  %4137 = vmatpush1.bf16.msra.mxu1 %v5141_v37 }
 0x137   : > { %3882 = vmatmul.mubr.msk.f32.vlgmr.msra.gmra.mrb[2].mxu0 %vm1230_vm8, %v5146_v40  ;;  %4159 = vmatprep.subr.bf16.mxu0 %v5395_v46 }
 0x138   : > { %v5411_v11 = vpack.c.bf16 %v804_v15, %v794_v56  ;;  %4161 = vmatpush1.bf16.msra.mxu0 %v5385_v51  ;;  %1113 = vrot.lane.b32.xlu1 %v5398_v47, %s4419_s26  ;;  %v813_v42 = vpop.permute.xlu1 %812  ;;  %v811_v2 = vpop.permute.xlu0 %810  ;;  %v5416_v61 = vpack.c.bf16 %v805_v32, %v795_v13 }
 0x139   : > { %1111 = vrot.lane.b32.xlu0 %v5406_v24, %s4419_s26  ;;  %4139 = vmatprep.subr.bf16.mxu1 %v5179_v59  ;;  %v814_v37 = vsel %vm336_vm4, %v811_v2, %v813_v42  ;;  %v815_v49 = vsel %vm336_vm4, %v813_v42, %v811_v2 }
 0x13a   : > { %v816_v52 = vmul.f32 %v814_v37, %v4708_v50  ;;  %v817_v10 = vmul.f32 %v815_v49, %v4716_v54  ;;  %4141 = vmatpush1.bf16.msra.mxu1 %v5177_v16  ;;  %4163 = vmatprep.subr.bf16.mxu0 %v5416_v61 }
 0x13b   : > { %2194 = vmatprep.subr.mxu1 %v5185_v63  ;;  %2460 = vmatprep.mubr.f32.mxu0 %v4425_v7 }
 0x13c   : > { %1124 = vrot.lane.b32.xlu1 %v5398_v47, %s4418_s25  ;;  %4165 = vmatpush1.bf16.msra.mxu0 %v5411_v11  ;;  %v823_v59 = vpop.permute.xlu1 %822  ;;  %v821_v58 = vpop.permute.xlu0 %820  ;;  %v5435_v34 = vpack.c.bf16 %v817_v10, %v4843_v28  ;;  %v5438_v5 = vpack.c.bf16 %v816_v52, %v4846_v29 }
 0x13d   : > { %1122 = vrot.lane.b32.xlu0 %v5406_v24, %s4418_s25  ;;  %v824_v16 = vsel %vm358_vm5, %v821_v58, %v823_v59  ;;  %v825_v63 = vsel %vm358_vm5, %v823_v59, %v821_v58 }
 0x13e   : > { %2195 = vmatpush1.msra.mxu1 %v5199_v18  ;;  %4167 = vmatprep.subr.bf16.mxu0 %v5435_v34  ;;  %v826_v56 = vmul.f32 %v824_v16, %v4782_v36  ;;  %v827_v31 = vmul.f32 %v825_v63, %v4785_v41 }
 0x13f   : > { %4143 = vmatprep.subr.bf16.mxu1 %v5395_v46  ;;  %3888 = vmatmul.mubr.msk.f32.vlgmr.msra.gmra.mrb[2].mxu1 %vm1230_vm8, %v5057_v17 }
 0x140   : > { %1134 = vrot.lane.b32.xlu1 %v5398_v47, %s4420_s27  ;;  %4145 = vmatpush1.bf16.msra.mxu1 %v5385_v51  ;;  %v833_v28 = vpop.permute.xlu1 %832  ;;  %v831_v29 = vpop.permute.xlu0 %830 }
 0x141   : > { %1132 = vrot.lane.b32.xlu0 %v5406_v24, %s4420_s27  ;;  %4169 = vmatpush1.bf16.msra.mxu0 %v5438_v5  ;;  %v834_v18 = vsel %vm380_vm6, %v831_v29, %v833_v28  ;;  %v835_v9 = vsel %vm380_vm6, %v833_v28, %v831_v29 }
 0x142   : > { %v836_v13 = vmul.f32 %v834_v18, %v4795_v45  ;;  %v837_v15 = vmul.f32 %v835_v9, %v4798_v48  ;;  %4147 = vmatprep.subr.bf16.mxu1 %v5416_v61  ;;  %2331 = vmatprep.mubr.f32.mxu1 %v4425_v7 }
 0x144   : > { %v5467_v32 = vpack.c.bf16 %v836_v13, %v826_v56  ;;  %1144 = vrot.lane.b32.xlu1 %v5398_v47, %s4421_s28  ;;  %4149 = vmatpush1.bf16.msra.mxu1 %v5411_v11  ;;  %v843_v42 = vpop.permute.xlu1 %842  ;;  %v841_v2 = vpop.permute.xlu0 %840  ;;  %v5472_v37 = vpack.c.bf16 %v837_v15, %v827_v31 }
 0x145   : > { %1142 = vrot.lane.b32.xlu0 %v5406_v24, %s4421_s28  ;;  %v845_v49 = vsel %vm402_vm7, %v843_v42, %v841_v2  ;;  %4151 = vmatprep.subr.bf16.mxu1 %v5435_v34  ;;  %v844_v52 = vsel %vm402_vm7, %v841_v2, %v843_v42 }
 0x146   : > { %v5482_v10 = vmul.f32 %v845_v49, %v4869_v53  ;;  %4171 = vmatprep.subr.bf16.mxu0 %v5472_v37  ;;  %v5490_v16 = vmul.f32 %v844_v52, %v4872_v55 }
 0x147   : > { %4173 = vmatpush1.bf16.msra.mxu0 %v5467_v32 }
 0x148   : > { %1156 = vrot.lane.b32.xlu1 %v5398_v47, %s4422_s29  ;;  %4153 = vmatpush1.bf16.msra.mxu1 %v5438_v5  ;;  %v856_v59 = vpop.permute.xlu1 %855  ;;  %v854_v58 = vpop.permute.xlu0 %853 }
 0x149   : > { %1154 = vrot.lane.b32.xlu0 %v5406_v24, %s4422_s29  ;;  %4155 = vmatprep.subr.bf16.mxu1 %v5472_v37  ;;  %v858_v63 = vsel %vm246_vm1, %v856_v59, %v854_v58  ;;  %v857_v28 = vsel %vm246_vm1, %v854_v58, %v856_v59 }
 0x14a   : > { %2412 = vmatprep.subr.mxu0 %v5482_v10  ;;  %v859_v18 = vmul.f32 %v858_v63, %v4643_v21  ;;  %v860_v13 = vmul.f32 %v857_v28, %v4637_v19 }
 0x14b   : > { %2413 = vmatpush1.msra.mxu0 %v5490_v16 }
 0x14c   : > { %1166 = vrot.lane.b32.xlu1 %v5398_v47, %s4423_s30  ;;  %4157 = vmatpush1.bf16.msra.mxu1 %v5467_v32  ;;  %v867_v29 = vpop.permute.xlu1 %866  ;;  %v865_v56 = vpop.permute.xlu0 %864 }
 0x14d   : > { %1164 = vrot.lane.b32.xlu0 %v5406_v24, %s4423_s30  ;;  %v868_v9 = vsel %vm268_vm0, %v865_v56, %v867_v29  ;;  %v869_v31 = vsel %vm268_vm0, %v867_v29, %v865_v56  ;;  %2283 = vmatprep.subr.mxu1 %v5482_v10  ;;  %s3958_s30 = sshll.u32 %s4464_s19, 7 }
 0x14e   : > { %v870_v15 = vmul.f32 %v869_v31, %v4646_v22  ;;  %v871_v42 = vmul.f32 %v868_v9, %v4640_v20  ;;  %4175 = vmatprep.subr.bf16.mxu0 %v5229_v14  ;;  %3894 = vmatmul.mubr.msk.f32.vlgmr.msra.gmra.mrb[4].mxu0 %vm1230_vm8, %v4902_v25  ;;  %s5886_s16 = scalar_lea.vmem %s6233_s5, %s3958_s30 }
 0x14f   : > { %4177 = vmatpush1.bf16.msra.mxu0 %v5231_v23  ;;  %2531 = vmatprep.mubr.f32.mxu0 %v4425_v7 }
 0x150   : > { %v5520_v2 = vpack.c.bf16 %v870_v15, %v859_v18  ;;  %1176 = vrot.lane.b32.xlu1 %v5398_v47, %s4424_s6  ;;  %4179 = vmatprep.subr.bf16.mxu0 %v5269_v0  ;;  %v877_v49 = vpop.permute.xlu1 %876  ;;  %v875_v52 = vpop.permute.xlu0 %874  ;;  %v5525_v59 = vpack.c.bf16 %v871_v42, %v860_v13 }
 0x151   : > { %1174 = vrot.lane.b32.xlu0 %v5406_v24, %s4424_s6  ;;  %2284 = vmatpush1.msra.mxu1 %v5490_v16  ;;  %v878_v25 = vsel %vm290_vm2, %v875_v52, %v877_v49  ;;  %v879_v14 = vsel %vm290_vm2, %v877_v49, %v875_v52 }
 0x152   : > { %3889 = vmatmul.mubr.msk.f32.vlgmr.msra.gmra.mrb[2].mxu1 %vm1230_vm8, %v5146_v40  ;;  %4207 = vmatprep.subr.bf16.mxu1 %v5525_v59 }
 0x153   : > { %4181 = vmatpush1.bf16.msra.mxu0 %v5271_v3  ;;  %4209 = vmatpush1.bf16.msra.mxu1 %v5520_v2  ;;  %v880_v3 = vmul.f32 %v879_v14, %v4674_v38 }
 0x154   : > { %4183 = vmatprep.subr.bf16.mxu0 %v5287_v35  ;;  %v887_v23 = vpop.permute.xlu1 %886  ;;  %v885_v0 = vpop.permute.xlu0 %884  ;;  %1186 = vrot.lane.b32.xlu1 %v5398_v47, %s4426_s7  ;;  %v881_v35 = vmul.f32 %v878_v25, %v4677_v39 }
 0x155   : > { %v888_v58 = vsel %vm312_vm3, %v885_v0, %v887_v23  ;;  %v889_v63 = vsel %vm312_vm3, %v887_v23, %v885_v0  ;;  %1184 = vrot.lane.b32.xlu0 %v5406_v24, %s4426_s7  ;;  %2749 = vmatprep.mubr.f32.mxu1 %v4425_v7 }
 0x156   : > { %v890_v28 = vmul.f32 %v889_v63, %v4692_v43  ;;  %v891_v29 = vmul.f32 %v888_v58, %v4695_v44 }
 0x157   : > { %4185 = vmatpush1.bf16.msra.mxu0 %v5290_v27 }
 0x158   : > { %v5554_v56 = vpack.c.bf16 %v890_v28, %v880_v3  ;;  %4187 = vmatprep.subr.bf16.mxu0 %v5321_v33  ;;  %v899_v18 = vpop.permute.xlu1 %898  ;;  %v897_v9 = vpop.permute.xlu0 %896  ;;  %v5557_v31 = vpack.c.bf16 %v891_v29, %v881_v35 }
 0x159   : > { %v900_v13 = vsel %vm336_vm4, %v897_v9, %v899_v18  ;;  %v901_v15 = vsel %vm336_vm4, %v899_v18, %v897_v9 }
 0x15a   : > { %v902_v42 = vmul.f32 %v900_v13, %v4708_v50  ;;  %v903_v49 = vmul.f32 %v901_v15, %v4716_v54  ;;  %4211 = vmatprep.subr.bf16.mxu1 %v5557_v31 }
 0x15b   : > { %4189 = vmatpush1.bf16.msra.mxu0 %v5316_v6  ;;  %4213 = vmatpush1.bf16.msra.mxu1 %v5554_v56 }
 0x15c   : > { %v5569_v27 = vpack.c.bf16 %v902_v42, %v4970_v62  ;;  %2483 = vmatprep.subr.mxu0 %v5329_v8  ;;  %v909_v33 = vpop.permute.xlu1 %908  ;;  %v907_v52 = vpop.permute.xlu0 %906  ;;  %v5573_v25 = vpack.c.bf16 %v903_v49, %v4967_v4 }
 0x15d   : > { %v910_v6 = vsel %vm358_vm5, %v907_v52, %v909_v33  ;;  %v911_v62 = vsel %vm358_vm5, %v909_v33, %v907_v52 }
 0x15e   : > { %4215 = vmatprep.subr.bf16.mxu1 %v5573_v25  ;;  %v912_v23 = vmul.f32 %v910_v6, %v4782_v36  ;;  %v913_v0 = vmul.f32 %v911_v62, %v4785_v41 }
 0x15f   : > { %2484 = vmatpush1.msra.mxu0 %v5343_v57  ;;  %4217 = vmatpush1.bf16.msra.mxu1 %v5569_v27 }
 0x160   : > { %4191 = vmatprep.subr.bf16.mxu0 %v5525_v59  ;;  %3895 = vmatmul.mubr.msk.f32.vlgmr.msra.gmra.mrb[4].mxu0 %vm1230_vm8, %v5057_v17  ;;  %v919_v8 = vpop.permute.xlu1 %918 }
 0x161   : > { %4193 = vmatpush1.bf16.msra.mxu0 %v5520_v2  ;;  %v917_v4 = vpop.permute.xlu0 %916  ;;  %2620 = vmatprep.mubr.f32.mxu0 %v4425_v7 }
 0x162   : > { %v920_v57 = vsel %vm380_vm6, %v917_v4, %v919_v8  ;;  %v921_v14 = vsel %vm380_vm6, %v919_v8, %v917_v4  ;;  %4195 = vmatprep.subr.bf16.mxu0 %v5557_v31 }
 0x163   : > { %v922_v58 = vmul.f32 %v920_v57, %v4795_v45  ;;  %v923_v63 = vmul.f32 %v921_v14, %v4798_v48  ;;  %v5633_v14 = vld [vmem:[%s6229_s1 + $0x8] sm:$0xff] }
 0x164   : > { %v929_v3 = vpop.permute.xlu1 %928 }
 0x165   : > { %v5596_v35 = vpack.c.bf16 %v922_v58, %v912_v23  ;;  %4197 = vmatpush1.bf16.msra.mxu0 %v5554_v56  ;;  %v927_v28 = vpop.permute.xlu0 %926  ;;  %v5599_v29 = vpack.c.bf16 %v923_v63, %v913_v0 }
 0x166   : > { %v931_v18 = vsel %vm402_vm7, %v929_v3, %v927_v28  ;;  %4199 = vmatprep.subr.bf16.mxu0 %v5573_v25  ;;  %v930_v9 = vsel %vm402_vm7, %v927_v28, %v929_v3 }
 0x167   : > { %v5607_v13 = vmul.f32 %v931_v18, %v4869_v53  ;;  %4219 = vmatprep.subr.bf16.mxu1 %v5599_v29  ;;  %v5614_v49 = vmul.f32 %v930_v9, %v4872_v55 }
 0x168   : > { %4221 = vmatpush1.bf16.msra.mxu1 %v5596_v35  ;;  %v942_v15 = vpop.permute.xlu1 %941 }
 0x169   : > { %4201 = vmatpush1.bf16.msra.mxu0 %v5569_v27  ;;  %v940_v42 = vpop.permute.xlu0 %939  ;;  %2701 = vmatprep.subr.mxu1 %v5607_v13 }
 0x16a   : > { %4203 = vmatprep.subr.bf16.mxu0 %v5599_v29  ;;  %v944_v33 = vsel %vm246_vm1, %v942_v15, %v940_v42  ;;  %v943_v52 = vsel %vm246_vm1, %v940_v42, %v942_v15 }
 0x16b   : > { %v945_v8 = vmul.f32 %v944_v33, %v4643_v21 }
 0x16c   : > { %2702 = vmatpush1.msra.mxu1 %v5614_v49  ;;  %v953_v6 = vpop.permute.xlu1 %952 }
 0x16d   : > { %4205 = vmatpush1.bf16.msra.mxu0 %v5596_v35  ;;  %v951_v62 = vpop.permute.xlu0 %950  ;;  %4223 = vmatprep.subr.bf16.mxu1 %v5395_v46  ;;  %v946_v46 = vmul.f32 %v943_v52, %v4637_v19 }
 0x16e   : > { %v954_v4 = vsel %vm268_vm0, %v951_v62, %v953_v6  ;;  %v955_v57 = vsel %vm268_vm0, %v953_v6, %v951_v62  ;;  %2572 = vmatprep.subr.mxu0 %v5607_v13  ;;  %3901 = vmatmul.mubr.msk.f32.vlgmr.msra.gmra.mrb[4].mxu1 %vm1230_vm8, %v5633_v14 }
 0x16f   : > { %v956_v23 = vmul.f32 %v955_v57, %v4646_v22  ;;  %v957_v0 = vmul.f32 %v954_v4, %v4640_v20  ;;  %4225 = vmatpush1.bf16.msra.mxu1 %v5385_v51  ;;  %2820 = vmatprep.mubr.f32.mxu1 %v4425_v7 }
 0x170   : > { %4227 = vmatprep.subr.bf16.mxu1 %v5416_v61  ;;  %v963_v58 = vpop.permute.xlu1 %962 }
 0x171   : > { %v5643_v63 = vpack.c.bf16 %v956_v23, %v945_v8  ;;  %2573 = vmatpush1.msra.mxu0 %v5614_v49  ;;  %v961_v3 = vpop.permute.xlu0 %960  ;;  %v5646_v28 = vpack.c.bf16 %v957_v0, %v946_v46 }
 0x172   : > { %3896 = vmatmul.mubr.msk.f32.vlgmr.msra.gmra.mrb[4].mxu0 %vm1230_vm8, %v5146_v40  ;;  %v964_v51 = vsel %vm290_vm2, %v961_v3, %v963_v58  ;;  %v965_v61 = vsel %vm290_vm2, %v963_v58, %v961_v3 }
 0x173   : > { %4229 = vmatpush1.bf16.msra.mxu1 %v5411_v11  ;;  %4255 = vmatprep.subr.bf16.mxu0 %v5646_v28  ;;  %v966_v42 = vmul.f32 %v965_v61, %v4674_v38  ;;  %v967_v33 = vmul.f32 %v964_v51, %v4677_v39 }
 0x174   : > { %4231 = vmatprep.subr.bf16.mxu1 %v5435_v34  ;;  %4257 = vmatpush1.bf16.msra.mxu0 %v5643_v63  ;;  %v973_v18 = vpop.permute.xlu1 %972 }
 0x175   : > { %v971_v9 = vpop.permute.xlu0 %970  ;;  %3038 = vmatprep.mubr.f32.mxu0 %v4425_v7 }
 0x176   : > { %v974_v15 = vsel %vm312_vm3, %v971_v9, %v973_v18  ;;  %v975_v11 = vsel %vm312_vm3, %v973_v18, %v971_v9 }
 0x177   : > { %v976_v52 = vmul.f32 %v975_v11, %v4692_v43  ;;  %v977_v34 = vmul.f32 %v974_v15, %v4695_v44  ;;  %4233 = vmatpush1.bf16.msra.mxu1 %v5438_v5 }
 0x178   : > { %4235 = vmatprep.subr.bf16.mxu1 %v5472_v37  ;;  %v985_v6 = vpop.permute.xlu1 %984 }
 0x179   : > { %v5669_v62 = vpack.c.bf16 %v976_v52, %v966_v42  ;;  %v983_v8 = vpop.permute.xlu0 %982  ;;  %v5671_v4 = vpack.c.bf16 %v977_v34, %v967_v33 }
 0x17a   : > { %v986_v57 = vsel %vm336_vm4, %v983_v8, %v985_v6  ;;  %v987_v46 = vsel %vm336_vm4, %v985_v6, %v983_v8 }
 0x17b   : > { %v988_v23 = vmul.f32 %v986_v57, %v4708_v50  ;;  %v989_v0 = vmul.f32 %v987_v46, %v4716_v54  ;;  %4237 = vmatpush1.bf16.msra.mxu1 %v5467_v32  ;;  %4259 = vmatprep.subr.bf16.mxu0 %v5671_v4 }
 0x17c   : > { %2772 = vmatprep.subr.mxu1 %v5482_v10  ;;  %4261 = vmatpush1.bf16.msra.mxu0 %v5669_v62  ;;  %v995_v5 = vpop.permute.xlu1 %994 }
 0x17d   : > { %v5684_v37 = vpack.c.bf16 %v988_v23, %v5102_v30  ;;  %v993_v58 = vpop.permute.xlu0 %992  ;;  %v5687_v3 = vpack.c.bf16 %v989_v0, %v5097_v1 }
 0x17e   : > { %v996_v32 = vsel %vm358_vm5, %v993_v58, %v995_v5  ;;  %v997_v10 = vsel %vm358_vm5, %v995_v5, %v993_v58 }
 0x17f   : > { %2773 = vmatpush1.msra.mxu1 %v5490_v16  ;;  %4263 = vmatprep.subr.bf16.mxu0 %v5687_v3  ;;  %v998_v61 = vmul.f32 %v996_v32, %v4782_v36 }
 0x180   : > { %4239 = vmatprep.subr.bf16.mxu1 %v5646_v28  ;;  %3902 = vmatmul.mubr.msk.f32.vlgmr.msra.gmra.mrb[4].mxu1 %vm1230_vm8, %v5057_v17  ;;  %v1005_v30 = vpop.permute.xlu1 %1004  ;;  %v999_v17 = vmul.f32 %v997_v10, %v4785_v41 }
 0x181   : > { %4241 = vmatpush1.bf16.msra.mxu1 %v5643_v63  ;;  %4265 = vmatpush1.bf16.msra.mxu0 %v5684_v37  ;;  %v1003_v1 = vpop.permute.xlu0 %1002 }
 0x182   : > { %v1006_v16 = vsel %vm380_vm6, %v1003_v1, %v1005_v30  ;;  %v1007_v51 = vsel %vm380_vm6, %v1005_v30, %v1003_v1  ;;  %4243 = vmatprep.subr.bf16.mxu1 %v5671_v4  ;;  %2909 = vmatprep.mubr.f32.mxu1 %v4425_v7 }
 0x183   : > { %v1008_v18 = vmul.f32 %v1006_v16, %v4795_v45  ;;  %v1009_v9 = vmul.f32 %v1007_v51, %v4798_v48 }
 0x185   : > { %v5710_v15 = vpack.c.bf16 %v1008_v18, %v998_v61  ;;  %4245 = vmatpush1.bf16.msra.mxu1 %v5669_v62  ;;  %v1015_v11 = vpop.permute.xlu1 %1014  ;;  %v5713_v42 = vpack.c.bf16 %v1009_v9, %v999_v17 }
 0x186   : > { %v1013_v33 = vpop.permute.xlu0 %1012  ;;  %4247 = vmatprep.subr.bf16.mxu1 %v5687_v3 }
 0x187   : > { %v1016_v52 = vsel %vm402_vm7, %v1013_v33, %v1015_v11  ;;  %v1017_v34 = vsel %vm402_vm7, %v1015_v11, %v1013_v33  ;;  %4267 = vmatprep.subr.bf16.mxu0 %v5713_v42 }
 0x188   : > { %v5722_v6 = vmul.f32 %v1017_v34, %v4869_v53  ;;  %4269 = vmatpush1.bf16.msra.mxu0 %v5710_v15  ;;  %v5727_v57 = vmul.f32 %v1016_v52, %v4872_v55 }
 0x189   : > { %4249 = vmatpush1.bf16.msra.mxu1 %v5684_v37  ;;  %v1028_v8 = vpop.permute.xlu1 %1027 }
 0x18a   : > { %v1026_v46 = vpop.permute.xlu0 %1025  ;;  %4251 = vmatprep.subr.bf16.mxu1 %v5713_v42  ;;  %2990 = vmatprep.subr.mxu0 %v5722_v6 }
 0x18b   : > { %v1029_v23 = vsel %vm246_vm1, %v1026_v46, %v1028_v8  ;;  %v1030_v0 = vsel %vm246_vm1, %v1028_v8, %v1026_v46 }
 0x18c   : > { %2991 = vmatpush1.msra.mxu0 %v5727_v57  ;;  %v1031_v30 = vmul.f32 %v1030_v0, %v4643_v21 }
 0x18d   : > { %4253 = vmatpush1.bf16.msra.mxu1 %v5710_v15  ;;  %v1039_v5 = vpop.permute.xlu1 %1038  ;;  %4271 = vmatprep.subr.bf16.mxu0 %v5525_v59  ;;  %v1032_v59 = vmul.f32 %v1029_v23, %v4637_v19 }
 0x18e   : > { %v1037_v58 = vpop.permute.xlu0 %1036  ;;  %2861 = vmatprep.subr.mxu1 %v5722_v6  ;;  %3908 = vmatmul.mubr.msk.f32.vlgmr.msra.gmra.mrb[6].mxu0 %vm1230_vm8, %v5633_v14 }
 0x18f   : > { %v1040_v32 = vsel %vm268_vm0, %v1037_v58, %v1039_v5  ;;  %v1041_v10 = vsel %vm268_vm0, %v1039_v5, %v1037_v58  ;;  %4273 = vmatpush1.bf16.msra.mxu0 %v5520_v2  ;;  %3109 = vmatprep.mubr.f32.mxu0 %v4425_v7 }
 0x190   : > { %v1042_v1 = vmul.f32 %v1041_v10, %v4646_v22  ;;  %v1043_v16 = vmul.f32 %v1040_v32, %v4640_v20  ;;  %4275 = vmatprep.subr.bf16.mxu0 %v5557_v31 }
 0x191   : > { %2862 = vmatpush1.msra.mxu1 %v5727_v57  ;;  %v1049_v51 = vpop.permute.xlu1 %1048 }
 0x192   : > { %v4288_v61 = vpack.c.bf16 %v1042_v1, %v1031_v30  ;;  %v1047_v17 = vpop.permute.xlu0 %1046  ;;  %3903 = vmatmul.mubr.msk.f32.vlgmr.msra.gmra.mrb[4].mxu1 %vm1230_vm8, %v5146_v40  ;;  %v4286_v2 = vpack.c.bf16 %v1043_v16, %v1032_v59 }
 0x193   : > { %4277 = vmatpush1.bf16.msra.mxu0 %v5554_v56  ;;  %3327 = vmatprep.mubr.f32.mxu1 %v4425_v7  ;;  %v1050_v18 = vsel %vm290_vm2, %v1047_v17, %v1049_v51  ;;  %v1051_v31 = vsel %vm290_vm2, %v1049_v51, %v1047_v17 }
 0x194   : > { %4279 = vmatprep.subr.bf16.mxu0 %v5573_v25  ;;  %4303 = vmatprep.subr.bf16.mxu1 %v4286_v2  ;;  %v1052_v25 = vmul.f32 %v1051_v31, %v4674_v38  ;;  %v1053_v33 = vmul.f32 %v1050_v18, %v4677_v39 }
 0x195   : > { %4305 = vmatpush1.bf16.msra.mxu1 %v4288_v61  ;;  %v1059_v9 = vpop.permute.xlu1 %1058 }
 0x196   : > { %v1057_v11 = vpop.permute.xlu0 %1056 }
 0x197   : > { %v1060_v40 = vsel %vm312_vm3, %v1057_v11, %v1059_v9  ;;  %v1061_v56 = vsel %vm312_vm3, %v1059_v9, %v1057_v11  ;;  %4281 = vmatpush1.bf16.msra.mxu0 %v5569_v27 }
 0x198   : > { %v1062_v52 = vmul.f32 %v1061_v56, %v4692_v43  ;;  %v1063_v34 = vmul.f32 %v1060_v40, %v4695_v44  ;;  %4283 = vmatprep.subr.bf16.mxu0 %v5599_v29 }
 0x199   : > { %v1071_v8 = vpop.permute.xlu1 %1070 }
 0x19a   : > { %v4292_v46 = vpack.c.bf16 %v1062_v52, %v1052_v25  ;;  %v1069_v23 = vpop.permute.xlu0 %1068  ;;  %v4290_v0 = vpack.c.bf16 %v1063_v34, %v1053_v33 }
 0x19b   : > { %v1072_v5 = vsel %vm336_vm4, %v1069_v23, %v1071_v8  ;;  %v1073_v27 = vsel %vm336_vm4, %v1071_v8, %v1069_v23  ;;  %4285 = vmatpush1.bf16.msra.mxu0 %v5596_v35 }
 0x19c   : > { %v1074_v58 = vmul.f32 %v1072_v5, %v4708_v50  ;;  %v1075_v32 = vmul.f32 %v1073_v27, %v4716_v54  ;;  %3061 = vmatprep.subr.mxu0 %v5607_v13  ;;  %4307 = vmatprep.subr.bf16.mxu1 %v4290_v0  ;;  %v5790_v13 = vld [vmem:[%s6229_s1] sm:$0xff]  ;;  %v5818_v5 = vld [vmem:[%s6229_s1 + $0x10] sm:$0xff] }
 0x19d   : > { %4309 = vmatpush1.bf16.msra.mxu1 %v4292_v46  ;;  %v1081_v29 = vpop.permute.xlu1 %1080 }
 0x19e   : > { %v4296_v10 = vpack.c.bf16 %v1074_v58, %v5255_v60  ;;  %v1079_v30 = vpop.permute.xlu0 %1078  ;;  %v4294_v59 = vpack.c.bf16 %v1075_v32, %v5247_v26 }
 0x19f   : > { %3062 = vmatpush1.msra.mxu0 %v5614_v49  ;;  %v1082_v35 = vsel %vm358_vm5, %v1079_v30, %v1081_v29  ;;  %v1083_v1 = vsel %vm358_vm5, %v1081_v29, %v1079_v30 }
 0x1a0   : > { %4287 = vmatprep.subr.bf16.mxu0 %v4286_v2  ;;  %4311 = vmatprep.subr.bf16.mxu1 %v4294_v59  ;;  %v1084_v51 = vmul.f32 %v1082_v35, %v4782_v36  ;;  %v1085_v17 = vmul.f32 %v1083_v1, %v4785_v41 }
 0x1a1   : > { %3909 = vmatmul.mubr.msk.f32.vlgmr.msra.gmra.mrb[6].mxu0 %vm1230_vm8, %v5790_v13  ;;  %4313 = vmatpush1.bf16.msra.mxu1 %v4296_v10  ;;  %v1091_v26 = vpop.permute.xlu1 %1090 }
 0x1a2   : > { %4289 = vmatpush1.bf16.msra.mxu0 %v4288_v61  ;;  %v1089_v60 = vpop.permute.xlu0 %1088  ;;  %3198 = vmatprep.mubr.f32.mxu0 %v4425_v7 }
 0x1a3   : > { %v1092_v49 = vsel %vm380_vm6, %v1089_v60, %v1091_v26  ;;  %v1093_v16 = vsel %vm380_vm6, %v1091_v26, %v1089_v60  ;;  %4291 = vmatprep.subr.bf16.mxu0 %v4290_v0 }
 0x1a4   : > { %v1094_v2 = vmul.f32 %v1092_v49, %v4795_v45  ;;  %v1095_v18 = vmul.f32 %v1093_v16, %v4798_v48 }
 0x1a5   : > { %v1101_v31 = vpop.permute.xlu1 %1100 }
 0x1a6   : > { %v4300_v61 = vpack.c.bf16 %v1094_v2, %v1084_v51  ;;  %4293 = vmatpush1.bf16.msra.mxu0 %v4292_v46  ;;  %v1099_v9 = vpop.permute.xlu0 %1098  ;;  %v4298_v11 = vpack.c.bf16 %v1095_v18, %v1085_v17 }
 0x1a7   : > { %v1102_v40 = vsel %vm402_vm7, %v1099_v9, %v1101_v31  ;;  %v1103_v56 = vsel %vm402_vm7, %v1101_v31, %v1099_v9  ;;  %4295 = vmatprep.subr.bf16.mxu0 %v4294_v59 }
 0x1a8   : > { %v1105_v25 = vmul.f32 %v1103_v56, %v4869_v53  ;;  %4315 = vmatprep.subr.bf16.mxu1 %v4298_v11  ;;  %v1104_v33 = vmul.f32 %v1102_v40, %v4872_v55 }
 0x1a9   : > { %4317 = vmatpush1.bf16.msra.mxu1 %v4300_v61 }
 0x1aa   : > { %4297 = vmatpush1.bf16.msra.mxu0 %v4296_v10  ;;  %v1114_v52 = vpop.permute.xlu1 %1113  ;;  %3279 = vmatprep.subr.mxu1 %v1105_v25 }
 0x1ab   : > { %v1112_v34 = vpop.permute.xlu0 %1111  ;;  %4299 = vmatprep.subr.bf16.mxu0 %v4298_v11 }
 0x1ac   : > { %v1116_v27 = vsel %vm246_vm1, %v1114_v52, %v1112_v34 }
 0x1ad   : > { %3280 = vmatpush1.msra.mxu1 %v1104_v33  ;;  %v1117_v30 = vmul.f32 %v1116_v27, %v4643_v21 }
 0x1ae   : > { %4301 = vmatpush1.bf16.msra.mxu0 %v4300_v61  ;;  %v1125_v8 = vpop.permute.xlu1 %1124  ;;  %4319 = vmatprep.subr.bf16.mxu1 %v5646_v28  ;;  %v1115_v28 = vsel %vm246_vm1, %v1112_v34, %v1114_v52 }
 0x1af   : > { %v1123_v46 = vpop.permute.xlu0 %1122  ;;  %3150 = vmatprep.subr.mxu0 %v1105_v25  ;;  %3915 = vmatmul.mubr.msk.f32.vlgmr.msra.gmra.mrb[6].mxu1 %vm1230_vm8, %v5633_v14  ;;  %v1118_v29 = vmul.f32 %v1115_v28, %v4637_v19 }
 0x1b0   : > { %4321 = vmatpush1.bf16.msra.mxu1 %v5643_v63  ;;  %3398 = vmatprep.mubr.f32.mxu1 %v4425_v7  ;;  %v1127_v58 = vsel %vm268_vm0, %v1125_v8, %v1123_v46 }
 0x1b1   : > { %4323 = vmatprep.subr.bf16.mxu1 %v5671_v4  ;;  %v1126_v4 = vsel %vm268_vm0, %v1123_v46, %v1125_v8  ;;  %v1128_v59 = vmul.f32 %v1127_v58, %v4646_v22  ;;  %v1486_v8 = vld [vmem:[#allocation4 + $0x8] sm:$0xff] }
 0x1b2   : > { %3151 = vmatpush1.msra.mxu0 %v1104_v33  ;;  %v1135_v23 = vpop.permute.xlu1 %1134  ;;  %v1129_v10 = vmul.f32 %v1126_v4, %v4640_v20  ;;  %v1480_v33 = vld [vmem:[#allocation3 + $0x8] sm:$0xff] }
 0x1b3   : > { %v1133_v0 = vpop.permute.xlu0 %1132  ;;  %3910 = vmatmul.mubr.msk.f32.vlgmr.msra.gmra.mrb[6].mxu0 %vm1230_vm8, %v5818_v5  ;;  %v4336_v60 = vpack.c.bf16 %v1128_v59, %v1117_v30 }
 0x1b4   : > { %4325 = vmatpush1.bf16.msra.mxu1 %v5669_v62  ;;  %v1136_v62 = vsel %vm290_vm2, %v1133_v0, %v1135_v23  ;;  %v1137_v35 = vsel %vm290_vm2, %v1135_v23, %v1133_v0  ;;  %v4334_v22 = vpack.c.bf16 %v1129_v10, %v1118_v29 }
 0x1b5   : > { %4327 = vmatprep.subr.bf16.mxu1 %v5687_v3  ;;  %v1138_v49 = vmul.f32 %v1137_v35, %v4674_v38 }
 0x1b6   : > { %v1145_v14 = vpop.permute.xlu1 %1144 }
 0x1b7   : > { %v1143_v63 = vpop.permute.xlu0 %1142 }
 0x1b8   : > { %4329 = vmatpush1.bf16.msra.mxu1 %v5684_v37  ;;  %v1146_v3 = vsel %vm312_vm3, %v1143_v63, %v1145_v14  ;;  %v1147_v1 = vsel %vm312_vm3, %v1145_v14, %v1143_v63 }
 0x1b9   : > { %4331 = vmatprep.subr.bf16.mxu1 %v5713_v42  ;;  %v1139_v42 = vmul.f32 %v1136_v62, %v4677_v39  ;;  %v1149_v26 = vmul.f32 %v1146_v3, %v4695_v44 }
 0x1ba   : > { %v1157_v32 = vpop.permute.xlu1 %1156 }
 0x1bb   : > { %v1155_v37 = vpop.permute.xlu0 %1154 }
 0x1bc   : > { %4333 = vmatpush1.bf16.msra.mxu1 %v5710_v15  ;;  %v1159_v19 = vsel %vm336_vm4, %v1157_v32, %v1155_v37  ;;  %v1148_v15 = vmul.f32 %v1147_v1, %v4692_v43  ;;  %v1158_v44 = vsel %vm336_vm4, %v1155_v37, %v1157_v32 }
 0x1bd   : > { %3350 = vmatprep.subr.mxu1 %v5722_v6  ;;  %v1161_v39 = vmul.f32 %v1159_v19, %v4716_v54  ;;  %v4338_v6 = vpack.c.bf16 %v1149_v26, %v1139_v42  ;;  %v1160_v54 = vmul.f32 %v1158_v44, %v4708_v50 }
 0x1be   : > { %v1167_v20 = vpop.permute.xlu1 %1166  ;;  %v4340_v43 = vpack.c.bf16 %v1148_v15, %v1138_v49 }
 0x1bf   : > { %v1165_v21 = vpop.permute.xlu0 %1164  ;;  %v4342_v17 = vpack.c.bf16 %v1161_v39, %v5398_v47  ;;  %v4344_v61 = vpack.c.bf16 %v1160_v54, %v5406_v24 }
 0x1c0   : > { %3351 = vmatpush1.msra.mxu1 %v5727_v57  ;;  %v1169_v16 = vsel %vm358_vm5, %v1167_v20, %v1165_v21 }
 0x1c1   : > { %4335 = vmatprep.subr.bf16.mxu1 %v4334_v22  ;;  %3916 = vmatmul.mubr.msk.f32.vlgmr.msra.gmra.mrb[6].mxu1 %vm1230_vm8, %v5790_v13  ;;  %v1168_v13 = vsel %vm358_vm5, %v1165_v21, %v1167_v20  ;;  %v1171_v2 = vmul.f32 %v1169_v16, %v4785_v41 }
 0x1c2   : > { %4337 = vmatpush1.bf16.msra.mxu1 %v4336_v60  ;;  %v1177_v51 = vpop.permute.xlu1 %1176  ;;  %3487 = vmatprep.mubr.f32.mxu1 %v4425_v7  ;;  %v1170_v9 = vmul.f32 %v1168_v13, %v4782_v36 }
 0x1c3   : > { %v1175_v38 = vpop.permute.xlu0 %1174  ;;  %4339 = vmatprep.subr.bf16.mxu1 %v4338_v6 }
 0x1c4   : > { %v1179_v57 = vsel %vm380_vm6, %v1177_v51, %v1175_v38  ;;  %v1178_v18 = vsel %vm380_vm6, %v1175_v38, %v1177_v51 }
 0x1c5   : > { %v1181_v7 = vmul.f32 %v1179_v57, %v4798_v48  ;;  %v1180_v47 = vmul.f32 %v1178_v18, %v4795_v45  ;;  %v1479_v45 = vld [vmem:[#allocation3] sm:$0xff] }
 0x1c6   : > { %4341 = vmatpush1.bf16.msra.mxu1 %v4340_v43  ;;  %v1187_v31 = vpop.permute.xlu1 %1186 }
 0x1c7   : > { %4343 = vmatprep.subr.bf16.mxu1 %v4342_v17  ;;  %v1185_v50 = vpop.permute.xlu0 %1184  ;;  %v4346_v41 = vpack.c.bf16 %v1181_v7, %v1171_v2  ;;  %v4348_v56 = vpack.c.bf16 %v1180_v47, %v1170_v9 }
 0x1c8   : > { %v1189_v11 = vsel %vm402_vm7, %v1187_v31, %v1185_v50  ;;  %v1188_v48 = vsel %vm402_vm7, %v1185_v50, %v1187_v31 }
 0x1c9   : > { %v1191_v40 = vmul.f32 %v1189_v11, %v4869_v53  ;;  %v1190_v25 = vmul.f32 %v1188_v48, %v4872_v55  ;;  %v1485_v55 = vld [vmem:[#allocation4] sm:$0xff] }
 0x1ca   : > { %4345 = vmatpush1.bf16.msra.mxu1 %v4344_v61 }
 0x1cb   : > { %4347 = vmatprep.subr.bf16.mxu1 %v4346_v41 }
 0x1ce   : > { %4349 = vmatpush1.bf16.msra.mxu1 %v4348_v56 }
 0x1cf   : > { %3439 = vmatprep.subr.mxu1 %v1191_v40 }
 0x1d2   : > { %3440 = vmatpush1.msra.mxu1 %v1190_v25 }
 0x1d3   : > { %3917 = vmatmul.mubr.msk.f32.vlgmr.msra.gmra.mrb[6].mxu1 %vm1230_vm8, %v5818_v5  ;;  %v1466_v12 = vpop.f32.mrb[0].mxu0 }
 0x1d4   : > { %1477 = vst [vmem:[%s5886_s16] sm:$0xff] %v1466_v12  ;;  %v1468_v36 = vpop.f32.mrb[1].mxu0  ;;  %v1487_v53 = vmul.f32 %v1466_v12, %v1466_v12  ;;  %v1481_v24 = vadd.f32 %v1479_v45, %v1466_v12 }
 0x1d5   : > { %1478 = vst [vmem:[%s5886_s16 + $0x8] sm:$0xff] %v1468_v36  ;;  %v1488_v52 = vmul.f32 %v1468_v36, %v1468_v36  ;;  %v1482_v46 = vadd.f32 %v1480_v33, %v1468_v36 }
 0x1d6   : > { %v1489_v34 = vadd.f32 %v1487_v53, %v1485_v55 }
 0x1d7   : > { %v1490_v63 = vadd.f32 %v1488_v52, %v1486_v8 }
 0x1e0   : > { %v1755_v23 = vpop.f32.mrb[0].mxu1 }
 0x1e1   : > { %3878 = vst [vmem:[%s5886_s16 + $0x10] sm:$0xff] %v1755_v23  ;;  %v1770_v0 = vadd.f32 %v1755_v23, %v1481_v24  ;;  %v1776_v5 = vmul.f32 %v1755_v23, %v1755_v23  ;;  %v1757_v14 = vpop.f32.mrb[1].mxu1 }
 0x1e2   : > { %3879 = vst [vmem:[%s5886_s16 + $0x18] sm:$0xff] %v1757_v14  ;;  %v1771_v28 = vadd.f32 %v1757_v14, %v1482_v46  ;;  %v1777_v4 = vmul.f32 %v1757_v14, %v1757_v14  ;;  %v4427_v46 = vmov (!%p3922_p5), 0  }
 0x1e3   : > { %v1778_v27 = vadd.f32 %v1776_v5, %v1489_v34  ;;  %4405 = vset.pattern.permute.xlu1 (!%p3922_p5), %v4427_v46  ;;  %4406 = vset.pattern.permute.xlu0 (!%p3922_p5), %v4427_v46 }
 0x1e4   : > { %v1779_v58 = vadd.f32 %v1777_v4, %v1490_v63 }
 0x20a   : > { %v2044_v62 = vpop.f32.mrb[2].mxu0 }
 0x20b   : > { %3885 = vst [vmem:[%s5886_s16 + $0x20] sm:$0xff] %v2044_v62  ;;  %v2059_v3 = vadd.f32 %v2044_v62, %v1770_v0  ;;  %v2065_v32 = vmul.f32 %v2044_v62, %v2044_v62  ;;  %v2046_v29 = vpop.f32.mrb[3].mxu0 }
 0x20c   : > { %3886 = vst [vmem:[%s5886_s16 + $0x28] sm:$0xff] %v2046_v29  ;;  %v2060_v10 = vadd.f32 %v2046_v29, %v1771_v28  ;;  %v2066_v37 = vmul.f32 %v2046_v29, %v2046_v29 }
 0x20d   : > { %v2067_v30 = vadd.f32 %v2065_v32, %v1778_v27  ;;  %v3534_v27 = vld [vmem:[%s6231_s3] sm:$0xff] (!%p3922_p5) }
 0x20e   : > { %v2068_v59 = vadd.f32 %v2066_v37, %v1779_v58 }
 0x225   : > { %v2333_v35 = vpop.f32.mrb[2].mxu1 }
 0x226   : > { %3892 = vst [vmem:[%s5886_s16 + $0x30] sm:$0xff] %v2333_v35  ;;  %v2348_v42 = vadd.f32 %v2333_v35, %v2059_v3  ;;  %v2354_v1 = vmul.f32 %v2333_v35, %v2333_v35  ;;  %v2335_v26 = vpop.f32.mrb[3].mxu1  ;;  %v3538_v3 = vld [vmem:[%s6232_s4] sm:$0xff] (!%p3922_p5) }
 0x227   : > { %3893 = vst [vmem:[%s5886_s16 + $0x38] sm:$0xff] %v2335_v26  ;;  %v2349_v19 = vadd.f32 %v2335_v26, %v2060_v10  ;;  %v2355_v20 = vmul.f32 %v2335_v26, %v2335_v26 }
 0x228   : > { %v2356_v21 = vadd.f32 %v2354_v1, %v2067_v30 }
 0x229   : > { %v2357_v22 = vadd.f32 %v2355_v20, %v2068_v59 }
 0x245   : > { %v2622_v60 = vpop.f32.mrb[4].mxu0 }
 0x246   : > { %3899 = vst [vmem:[%s5886_s16 + $0x40] sm:$0xff] %v2622_v60  ;;  %v2637_v49 = vadd.f32 %v2622_v60, %v2348_v42  ;;  %v2643_v15 = vmul.f32 %v2622_v60, %v2622_v60  ;;  %v2624_v39 = vpop.f32.mrb[5].mxu0 }
 0x247   : > { %3900 = vst [vmem:[%s5886_s16 + $0x48] sm:$0xff] %v2624_v39  ;;  %v2638_v44 = vadd.f32 %v2624_v39, %v2349_v19  ;;  %v2644_v6 = vmul.f32 %v2624_v39, %v2624_v39 }
 0x248   : > { %v2645_v16 = vadd.f32 %v2643_v15, %v2356_v21 }
 0x249   : > { %v2646_v51 = vadd.f32 %v2644_v6, %v2357_v22 }
 0x265   : > { %v2911_v38 = vpop.f32.mrb[4].mxu1 }
 0x266   : > { %3906 = vst [vmem:[%s5886_s16 + $0x50] sm:$0xff] %v2911_v38  ;;  %v2926_v43 = vadd.f32 %v2911_v38, %v2637_v49  ;;  %v2932_v54 = vmul.f32 %v2911_v38, %v2911_v38  ;;  %v2913_v57 = vpop.f32.mrb[5].mxu1 }
 0x267   : > { %3907 = vst [vmem:[%s5886_s16 + $0x58] sm:$0xff] %v2913_v57  ;;  %v2927_v17 = vadd.f32 %v2913_v57, %v2638_v44  ;;  %v2933_v13 = vmul.f32 %v2913_v57, %v2913_v57 }
 0x268   : > { %v2934_v2 = vadd.f32 %v2932_v54, %v2645_v16 }
 0x269   : > { %v2935_v18 = vadd.f32 %v2933_v13, %v2646_v51 }
 0x286   : > { %v3200_v7 = vpop.f32.mrb[6].mxu0 }
 0x287   : > { %3913 = vst [vmem:[%s5886_s16 + $0x60] sm:$0xff] %v3200_v7  ;;  %v3215_v31 = vadd.f32 %v3200_v7, %v2926_v43  ;;  %v3221_v50 = vmul.f32 %v3200_v7, %v3200_v7  ;;  %v3202_v61 = vpop.f32.mrb[7].mxu0 }
 0x288   : > { %3914 = vst [vmem:[%s5886_s16 + $0x68] sm:$0xff] %v3202_v61  ;;  %v3216_v9 = vadd.f32 %v3202_v61, %v2927_v17  ;;  %v3222_v47 = vmul.f32 %v3202_v61, %v3202_v61 }
 0x289   : > { %v3223_v11 = vadd.f32 %v3221_v50, %v2934_v2 }
 0x28a   : > { %v3224_v41 = vadd.f32 %v3222_v47, %v2935_v18 }
 0x2a6   : > { %v3489_v48 = vpop.f32.mrb[6].mxu1  ;;  %3519 = sbr.rel (%p3922_p5) target bundleno = 1031 (0x407), region = 48 }
 0x2a7   : > { %3920 = vst [vmem:[%s5886_s16 + $0x70] sm:$0xff] %v3489_v48  ;;  %v3504_v40 = vadd.f32 %v3489_v48, %v3215_v31  ;;  %v3510_v56 = vmul.f32 %v3489_v48, %v3489_v48  ;;  %v3491_v25 = vpop.f32.mrb[7].mxu1 }
 0x2a8   : > { %3921 = vst [vmem:[%s5886_s16 + $0x78] sm:$0xff] %v3491_v25  ;;  %v3505_v12 = vadd.f32 %v3491_v25, %v3216_v9  ;;  %v3511_v36 = vmul.f32 %v3491_v25, %v3491_v25 }
 0x2a9   : > { %3506 = vst [vmem:[#allocation3] sm:$0xff] %v3504_v40  ;;  %v3512_v45 = vadd.f32 %v3510_v56, %v3223_v11 }
 0x2aa   : > { %3507 = vst [vmem:[#allocation3 + $0x8] sm:$0xff] %v3505_v12  ;;  %v3513_v53 = vadd.f32 %v3511_v36, %v3224_v41 }
 0x2ab   : > { %3514 = vst [vmem:[#allocation4] sm:$0xff] %v3512_v45 }
 0x2ac   : > { %3515 = vst [vmem:[#allocation4 + $0x8] sm:$0xff] %v3513_v53 }
 0x2af   : > { %v3541_v10 = vld [vmem:[%s6233_s5] sm:$0xff]  ;;  %v3542_v37 = vld [vmem:[%s6233_s5 + $0x8] sm:$0xff]  ;;  %v3543_v30 = vld [vmem:[%s6233_s5 + $0x10] sm:$0xff] }
 0x2b0   : > { %v3520_v55 = vld [vmem:[#allocation3] sm:$0xff]  ;;  %v3544_v59 = vld [vmem:[%s6233_s5 + $0x18] sm:$0xff]  ;;  %v3546_v42 = vld [vmem:[%s6233_s5 + $0x28] sm:$0xff] }
 0x2b1   : > { %v3521_v24 = vld [vmem:[#allocation3 + $0x8] sm:$0xff]  ;;  %v3545_v35 = vld [vmem:[%s6233_s5 + $0x20] sm:$0xff]  ;;  %v3547_v1 = vld [vmem:[%s6233_s5 + $0x30] sm:$0xff] }
 0x2b2   : > { %v3526_v33 = vld [vmem:[#allocation4] sm:$0xff]  ;;  %v3522_v52 = vadd.f32 %v3521_v24, %v3520_v55  ;;  %v3548_v26 = vld [vmem:[%s6233_s5 + $0x38] sm:$0xff]  ;;  %v3549_v19 = vld [vmem:[%s6233_s5 + $0x40] sm:$0xff] }
 0x2b3   : > { %v3527_v34 = vld [vmem:[#allocation4 + $0x8] sm:$0xff]  ;;  %v3550_v20 = vld [vmem:[%s6233_s5 + $0x48] sm:$0xff]  ;;  %v3551_v21 = vld [vmem:[%s6233_s5 + $0x50] sm:$0xff] }
 0x2b4   : > { %3523 = vadd.xlane.f32.xlu0 %v3522_v52  ;;  %v3528_v8 = vadd.f32 %v3527_v34, %v3526_v33  ;;  %v3552_v22 = vld [vmem:[%s6233_s5 + $0x58] sm:$0xff]  ;;  %v3553_v60 = vld [vmem:[%s6233_s5 + $0x60] sm:$0xff]  ;;  %v3554_v49 = vld [vmem:[%s6233_s5 + $0x68] sm:$0xff] }
 0x2b5   : > { %v3555_v39 = vld [vmem:[%s6233_s5 + $0x70] sm:$0xff]  ;;  %v3556_v44 = vld [vmem:[%s6233_s5 + $0x78] sm:$0xff]  ;;  %v3923_v6 = vld [vmem:[%s6233_s5 + $0x80] sm:$0xff] }
 0x2b6   : > { %v3924_v54 = vld [vmem:[%s6233_s5 + $0x88] sm:$0xff]  ;;  %v3925_v57 = vld [vmem:[%s6233_s5 + $0x90] sm:$0xff]  ;;  %v3926_v17 = vld [vmem:[%s6233_s5 + $0x98] sm:$0xff] }
 0x2b7   : > { %v3927_v31 = vld [vmem:[%s6233_s5 + $0xa0] sm:$0xff]  ;;  %v3928_v50 = vld [vmem:[%s6233_s5 + $0xa8] sm:$0xff]  ;;  %v3929_v61 = vld [vmem:[%s6233_s5 + $0xb0] sm:$0xff] }
 0x2b8   : > { %3529 = vadd.xlane.f32.xlu0 %v3528_v8  ;;  %v3930_v48 = vld [vmem:[%s6233_s5 + $0xb8] sm:$0xff]  ;;  %v3931_v40 = vld [vmem:[%s6233_s5 + $0xc0] sm:$0xff]  ;;  %v3932_v56 = vld [vmem:[%s6233_s5 + $0xc8] sm:$0xff] }
 0x2b9   : > { %v3933_v53 = vld [vmem:[%s6233_s5 + $0xd0] sm:$0xff]  ;;  %v3934_v55 = vld [vmem:[%s6233_s5 + $0xd8] sm:$0xff]  ;;  %v3935_v24 = vld [vmem:[%s6233_s5 + $0xe0] sm:$0xff] }
 0x2ba   : > { %v3936_v33 = vld [vmem:[%s6233_s5 + $0xe8] sm:$0xff]  ;;  %v3937_v52 = vld [vmem:[%s6233_s5 + $0xf0] sm:$0xff]  ;;  %v3938_v34 = vld [vmem:[%s6233_s5 + $0xf8] sm:$0xff] }
 0x341   : > { %v3524_v23 = vpop.xlane.xlu0 %3523 }
 0x342   : > { %v3525_v0 = vmul.f32 0.00024414063, %v3524_v23 }
 0x344   : > { %v3532_v14 = vmul.f32 %v3525_v0, %v3525_v0 }
 0x345   : > { %v3530_v5 = vpop.xlane.xlu0 %3529 }
 0x346   : > { %v3531_v63 = vmul.f32 0.00024414063, %v3530_v5 }
 0x348   : > { %v3533_v28 = vsub.f32 %v3531_v63, %v3532_v14 }
 0x34a   : > { %v3535_v4 = vadd.f32 1e-05, %v3533_v28 }
 0x34c   : > { %4407 = vrsqrt.f32 %v3535_v4 }
 0x356   : > { %v4408_v58 = vpop.eup %4407 }
 0x357   : > { %v3537_v62 = vmul.f32 %v4408_v58, %v3534_v27 }
 0x359   : > { %3559 = vperm.xlu1 %4405, %v3537_v62   ;;  %v3539_v32 = vmul.f32 %v3537_v62, %v3525_v0 }
 0x35b   : > { %v3540_v29 = vsub.f32 %v3538_v3, %v3539_v32 }
 0x35d   : > { %3580 = vperm.xlu1 %4405, %v3540_v29  }
 0x3d8   : > { %v3560_v15 = vpop.permute.xlu1 %3559 }
 0x3d9   : > { %v3562_v16 = vmul.f32 %v3560_v15, %v3541_v10  ;;  %v3563_v51 = vmul.f32 %v3560_v15, %v3542_v37  ;;  %v3564_v38 = vmul.f32 %v3560_v15, %v3543_v30  ;;  %v3565_v43 = vmul.f32 %v3560_v15, %v3544_v59 }
 0x3da   : > { %v3566_v13 = vmul.f32 %v3560_v15, %v3545_v35  ;;  %v3567_v2 = vmul.f32 %v3560_v15, %v3546_v42  ;;  %v3568_v18 = vmul.f32 %v3560_v15, %v3547_v1  ;;  %v3569_v7 = vmul.f32 %v3560_v15, %v3548_v26 }
 0x3db   : > { %v3570_v9 = vmul.f32 %v3560_v15, %v3549_v19  ;;  %v3571_v47 = vmul.f32 %v3560_v15, %v3550_v20  ;;  %v3572_v11 = vmul.f32 %v3560_v15, %v3551_v21  ;;  %v3573_v41 = vmul.f32 %v3560_v15, %v3552_v22 }
 0x3dc   : > { %v3574_v25 = vmul.f32 %v3560_v15, %v3553_v60  ;;  %v3575_v12 = vmul.f32 %v3560_v15, %v3554_v49  ;;  %v3576_v36 = vmul.f32 %v3560_v15, %v3555_v39  ;;  %v3577_v45 = vmul.f32 %v3560_v15, %v3556_v44  ;;  %v6021_v4 = vpop.permute.xlu1 %3580 }
 0x3dd   : > { %v3680_v8 = vmul.f32 %v3923_v6, %v3560_v15  ;;  %v3681_v46 = vmul.f32 %v3924_v54, %v3560_v15  ;;  %v6009_v23 = vmul.f32 %v3925_v57, %v3560_v15  ;;  %v6011_v0 = vmul.f32 %v3926_v17, %v3560_v15 }
 0x3de   : > { %v6013_v5 = vmul.f32 %v3927_v31, %v3560_v15  ;;  %v6015_v14 = vmul.f32 %v3928_v50, %v3560_v15  ;;  %v6017_v63 = vmul.f32 %v3929_v61, %v3560_v15  ;;  %v6019_v28 = vmul.f32 %v3930_v48, %v3560_v15 }
 0x3df   : > { %v6023_v27 = vmul.f32 %v3931_v40, %v3560_v15  ;;  %v6025_v58 = vmul.f32 %v3932_v56, %v3560_v15  ;;  %v6027_v62 = vmul.f32 %v3933_v53, %v3560_v15  ;;  %v6029_v3 = vmul.f32 %v3934_v55, %v3560_v15 }
 0x3e0   : > { %v6031_v32 = vmul.f32 %v3935_v24, %v3560_v15  ;;  %v6033_v29 = vmul.f32 %v3936_v33, %v3560_v15  ;;  %v6035_v10 = vmul.f32 %v3937_v52, %v3560_v15  ;;  %v6037_v37 = vmul.f32 %v3938_v34, %v3560_v15 }
 0x3e1   : > { %v3583_v30 = vadd.f32 %v6021_v4, %v3562_v16  ;;  %v3584_v59 = vadd.f32 %v6021_v4, %v3563_v51  ;;  %v3585_v35 = vadd.f32 %v6021_v4, %v3564_v38  ;;  %v3586_v42 = vadd.f32 %v6021_v4, %v3565_v43 }
 0x3e2   : > { %v3587_v1 = vadd.f32 %v6021_v4, %v3566_v13  ;;  %v3588_v26 = vadd.f32 %v6021_v4, %v3567_v2  ;;  %v3589_v19 = vadd.f32 %v6021_v4, %v3568_v18  ;;  %v3590_v20 = vadd.f32 %v6021_v4, %v3569_v7 }
 0x3e3   : > { %v3591_v21 = vadd.f32 %v6021_v4, %v3570_v9  ;;  %v3592_v22 = vadd.f32 %v6021_v4, %v3571_v47  ;;  %v3593_v60 = vadd.f32 %v6021_v4, %v3572_v11  ;;  %v3594_v49 = vadd.f32 %v6021_v4, %v3573_v41 }
 0x3e4   : > { %v3595_v15 = vadd.f32 %v6021_v4, %v3574_v25  ;;  %v3596_v39 = vadd.f32 %v6021_v4, %v3575_v12  ;;  %v3597_v44 = vadd.f32 %v6021_v4, %v3576_v36  ;;  %v3598_v6 = vadd.f32 %v6021_v4, %v3577_v45 }
 0x3e5   : > { %vm3599_vm9 = vcmp.ge.f32.partialorder %v3583_v30, 0.0  ;;  %vm3600_vm10 = vcmp.ge.f32.partialorder %v3584_v59, 0.0  ;;  %vm3601_vm11 = vcmp.ge.f32.partialorder %v3585_v35, 0.0  ;;  %vm3602_vm12 = vcmp.ge.f32.partialorder %v3586_v42, 0.0 }
 0x3e6   : > { %vm3603_vm13 = vcmp.ge.f32.partialorder %v3587_v1, 0.0  ;;  %vm3604_vm14 = vcmp.ge.f32.partialorder %v3588_v26, 0.0  ;;  %vm3605_vm15 = vcmp.ge.f32.partialorder %v3589_v19, 0.0  ;;  %vm3606_vm0 = vcmp.ge.f32.partialorder %v3590_v20, 0.0 }
 0x3e7   : > { %vm3607_vm1 = vcmp.ge.f32.partialorder %v3591_v21, 0.0  ;;  %vm3608_vm2 = vcmp.ge.f32.partialorder %v3592_v22, 0.0  ;;  %vm3609_vm3 = vcmp.ge.f32.partialorder %v3593_v60, 0.0  ;;  %vm3610_vm4 = vcmp.ge.f32.partialorder %v3594_v49, 0.0 }
 0x3e8   : > { %vm3611_vm5 = vcmp.ge.f32.partialorder %v3595_v15, 0.0  ;;  %vm3612_vm6 = vcmp.ge.f32.partialorder %v3596_v39, 0.0  ;;  %vm3613_vm7 = vcmp.ge.f32.partialorder %v3597_v44, 0.0  ;;  %vm3614_vm8 = vcmp.ge.f32.partialorder %v3598_v6, 0.0 }
 0x3e9   : > { %v3615_v16 = vmul.f32 0.01, %v3583_v30  ;;  %v3616_v51 = vmul.f32 0.01, %v3584_v59  ;;  %v3617_v38 = vmul.f32 0.01, %v3585_v35  ;;  %v6056_v43 = vadd.f32 %v3680_v8, %v6021_v4 }
 0x3ea   : > { %v3618_v54 = vmul.f32 0.01, %v3586_v42  ;;  %v3619_v57 = vmul.f32 0.01, %v3587_v1  ;;  %v3620_v17 = vmul.f32 0.01, %v3588_v26  ;;  %v6059_v13 = vadd.f32 %v3681_v46, %v6021_v4 }
 0x3eb   : > { %v3621_v2 = vmul.f32 0.01, %v3589_v19  ;;  %v3622_v18 = vmul.f32 0.01, %v3590_v20  ;;  %v3623_v7 = vmul.f32 0.01, %v3591_v21  ;;  %v3631_v31 = vsel %vm3599_vm9, %v3583_v30, %v3615_v16 }
 0x3ec   : > { %v3624_v50 = vmul.f32 0.01, %v3592_v22  ;;  %v3625_v61 = vmul.f32 0.01, %v3593_v60  ;;  %v3626_v9 = vmul.f32 0.01, %v3594_v49  ;;  %v3632_v47 = vsel %vm3600_vm10, %v3584_v59, %v3616_v51  ;;  %3647 = vst [vmem:[%s6233_s5] sm:$0xff] %v3631_v31 }
 0x3ed   : > { %v3627_v11 = vmul.f32 0.01, %v3595_v15  ;;  %v3628_v41 = vmul.f32 0.01, %v3596_v39  ;;  %v3629_v48 = vmul.f32 0.01, %v3597_v44  ;;  %v3633_v40 = vsel %vm3601_vm11, %v3585_v35, %v3617_v38 }
 0x3ee   : > { %3648 = vst [vmem:[%s6233_s5 + $0x8] sm:$0xff] %v3632_v47  ;;  %v3630_v56 = vmul.f32 0.01, %v3598_v6  ;;  %v3634_v25 = vsel %vm3602_vm12, %v3586_v42, %v3618_v54  ;;  %v3635_v12 = vsel %vm3603_vm13, %v3587_v1, %v3619_v57  ;;  %v3636_v36 = vsel %vm3604_vm14, %v3588_v26, %v3620_v17  ;;  %3649 = vst [vmem:[%s6233_s5 + $0x10] sm:$0xff] %v3633_v40 }
 0x3ef   : > { %v3637_v45 = vsel %vm3605_vm15, %v3589_v19, %v3621_v2  ;;  %v3638_v53 = vsel %vm3606_vm0, %v3590_v20, %v3622_v18  ;;  %v3639_v55 = vsel %vm3607_vm1, %v3591_v21, %v3623_v7  ;;  %v3640_v24 = vsel %vm3608_vm2, %v3592_v22, %v3624_v50  ;;  %3650 = vst [vmem:[%s6233_s5 + $0x18] sm:$0xff] %v3634_v25 }
 0x3f0   : > { %3651 = vst [vmem:[%s6233_s5 + $0x20] sm:$0xff] %v3635_v12  ;;  %3652 = vst [vmem:[%s6233_s5 + $0x28] sm:$0xff] %v3636_v36  ;;  %v3641_v33 = vsel %vm3609_vm3, %v3593_v60, %v3625_v61  ;;  %v3642_v52 = vsel %vm3610_vm4, %v3594_v49, %v3626_v9  ;;  %v3643_v34 = vsel %vm3611_vm5, %v3595_v15, %v3627_v11  ;;  %vm3712_vm9 = vcmp.ge.f32.partialorder %v6056_v43, 0.0 }
 0x3f1   : > { %v3644_v8 = vsel %vm3612_vm6, %v3596_v39, %v3628_v41  ;;  %3653 = vst [vmem:[%s6233_s5 + $0x30] sm:$0xff] %v3637_v45  ;;  %3654 = vst [vmem:[%s6233_s5 + $0x38] sm:$0xff] %v3638_v53  ;;  %v3645_v46 = vsel %vm3613_vm7, %v3597_v44, %v3629_v48  ;;  %v3646_v30 = vsel %vm3614_vm8, %v3598_v6, %v3630_v56  ;;  %vm3713_vm10 = vcmp.ge.f32.partialorder %v6059_v13, 0.0 }
 0x3f2   : > { %3655 = vst [vmem:[%s6233_s5 + $0x40] sm:$0xff] %v3639_v55  ;;  %3656 = vst [vmem:[%s6233_s5 + $0x48] sm:$0xff] %v3640_v24  ;;  %v3698_v59 = vadd.f32 %v6009_v23, %v6021_v4  ;;  %v3699_v35 = vadd.f32 %v6011_v0, %v6021_v4  ;;  %v3700_v42 = vadd.f32 %v6013_v5, %v6021_v4 }
 0x3f3   : > { %3657 = vst [vmem:[%s6233_s5 + $0x50] sm:$0xff] %v3641_v33  ;;  %3658 = vst [vmem:[%s6233_s5 + $0x58] sm:$0xff] %v3642_v52  ;;  %v3701_v1 = vadd.f32 %v6015_v14, %v6021_v4  ;;  %v3702_v23 = vadd.f32 %v6017_v63, %v6021_v4  ;;  %v3703_v0 = vadd.f32 %v6019_v28, %v6021_v4 }
 0x3f4   : > { %3659 = vst [vmem:[%s6233_s5 + $0x60] sm:$0xff] %v3643_v34  ;;  %3660 = vst [vmem:[%s6233_s5 + $0x68] sm:$0xff] %v3644_v8  ;;  %v3704_v26 = vadd.f32 %v6023_v27, %v6021_v4  ;;  %v3705_v19 = vadd.f32 %v6025_v58, %v6021_v4  ;;  %v3706_v20 = vadd.f32 %v6027_v62, %v6021_v4  ;;  %vm3714_vm11 = vcmp.ge.f32.partialorder %v3698_v59, 0.0 }
 0x3f5   : > { %3661 = vst [vmem:[%s6233_s5 + $0x70] sm:$0xff] %v3645_v46  ;;  %3662 = vst [vmem:[%s6233_s5 + $0x78] sm:$0xff] %v3646_v30  ;;  %v3707_v5 = vadd.f32 %v6029_v3, %v6021_v4  ;;  %v3708_v14 = vadd.f32 %v6031_v32, %v6021_v4  ;;  %v3709_v63 = vadd.f32 %v6033_v29, %v6021_v4  ;;  %vm3715_vm12 = vcmp.ge.f32.partialorder %v3699_v35, 0.0 }
 0x3f6   : > { %v3710_v28 = vadd.f32 %v6035_v10, %v6021_v4  ;;  %v3711_v27 = vadd.f32 %v6037_v37, %v6021_v4  ;;  %vm3716_vm13 = vcmp.ge.f32.partialorder %v3700_v42, 0.0  ;;  %vm3717_vm14 = vcmp.ge.f32.partialorder %v3701_v1, 0.0 }
 0x3f7   : > { %vm3718_vm15 = vcmp.ge.f32.partialorder %v3702_v23, 0.0  ;;  %vm3719_vm0 = vcmp.ge.f32.partialorder %v3703_v0, 0.0  ;;  %vm3720_vm1 = vcmp.ge.f32.partialorder %v3704_v26, 0.0  ;;  %vm3721_vm2 = vcmp.ge.f32.partialorder %v3705_v19, 0.0 }
 0x3f8   : > { %vm3722_vm3 = vcmp.ge.f32.partialorder %v3706_v20, 0.0  ;;  %vm3723_vm4 = vcmp.ge.f32.partialorder %v3707_v5, 0.0  ;;  %vm3724_vm5 = vcmp.ge.f32.partialorder %v3708_v14, 0.0  ;;  %vm3725_vm6 = vcmp.ge.f32.partialorder %v3709_v63, 0.0 }
 0x3f9   : > { %vm3726_vm7 = vcmp.ge.f32.partialorder %v3710_v28, 0.0  ;;  %vm3727_vm8 = vcmp.ge.f32.partialorder %v3711_v27, 0.0  ;;  %v3728_v4 = vmul.f32 0.01, %v6056_v43  ;;  %v3729_v58 = vmul.f32 0.01, %v6059_v13 }
 0x3fa   : > { %v3730_v62 = vmul.f32 0.01, %v3698_v59  ;;  %v3731_v3 = vmul.f32 0.01, %v3699_v35  ;;  %v3732_v32 = vmul.f32 0.01, %v3700_v42 }
 0x3fb   : > { %v3733_v29 = vmul.f32 0.01, %v3701_v1  ;;  %v3734_v10 = vmul.f32 0.01, %v3702_v23  ;;  %v3735_v37 = vmul.f32 0.01, %v3703_v0  ;;  %v3744_v22 = vsel %vm3712_vm9, %v6056_v43, %v3728_v4 }
 0x3fc   : > { %v3736_v21 = vmul.f32 0.01, %v3704_v26  ;;  %v3737_v60 = vmul.f32 0.01, %v3705_v19  ;;  %v3738_v49 = vmul.f32 0.01, %v3706_v20  ;;  %v3745_v39 = vsel %vm3713_vm10, %v6059_v13, %v3729_v58 }
 0x3fd   : > { %v3739_v15 = vmul.f32 0.01, %v3707_v5  ;;  %3939 = vst [vmem:[%s6233_s5 + $0x80] sm:$0xff] %v3744_v22  ;;  %v3740_v44 = vmul.f32 0.01, %v3708_v14  ;;  %v3746_v51 = vsel %vm3714_vm11, %v3698_v59, %v3730_v62  ;;  %3940 = vst [vmem:[%s6233_s5 + $0x88] sm:$0xff] %v3745_v39  ;;  %v3747_v43 = vsel %vm3715_vm12, %v3699_v35, %v3731_v3 }
 0x3fe   : > { %v3741_v6 = vmul.f32 0.01, %v3709_v63  ;;  %v3742_v16 = vmul.f32 0.01, %v3710_v28  ;;  %v3743_v38 = vmul.f32 0.01, %v3711_v27  ;;  %v3748_v54 = vsel %vm3716_vm13, %v3700_v42, %v3732_v32 }
 0x3ff   : > { %v3749_v57 = vsel %vm3717_vm14, %v3701_v1, %v3733_v29  ;;  %3941 = vst [vmem:[%s6233_s5 + $0x90] sm:$0xff] %v3746_v51  ;;  %v3750_v17 = vsel %vm3718_vm15, %v3702_v23, %v3734_v10  ;;  %v3751_v13 = vsel %vm3719_vm0, %v3703_v0, %v3735_v37  ;;  %v3752_v2 = vsel %vm3720_vm1, %v3704_v26, %v3736_v21 }
 0x400   : > { %v3753_v18 = vsel %vm3721_vm2, %v3705_v19, %v3737_v60  ;;  %3942 = vst [vmem:[%s6233_s5 + $0x98] sm:$0xff] %v3747_v43  ;;  %3943 = vst [vmem:[%s6233_s5 + $0xa0] sm:$0xff] %v3748_v54  ;;  %v3754_v7 = vsel %vm3722_vm3, %v3706_v20, %v3738_v49  ;;  %v3755_v31 = vsel %vm3723_vm4, %v3707_v5, %v3739_v15 }
 0x401   : > { %3944 = vst [vmem:[%s6233_s5 + $0xa8] sm:$0xff] %v3749_v57  ;;  %v3756_v50 = vsel %vm3724_vm5, %v3708_v14, %v3740_v44  ;;  %v3757_v61 = vsel %vm3725_vm6, %v3709_v63, %v3741_v6  ;;  %3945 = vst [vmem:[%s6233_s5 + $0xb0] sm:$0xff] %v3750_v17  ;;  %v3758_v9 = vsel %vm3726_vm7, %v3710_v28, %v3742_v16 }
 0x402   : > { %3946 = vst [vmem:[%s6233_s5 + $0xb8] sm:$0xff] %v3751_v13  ;;  %3947 = vst [vmem:[%s6233_s5 + $0xc0] sm:$0xff] %v3752_v2  ;;  %v3759_v47 = vsel %vm3727_vm8, %v3711_v27, %v3743_v38 }
 0x403   : > { %3948 = vst [vmem:[%s6233_s5 + $0xc8] sm:$0xff] %v3753_v18  ;;  %3949 = vst [vmem:[%s6233_s5 + $0xd0] sm:$0xff] %v3754_v7 }
 0x404   : > { %3950 = vst [vmem:[%s6233_s5 + $0xd8] sm:$0xff] %v3755_v31  ;;  %3951 = vst [vmem:[%s6233_s5 + $0xe0] sm:$0xff] %v3756_v50 }
 0x405   : > { %3952 = vst [vmem:[%s6233_s5 + $0xe8] sm:$0xff] %v3757_v61  ;;  %3953 = vst [vmem:[%s6233_s5 + $0xf0] sm:$0xff] %v3758_v9 }
 0x406   : > { %3954 = vst [vmem:[%s6233_s5 + $0xf8] sm:$0xff] %v3759_v47 }
 0x407 PF: > { %s15_s18 = sadd.s32 1, %s4415_s18  }
 0x408   : > { %p12_p6 = scmp.ge.s32.totalorder %s15_s18, 4  }
 0x40a   :  { %14 = sbr.rel (!%p12_p6) target bundleno = 1 (0x1), region = 110 }

</bundles_post_ra>
